<compile_context>
chip_gen: v7x
topology: tpu7x:2x2x1
jax: 0.10.0
libtpu: 0.0.40
codegen_flags: <defaults>
</compile_context>

<pallas_src>
import math
import functools

import jax
import jax.numpy as jnp
import numpy as np
from jax.experimental import pallas as pl
from jax.experimental.pallas import tpu as pltpu

# Only used by the pure-JAX reference recurrence / final projection, mirroring the exact-f32
# matmuls done inside the Pallas kernels (review correctness note: keep precision consistent).
_HI = jax.lax.Precision.HIGHEST


def _round_up(x, m):
    return ((x + m - 1) // m) * m


# ----------------------------------------------------------------------------
# Pallas kernels
# ----------------------------------------------------------------------------
def _sigmoid(x):
    # One EUP op (tanh) instead of exp + reciprocal (perf review: cut EUP work per step).
    return 0.5 * jnp.tanh(0.5 * x) + 0.5


def _lstm_chunk_kernel(gxf_ref, gxb_ref, whh_ref, outf_ref, outb_ref,
                       hf_sc, cf_sc, hb_sc, cb_sc, *, Tc, H, unroll):
    """Both directions of one BiLSTM layer, one chunk of Tc timesteps.

    grid = (NC,), serial over time chunks ("arbitrary").

    gxf_ref : (Tc, B, 4H)  fwd precomputed input gates for chunk c         (bf16 or f32)
    gxb_ref : (Tc, B, 4H)  bwd precomputed input gates for chunk NC-1-c    (natural order)
    whh_ref : (2, H, 4H)   recurrent weights, pre-transposed, VMEM-resident across chunks
    outf_ref: (Tc, B, H)   fwd hidden outputs, natural time order
    outb_ref: (Tc, B, H)   bwd hidden outputs, natural time order
    *_sc    : (B, H) f32   recurrent state, persists across chunks
    """
    c = pl.program_id(0)

    @pl.when(c == 0)
    def _():
        hf_sc[...] = jnp.zeros_like(hf_sc)
        cf_sc[...] = jnp.zeros_like(cf_sc)
        hb_sc[...] = jnp.zeros_like(hb_sc)
        cb_sc[...] = jnp.zeros_like(cb_sc)

    whh_f = whh_ref[0]   # (H, 4H), loaded once per chunk (loop-invariant)
    whh_b = whh_ref[1]

    def cell(gates, c_prev):
        # PyTorch gate order i, f, g, o.
        # TODO(synk): at production shapes make H a multiple of 128 so these gate slices and
        # the (B, H) stores are full-lane ops instead of intra-vreg lane selects.
        i = _sigmoid(gates[:, 0 * H:1 * H])
        f = _sigmoid(gates[:, 1 * H:2 * H])
        g = jnp.tanh(gates[:, 2 * H:3 * H])
        o = _sigmoid(gates[:, 3 * H:4 * H])
        c_new = f * c_prev + i * g
        h_new = o * jnp.tanh(c_new)
        return h_new, c_new

    def body(s, carry):
        sb = Tc - 1 - s   # backward direction walks its (time-reversed) chunk in reverse
        # Two independent (B,H)@(H,4H) dots + gate chains: the scheduler interleaves the two
        # directions, hiding each serial MXU->EUP latency chain behind the other (1-TC chips).
        gf = gxf_ref[s].astype(jnp.float32) + jnp.dot(
            hf_sc[...], whh_f, preferred_element_type=jnp.float32)
        gb = gxb_ref[sb].astype(jnp.float32) + jnp.dot(
            hb_sc[...], whh_b, preferred_element_type=jnp.float32)
        hf, cf = cell(gf, cf_sc[...])
        hb, cb = cell(gb, cb_sc[...])
        hf_sc[...] = hf
        cf_sc[...] = cf
        hb_sc[...] = hb
        cb_sc[...] = cb
        outf_ref[s] = hf
        outb_ref[sb] = hb
        return carry

    jax.lax.fori_loop(0, Tc, body, 0, unroll=unroll)


def _proj_kernel(hf_ref, hb_ref, w_ref, b_ref, out_ref):
    """Mean over the two LSTM directions followed by the Linear projection.

    hf_ref/hb_ref : (bn, H)  forward / backward hidden states (row tile)
    w_ref         : (H, Cp)  projection weight, zero-padded to a lane-dense Cp
    b_ref         : (1, Cp)  projection bias (zero padded)
    out_ref       : (bn, Cp)
    """
    mean_h = (hf_ref[...] + hb_ref[...]) * 0.5
    out_ref[...] = (
        jnp.dot(mean_h, w_ref[...], preferred_element_type=jnp.float32) + b_ref[...]
    )


# ----------------------------------------------------------------------------
# Per-generation sizing
# ----------------------------------------------------------------------------
def _vmem_limit_bytes():
    """Explicit scoped-VMEM limit, co-tuned with the chunk size Tc (perf review)."""
    kind = ""
    try:
        kind = jax.devices()[0].device_kind.lower()
    except Exception:
        pass
    if "v7" in kind or "7x" in kind:
        return 48 * 1024 * 1024          # 64 MiB physical per TC on v7x -> leave headroom
    if "v6" in kind or "v5" in kind:
        return 100 * 1024 * 1024         # 128 MiB physical VMEM on v5e/v5p/v6e
    return None                          # unknown generation: keep the compiler default


def _choose_chunk(T, B, H, gate_bytes, vmem_budget, max_chunk=None):
    """Largest Tc (timesteps per grid step) fitting the VMEM budget, plus the padded T."""
    # Double-buffered pipelined blocks: 2 dirs x 2 bufs x gx + 2 dirs x 2 bufs x out,
    # plus the resident recurrent weights and the four (B,H) state scratch buffers.
    fixed = 2 * H * (4 * H) * 4 + 4 * B * H * 4
    per_t = 2 * 2 * B * (4 * H) * gate_bytes + 2 * 2 * B * H * 4
    tc = max(1, int(max(vmem_budget - fixed, per_t) // per_t))
    if tc >= 8:
        tc = (tc // 8) * 8
    cap = 128 if max_chunk is None else max_chunk
    tc = min(tc, cap, _round_up(T, 8))
    tp = _round_up(T, tc)
    return tc, tp


# ----------------------------------------------------------------------------
# Wrappers
# ----------------------------------------------------------------------------
def bilstm_layer(gx_f, gx_b, whh_stack, *, Tc, vmem_limit):
    """One bidirectional LSTM layer (both directions interleaved in one kernel).

    gx_f, gx_b : (Tp, B, 4H) precomputed input gates (fwd / bwd), bf16 or f32
    whh_stack  : (2, H, 4H)  recurrent weights (pre-transposed), f32
    returns    : (h_f, h_b), each (Tp, B, H) f32, natural time order
    """
    Tp, B, G = gx_f.shape
    H = G // 4
    NC = Tp // Tc
    unroll = 8 if Tc % 8 == 0 else 1
    kernel = functools.partial(_lstm_chunk_kernel, Tc=Tc, H=H, unroll=unroll)

    return pl.pallas_call(
        kernel,
        out_shape=(jax.ShapeDtypeStruct((Tp, B, H), jnp.float32),
                   jax.ShapeDtypeStruct((Tp, B, H), jnp.float32)),
        grid=(NC,),
        in_specs=[
            # TODO(synk): on v5e add pipeline_mode=pl.Buffered(3) here if profiling shows
            # exposed DMA on the gate stream.
            pl.BlockSpec((Tc, B, G), lambda c: (c, 0, 0)),
            # Backward direction reads time-reversed chunks via the index_map -> no [::-1]
            # copies of activations ever hit HBM.
            pl.BlockSpec((Tc, B, G), lambda c: (NC - 1 - c, 0, 0)),
            # Constant block index -> weights DMA'd once and stay VMEM-resident.
            pl.BlockSpec((2, H, G), lambda c: (0, 0, 0)),
        ],
        out_specs=(
            pl.BlockSpec((Tc, B, H), lambda c: (c, 0, 0)),
            pl.BlockSpec((Tc, B, H), lambda c: (NC - 1 - c, 0, 0)),
        ),
        scratch_shapes=[pltpu.VMEM((B, H), jnp.float32)] * 4,
        compiler_params=pltpu.CompilerParams(
            dimension_semantics=("arbitrary",),
            vmem_limit_bytes=vmem_limit,
        ),
    )(gx_f, gx_b, whh_stack)


def _precompute_gates(layer_in, lp, H, layer_idx, gate_dtype):
    """Hoisted input projection x @ W_ih^T + (b_ih + b_hh), both directions.

    Default MXU precision (bf16 operands, f32 accumulate) — HIGHEST was a 3-6x MXU-pass
    penalty on the model's dominant FLOPs (perf review item #1).
    layer 0   : layer_in is (T, B, D)
    layer > 0 : layer_in is (h_fwd, h_bwd), each (T, B, H); the concat with W_ih (4H, 2H)
                is expressed as two matmuls with the W_ih halves (no (T,B,2H) concat).
    returns   : gx_f, gx_b of shape (T, B, 4H) in gate_dtype (bf16 halves the HBM stream).
    """
    b_f = (lp["b_ih_f"] + lp["b_hh_f"]).astype(jnp.float32)
    b_b = (lp["b_ih_b"] + lp["b_hh_b"]).astype(jnp.float32)

    if layer_idx == 0:
        x = layer_in  # (T, B, D)
        gx_f = jnp.einsum("tbd,gd->tbg", x, lp["w_ih_f"]) + b_f
        gx_b = jnp.einsum("tbd,gd->tbg", x, lp["w_ih_b"]) + b_b
    else:
        hf, hb = layer_in  # (T, B, H) each
        gx_f = (jnp.einsum("tbh,gh->tbg", hf, lp["w_ih_f"][:, :H])
                + jnp.einsum("tbh,gh->tbg", hb, lp["w_ih_f"][:, H:]) + b_f)
        gx_b = (jnp.einsum("tbh,gh->tbg", hf, lp["w_ih_b"][:, :H])
                + jnp.einsum("tbh,gh->tbg", hb, lp["w_ih_b"][:, H:]) + b_b)
    return gx_f.astype(gate_dtype), gx_b.astype(gate_dtype)


def _pad_time_gates(gx, Tp, H):
    """Pad the time axis to Tp with steps whose i/f gate pre-activations are -1e9.

    With i = f = 0 the cell keeps h = c = 0 through padded steps, so the backward direction
    (which consumes the padded tail FIRST) starts its real steps from a clean zero state;
    padded outputs are sliced away afterwards.
    """
    T, B, _ = gx.shape
    if Tp == T:
        return gx
    neg = jnp.full((Tp - T, B, 2 * H), -1e9, gx.dtype)   # i, f gates -> sigmoid = 0
    zer = jnp.zeros((Tp - T, B, 2 * H), gx.dtype)        # g, o gates (irrelevant)
    return jnp.concatenate([gx, jnp.concatenate([neg, zer], axis=-1)], axis=0)


def proj_mean_directions(h_f, h_b, w_p, b_p, *, block_rows=256):
    """(mean of directions) @ W_p^T + b_p as a tiled Pallas kernel, lane-dense output.

    h_f, h_b : (T, B, H);  w_p : (C, H);  b_p : (C,)
    returns  : (T, B, C) float32
    """
    T, B, H = h_f.shape
    C = w_p.shape[0]
    N = T * B
    Cp = _round_up(C, 128)                 # lane-dense (unmasked 128-lane) output stores

    bn = block_rows if N >= block_rows else _round_up(N, 8)
    Np = _round_up(N, bn)

    hf = h_f.reshape(N, H)
    hb = h_b.reshape(N, H)
    if Np != N:
        hf = jnp.pad(hf, ((0, Np - N), (0, 0)))
        hb = jnp.pad(hb, ((0, Np - N), (0, 0)))

    w_t = jnp.zeros((H, Cp), jnp.float32).at[:, :C].set(
        jnp.transpose(w_p).astype(jnp.float32))
    b2 = jnp.zeros((1, Cp), jnp.float32).at[:, :C].set(b_p.astype(jnp.float32))

    out = pl.pallas_call(
        _proj_kernel,
        out_shape=jax.ShapeDtypeStruct((Np, Cp), jnp.float32),
        grid=(Np // bn,),
        in_specs=[
            pl.BlockSpec((bn, H), lambda i: (i, 0)),
            pl.BlockSpec((bn, H), lambda i: (i, 0)),
            pl.BlockSpec((H, Cp), lambda i: (0, 0)),
            pl.BlockSpec((1, Cp), lambda i: (0, 0)),
        ],
        out_specs=pl.BlockSpec((bn, Cp), lambda i: (i, 0)),
        compiler_params=pltpu.CompilerParams(dimension_semantics=("parallel",)),
    )(hf, hb, w_t, b2)
    return out[:N, :C].reshape(T, B, C)


def bilstm_forward(tokens, mask, params, *, gate_dtype=jnp.bfloat16, max_chunk=None):
    """Replicates BiLSTM.forward.

    tokens : (B, T) int32 token ids
    mask   : (B, T) bool (True = padding, as in NestedTensor)
    returns (output (B, T, C) float32, inverted mask (B, T) bool)
    """
    B, T = tokens.shape
    emb = jnp.take(params["embedding"], tokens, axis=0)          # glue: gather
    x = jnp.transpose(emb, (1, 0, 2)).astype(jnp.float32)        # (T, B, D) time-major

    Bp = _round_up(B, 8)                                         # sublane-align the batch
    if Bp != B:
        x = jnp.pad(x, ((0, 0), (0, Bp - B), (0, 0)))

    H = params["lstm"][0]["w_hh_f"].shape[1]
    vmem_limit = _vmem_limit_bytes()
    budget = int(0.75 * (vmem_limit if vmem_limit is not None else 16 * 1024 * 1024))
    Tc, Tp = _choose_chunk(T, Bp, H, jnp.dtype(gate_dtype).itemsize, budget, max_chunk)

    layer_in = x
    h_f = h_b = None
    for li, lp in enumerate(params["lstm"]):
        gx_f, gx_b = _precompute_gates(layer_in, lp, H, li, gate_dtype)  # hoisted matmuls
        gx_f = _pad_time_gates(gx_f, Tp, H)
        gx_b = _pad_time_gates(gx_b, Tp, H)
        whh = jnp.stack([jnp.transpose(lp["w_hh_f"]),
                         jnp.transpose(lp["w_hh_b"])], axis=0).astype(jnp.float32)
        h_f, h_b = bilstm_layer(gx_f, gx_b, whh, Tc=Tc, vmem_limit=vmem_limit)
        h_f, h_b = h_f[:T], h_b[:T]                              # drop padded timesteps
        layer_in = (h_f, h_b)                                    # fed as two dirs; no concat
        # TODO(synk): inter-layer dropout not applied (dropout=0.0 / eval semantics).

    out_tb = proj_mean_directions(h_f, h_b, params["w_proj"], params["b_proj"])  # (T, Bp, C)
    output = jnp.transpose(out_tb[:, :B, :], (1, 0, 2))          # (B, T, C)
    # NOTE: like torch.nn.LSTM on a dense (non-packed) batch, padded timesteps are NOT
    # masked inside the recurrence; the mask is only inverted and passed through.
    return output, jnp.logical_not(mask)


# ----------------------------------------------------------------------------
# Pure-JAX reference (for correctness check).  Precision mirrors the kernel path:
# hoisted input projection at default MXU precision; the recurrent dot and the final
# projection at HIGHEST (they are exact-f32 inside the Pallas kernels).
# ----------------------------------------------------------------------------
def _lstm_dir_ref(x_tbd, w_ih, w_hh, b_ih, b_hh):
    H = w_hh.shape[1]
    b = b_ih + b_hh

    def step(carry, x_t):
        h, c = carry
        g = (jnp.dot(x_t, w_ih.T)
             + jnp.dot(h, w_hh.T, precision=_HI) + b)
        i = jax.nn.sigmoid(g[:, :H])
        f = jax.nn.sigmoid(g[:, H:2 * H])
        gg = jnp.tanh(g[:, 2 * H:3 * H])
        o = jax.nn.sigmoid(g[:, 3 * H:4 * H])
        c = f * c + i * gg
        h = o * jnp.tanh(c)
        return (h, c), h

    B = x_tbd.shape[1]
    init = (jnp.zeros((B, H), jnp.float32), jnp.zeros((B, H), jnp.float32))
    _, ys = jax.lax.scan(step, init, x_tbd)
    return ys


def bilstm_forward_ref(tokens, mask, params):
    emb = jnp.take(params["embedding"], tokens, axis=0)
    x_tbd = jnp.transpose(emb, (1, 0, 2)).astype(jnp.float32)
    layer_in = x_tbd
    h_fwd = h_bwd = None
    for lp in params["lstm"]:
        h_fwd = _lstm_dir_ref(layer_in, lp["w_ih_f"], lp["w_hh_f"], lp["b_ih_f"], lp["b_hh_f"])
        h_bwd = _lstm_dir_ref(layer_in[::-1], lp["w_ih_b"], lp["w_hh_b"], lp["b_ih_b"], lp["b_hh_b"])[::-1]
        layer_in = jnp.concatenate([h_fwd, h_bwd], axis=-1)
    mean_h = (jnp.transpose(h_fwd, (1, 0, 2)) + jnp.transpose(h_bwd, (1, 0, 2))) * 0.5
    out = jnp.dot(mean_h, params["w_proj"].T, precision=_HI) + params["b_proj"]
    return out, jnp.logical_not(mask)


# ----------------------------------------------------------------------------
# Deterministic parameter init (PyTorch-style uniform(-1/sqrt(H), 1/sqrt(H)))
# ----------------------------------------------------------------------------
def init_params(key, num_embeddings, embedding_dim, hidden_dim, num_layers, num_channels):
    keys = iter(jax.random.split(key, 4 + num_layers * 16))
    k = 1.0 / math.sqrt(hidden_dim)

    def u(shape):
        return jax.random.uniform(next(keys), shape, jnp.float32, -k, k)

    params = {
        "embedding": jax.random.normal(next(keys), (num_embeddings, embedding_dim), jnp.float32),
        "lstm": [],
        "w_proj": u((num_channels, hidden_dim)),
        "b_proj": u((num_channels,)),
    }
    for layer in range(num_layers):
        in_dim = embedding_dim if layer == 0 else 2 * hidden_dim
        params["lstm"].append({
            "w_ih_f": u((4 * hidden_dim, in_dim)),
            "w_hh_f": u((4 * hidden_dim, hidden_dim)),
            "b_ih_f": u((4 * hidden_dim,)),
            "b_hh_f": u((4 * hidden_dim,)),
            "w_ih_b": u((4 * hidden_dim, in_dim)),
            "w_hh_b": u((4 * hidden_dim, hidden_dim)),
            "b_ih_b": u((4 * hidden_dim,)),
            "b_hh_b": u((4 * hidden_dim,)),
        })
    return params


# ----------------------------------------------------------------------------
if __name__ == "__main__":
    B, T = 2, 8
    NUM_EMB, EMB_DIM = 50, 16
    HIDDEN, NUM_LAYERS, NUM_CH = 32, 2, 8

    key = jax.random.PRNGKey(0)
    k_tok, k_mask, k_par, k_tok2, k_mask2 = jax.random.split(key, 5)

    tokens = jax.random.randint(k_tok, (B, T), 0, NUM_EMB, dtype=jnp.int32)
    mask = jax.random.bernoulli(k_mask, p=0.3, shape=(B, T))  # True = padding
    params = init_params(k_par, NUM_EMB, EMB_DIM, HIDDEN, NUM_LAYERS, NUM_CH)

    # Production config: bf16 gate stream.
    out, out_mask = bilstm_forward(tokens, mask, params)
    out = jax.block_until_ready(out)
    out_mask = jax.block_until_ready(out_mask)

    # Exactness config: f32 gate stream (isolates the bf16-storage effect).
    out_f32, _ = bilstm_forward(tokens, mask, params, gate_dtype=jnp.float32)
    out_f32 = jax.block_until_ready(out_f32)

    ref_out, ref_mask = bilstm_forward_ref(tokens, mask, params)

    # f32 gate stream: only matmul rounding/ordering differences vs the reference.
    np.testing.assert_allclose(np.asarray(out_f32), np.asarray(ref_out), rtol=2e-3, atol=2e-3)
    # bf16 gate stream: ~1e-3-level deviation from bf16 storage of pre-activation gates
    # (perf review item), hence the looser tolerance.
    np.testing.assert_allclose(np.asarray(out), np.asarray(ref_out), rtol=1e-2, atol=1e-2)
    np.testing.assert_array_equal(np.asarray(out_mask), np.asarray(ref_mask))
    assert out.shape == (B, T, NUM_CH) and out.dtype == jnp.float32

    # Ragged-T path: T=13 with a forced small chunk -> padded tail + multi-chunk reversal.
    T2 = 13
    tokens2 = jax.random.randint(k_tok2, (B, T2), 0, NUM_EMB, dtype=jnp.int32)
    mask2 = jax.random.bernoulli(k_mask2, p=0.3, shape=(B, T2))
    out2, _ = bilstm_forward(tokens2, mask2, params, max_chunk=8)
    out2 = jax.block_until_ready(out2)
    ref2, _ = bilstm_forward_ref(tokens2, mask2, params)
    np.testing.assert_allclose(np.asarray(out2), np.asarray(ref2), rtol=1e-2, atol=1e-2)

    print("KERNEL_OK")
</pallas_src>

<mosaic_0001>
module attributes {stable_mosaic.version = 11 : i64} {
  func.func @_lstm_chunk_kernel(%arg0: i32, %arg1: memref<8x8x128xbf16, #tpu.memory_space<vmem>>, %arg2: memref<8x8x128xbf16, #tpu.memory_space<vmem>>, %arg3: memref<2x32x128xf32, #tpu.memory_space<vmem>>, %arg4: memref<8x8x32xf32, #tpu.memory_space<vmem>>, %arg5: memref<8x8x32xf32, #tpu.memory_space<vmem>>, %arg6: memref<8x32xf32, #tpu.memory_space<vmem>>, %arg7: memref<8x32xf32, #tpu.memory_space<vmem>>, %arg8: memref<8x32xf32, #tpu.memory_space<vmem>>, %arg9: memref<8x32xf32, #tpu.memory_space<vmem>>) attributes {dimension_semantics = [#tpu.dimension_semantics<arbitrary>], iteration_bounds = array<i64: 1>, scalar_prefetch = 0 : i64, scratch_operands = 4 : i64, tpu.core_type = #tpu.core_type<tc>, window_params = [{transform_indices = @transform_0, window_bounds = array<i64: 8, 8, 128>}, {transform_indices = @transform_1, window_bounds = array<i64: 8, 8, 128>}, {pipeline_mode = #tpu.pipeline_mode<synchronous>, transform_indices = @transform_2, window_bounds = array<i64: 2, 32, 128>}, {transform_indices = @transform_3, window_bounds = array<i64: 8, 8, 32>}, {transform_indices = @transform_4, window_bounds = array<i64: 8, 8, 32>}]} {
    %c0_i32 = arith.constant 0 : i32
    %0 = arith.cmpi eq, %arg0, %c0_i32 : i32
    %1 = arith.extui %0 : i1 to i32
    %c0_i32_0 = arith.constant 0 : i32
    %2 = arith.cmpi ne, %1, %c0_i32_0 : i32
    scf.if %2 {
      %cst_365 = arith.constant 0.000000e+00 : f32
      %735 = vector.broadcast %cst_365 : f32 to vector<8x32xf32>
      %c0_366 = arith.constant 0 : index
      %c0_367 = arith.constant 0 : index
      %736 = vector.load %arg6[%c0_366, %c0_367] : memref<8x32xf32, #tpu.memory_space<vmem>>, vector<8x32xf32>
      tpu.vector_store %arg6[%c0_366, %c0_367], %735 {strides = array<i32>} : memref<8x32xf32, #tpu.memory_space<vmem>>, vector<8x32xf32>,
      %cst_368 = arith.constant 0.000000e+00 : f32
      %737 = vector.broadcast %cst_368 : f32 to vector<8x32xf32>
      %c0_369 = arith.constant 0 : index
      %c0_370 = arith.constant 0 : index
      %738 = vector.load %arg7[%c0_369, %c0_370] : memref<8x32xf32, #tpu.memory_space<vmem>>, vector<8x32xf32>
      tpu.vector_store %arg7[%c0_369, %c0_370], %737 {strides = array<i32>} : memref<8x32xf32, #tpu.memory_space<vmem>>, vector<8x32xf32>,
      %cst_371 = arith.constant 0.000000e+00 : f32
      %739 = vector.broadcast %cst_371 : f32 to vector<8x32xf32>
      %c0_372 = arith.constant 0 : index
      %c0_373 = arith.constant 0 : index
      %740 = vector.load %arg8[%c0_372, %c0_373] : memref<8x32xf32, #tpu.memory_space<vmem>>, vector<8x32xf32>
      tpu.vector_store %arg8[%c0_372, %c0_373], %739 {strides = array<i32>} : memref<8x32xf32, #tpu.memory_space<vmem>>, vector<8x32xf32>,
      %cst_374 = arith.constant 0.000000e+00 : f32
      %741 = vector.broadcast %cst_374 : f32 to vector<8x32xf32>
      %c0_375 = arith.constant 0 : index
      %c0_376 = arith.constant 0 : index
      %742 = vector.load %arg9[%c0_375, %c0_376] : memref<8x32xf32, #tpu.memory_space<vmem>>, vector<8x32xf32>
      tpu.vector_store %arg9[%c0_375, %c0_376], %741 {strides = array<i32>} : memref<8x32xf32, #tpu.memory_space<vmem>>, vector<8x32xf32>,
    } else {
    }
    %c0 = arith.constant 0 : index
    %c0_1 = arith.constant 0 : index
    %c0_2 = arith.constant 0 : index
    %3 = vector.load %arg3[%c0, %c0_1, %c0_2] : memref<2x32x128xf32, #tpu.memory_space<vmem>>, vector<1x32x128xf32>
    %4 = vector.shape_cast %3 : vector<1x32x128xf32> to vector<32x128xf32>
    %c1 = arith.constant 1 : index
    %c0_3 = arith.constant 0 : index
    %c0_4 = arith.constant 0 : index
    %5 = vector.load %arg3[%c1, %c0_3, %c0_4] : memref<2x32x128xf32, #tpu.memory_space<vmem>>, vector<1x32x128xf32>
    %6 = vector.shape_cast %5 : vector<1x32x128xf32> to vector<32x128xf32>
    %c0_i32_5 = arith.constant 0 : i32
    %c7_i32 = arith.constant 7 : i32
    %7 = arith.subi %c7_i32, %c0_i32_5 : i32
    %8 = arith.index_cast %c0_i32_5 : i32 to index
    %c0_6 = arith.constant 0 : index
    %c0_7 = arith.constant 0 : index
    %9 = vector.load %arg1[%8, %c0_6, %c0_7] : memref<8x8x128xbf16, #tpu.memory_space<vmem>>, vector<1x8x128xbf16>
    %10 = vector.shape_cast %9 : vector<1x8x128xbf16> to vector<8x128xbf16>
    %11 = arith.extf %10 : vector<8x128xbf16> to vector<8x128xf32>
    %c0_8 = arith.constant 0 : index
    %c0_9 = arith.constant 0 : index
    %12 = vector.load %arg6[%c0_8, %c0_9] : memref<8x32xf32, #tpu.memory_space<vmem>>, vector<8x32xf32>
    %cst = arith.constant dense<0.000000e+00> : vector<8x128xf32>
    %13 = tpu.matmul %12, %4, %cst {dimension_numbers = #tpu.dot_dimension_numbers<[1], [0], [0], [1], [0, 0, 1, 1], [], []>} : vector<8x32xf32>, vector<32x128xf32>, vector<8x128xf32> -> vector<8x128xf32>
    %14 = arith.addf %11, %13 : vector<8x128xf32>
    %15 = arith.index_cast %7 : i32 to index
    %c0_10 = arith.constant 0 : index
    %c0_11 = arith.constant 0 : index
    %16 = vector.load %arg2[%15, %c0_10, %c0_11] : memref<8x8x128xbf16, #tpu.memory_space<vmem>>, vector<1x8x128xbf16>
    %17 = vector.shape_cast %16 : vector<1x8x128xbf16> to vector<8x128xbf16>
    %18 = arith.extf %17 : vector<8x128xbf16> to vector<8x128xf32>
    %c0_12 = arith.constant 0 : index
    %c0_13 = arith.constant 0 : index
    %19 = vector.load %arg8[%c0_12, %c0_13] : memref<8x32xf32, #tpu.memory_space<vmem>>, vector<8x32xf32>
    %cst_14 = arith.constant dense<0.000000e+00> : vector<8x128xf32>
    %20 = tpu.matmul %19, %6, %cst_14 {dimension_numbers = #tpu.dot_dimension_numbers<[1], [0], [0], [1], [0, 0, 1, 1], [], []>} : vector<8x32xf32>, vector<32x128xf32>, vector<8x128xf32> -> vector<8x128xf32>
    %21 = arith.addf %18, %20 : vector<8x128xf32>
    %c0_15 = arith.constant 0 : index
    %c0_16 = arith.constant 0 : index
    %22 = vector.load %arg7[%c0_15, %c0_16] : memref<8x32xf32, #tpu.memory_space<vmem>>, vector<8x32xf32>
    %23 = vector.extract_strided_slice %14 {offsets = [0, 0], sizes = [8, 32], strides = [1, 1]} : vector<8x128xf32> to vector<8x32xf32>
    %cst_17 = arith.constant 5.000000e-01 : f32
    %24 = vector.broadcast %cst_17 : f32 to vector<8x32xf32>
    %25 = arith.mulf %24, %23 : vector<8x32xf32>
    %26 = math.tanh %25 : vector<8x32xf32>
    %cst_18 = arith.constant 5.000000e-01 : f32
    %27 = vector.broadcast %cst_18 : f32 to vector<8x32xf32>
    %28 = arith.mulf %27, %26 : vector<8x32xf32>
    %cst_19 = arith.constant 5.000000e-01 : f32
    %29 = vector.broadcast %cst_19 : f32 to vector<8x32xf32>
    %30 = arith.addf %28, %29 : vector<8x32xf32>
    %31 = vector.extract_strided_slice %14 {offsets = [0, 32], sizes = [8, 32], strides = [1, 1]} : vector<8x128xf32> to vector<8x32xf32>
    %cst_20 = arith.constant 5.000000e-01 : f32
    %32 = vector.broadcast %cst_20 : f32 to vector<8x32xf32>
    %33 = arith.mulf %32, %31 : vector<8x32xf32>
    %34 = math.tanh %33 : vector<8x32xf32>
    %cst_21 = arith.constant 5.000000e-01 : f32
    %35 = vector.broadcast %cst_21 : f32 to vector<8x32xf32>
    %36 = arith.mulf %35, %34 : vector<8x32xf32>
    %cst_22 = arith.constant 5.000000e-01 : f32
    %37 = vector.broadcast %cst_22 : f32 to vector<8x32xf32>
    %38 = arith.addf %36, %37 : vector<8x32xf32>
    %39 = vector.extract_strided_slice %14 {offsets = [0, 64], sizes = [8, 32], strides = [1, 1]} : vector<8x128xf32> to vector<8x32xf32>
    %40 = math.tanh %39 : vector<8x32xf32>
    %41 = vector.extract_strided_slice %14 {offsets = [0, 96], sizes = [8, 32], strides = [1, 1]} : vector<8x128xf32> to vector<8x32xf32>
    %cst_23 = arith.constant 5.000000e-01 : f32
    %42 = vector.broadcast %cst_23 : f32 to vector<8x32xf32>
    %43 = arith.mulf %42, %41 : vector<8x32xf32>
    %44 = math.tanh %43 : vector<8x32xf32>
    %cst_24 = arith.constant 5.000000e-01 : f32
    %45 = vector.broadcast %cst_24 : f32 to vector<8x32xf32>
    %46 = arith.mulf %45, %44 : vector<8x32xf32>
    %cst_25 = arith.constant 5.000000e-01 : f32
    %47 = vector.broadcast %cst_25 : f32 to vector<8x32xf32>
    %48 = arith.addf %46, %47 : vector<8x32xf32>
    %49 = arith.mulf %38, %22 : vector<8x32xf32>
    %50 = arith.mulf %30, %40 : vector<8x32xf32>
    %51 = arith.addf %49, %50 : vector<8x32xf32>
    %52 = math.tanh %51 : vector<8x32xf32>
    %53 = arith.mulf %48, %52 : vector<8x32xf32>
    %c0_26 = arith.constant 0 : index
    %c0_27 = arith.constant 0 : index
    %54 = vector.load %arg9[%c0_26, %c0_27] : memref<8x32xf32, #tpu.memory_space<vmem>>, vector<8x32xf32>
    %55 = vector.extract_strided_slice %21 {offsets = [0, 0], sizes = [8, 32], strides = [1, 1]} : vector<8x128xf32> to vector<8x32xf32>
    %cst_28 = arith.constant 5.000000e-01 : f32
    %56 = vector.broadcast %cst_28 : f32 to vector<8x32xf32>
    %57 = arith.mulf %56, %55 : vector<8x32xf32>
    %58 = math.tanh %57 : vector<8x32xf32>
    %cst_29 = arith.constant 5.000000e-01 : f32
    %59 = vector.broadcast %cst_29 : f32 to vector<8x32xf32>
    %60 = arith.mulf %59, %58 : vector<8x32xf32>
    %cst_30 = arith.constant 5.000000e-01 : f32
    %61 = vector.broadcast %cst_30 : f32 to vector<8x32xf32>
    %62 = arith.addf %60, %61 : vector<8x32xf32>
    %63 = vector.extract_strided_slice %21 {offsets = [0, 32], sizes = [8, 32], strides = [1, 1]} : vector<8x128xf32> to vector<8x32xf32>
    %cst_31 = arith.constant 5.000000e-01 : f32
    %64 = vector.broadcast %cst_31 : f32 to vector<8x32xf32>
    %65 = arith.mulf %64, %63 : vector<8x32xf32>
    %66 = math.tanh %65 : vector<8x32xf32>
    %cst_32 = arith.constant 5.000000e-01 : f32
    %67 = vector.broadcast %cst_32 : f32 to vector<8x32xf32>
    %68 = arith.mulf %67, %66 : vector<8x32xf32>
    %cst_33 = arith.constant 5.000000e-01 : f32
    %69 = vector.broadcast %cst_33 : f32 to vector<8x32xf32>
    %70 = arith.addf %68, %69 : vector<8x32xf32>
    %71 = vector.extract_strided_slice %21 {offsets = [0, 64], sizes = [8, 32], strides = [1, 1]} : vector<8x128xf32> to vector<8x32xf32>
    %72 = math.tanh %71 : vector<8x32xf32>
    %73 = vector.extract_strided_slice %21 {offsets = [0, 96], sizes = [8, 32], strides = [1, 1]} : vector<8x128xf32> to vector<8x32xf32>
    %cst_34 = arith.constant 5.000000e-01 : f32
    %74 = vector.broadcast %cst_34 : f32 to vector<8x32xf32>
    %75 = arith.mulf %74, %73 : vector<8x32xf32>
    %76 = math.tanh %75 : vector<8x32xf32>
    %cst_35 = arith.constant 5.000000e-01 : f32
    %77 = vector.broadcast %cst_35 : f32 to vector<8x32xf32>
    %78 = arith.mulf %77, %76 : vector<8x32xf32>
    %cst_36 = arith.constant 5.000000e-01 : f32
    %79 = vector.broadcast %cst_36 : f32 to vector<8x32xf32>
    %80 = arith.addf %78, %79 : vector<8x32xf32>
    %81 = arith.mulf %70, %54 : vector<8x32xf32>
    %82 = arith.mulf %62, %72 : vector<8x32xf32>
    %83 = arith.addf %81, %82 : vector<8x32xf32>
    %84 = math.tanh %83 : vector<8x32xf32>
    %85 = arith.mulf %80, %84 : vector<8x32xf32>
    %c0_37 = arith.constant 0 : index
    %c0_38 = arith.constant 0 : index
    %86 = vector.load %arg6[%c0_37, %c0_38] : memref<8x32xf32, #tpu.memory_space<vmem>>, vector<8x32xf32>
    tpu.vector_store %arg6[%c0_37, %c0_38], %53 {strides = array<i32>} : memref<8x32xf32, #tpu.memory_space<vmem>>, vector<8x32xf32>,
    %c0_39 = arith.constant 0 : index
    %c0_40 = arith.constant 0 : index
    %87 = vector.load %arg7[%c0_39, %c0_40] : memref<8x32xf32, #tpu.memory_space<vmem>>, vector<8x32xf32>
    tpu.vector_store %arg7[%c0_39, %c0_40], %51 {strides = array<i32>} : memref<8x32xf32, #tpu.memory_space<vmem>>, vector<8x32xf32>,
    %c0_41 = arith.constant 0 : index
    %c0_42 = arith.constant 0 : index
    %88 = vector.load %arg8[%c0_41, %c0_42] : memref<8x32xf32, #tpu.memory_space<vmem>>, vector<8x32xf32>
    tpu.vector_store %arg8[%c0_41, %c0_42], %85 {strides = array<i32>} : memref<8x32xf32, #tpu.memory_space<vmem>>, vector<8x32xf32>,
    %c0_43 = arith.constant 0 : index
    %c0_44 = arith.constant 0 : index
    %89 = vector.load %arg9[%c0_43, %c0_44] : memref<8x32xf32, #tpu.memory_space<vmem>>, vector<8x32xf32>
    tpu.vector_store %arg9[%c0_43, %c0_44], %83 {strides = array<i32>} : memref<8x32xf32, #tpu.memory_space<vmem>>, vector<8x32xf32>,
    %90 = arith.index_cast %c0_i32_5 : i32 to index
    %c0_45 = arith.constant 0 : index
    %c0_46 = arith.constant 0 : index
    %91 = vector.load %arg4[%90, %c0_45, %c0_46] : memref<8x8x32xf32, #tpu.memory_space<vmem>>, vector<1x8x32xf32>
    %92 = vector.shape_cast %91 : vector<1x8x32xf32> to vector<8x32xf32>
    %93 = vector.shape_cast %53 : vector<8x32xf32> to vector<1x8x32xf32>
    tpu.vector_store %arg4[%90, %c0_45, %c0_46], %93 {strides = array<i32>} : memref<8x8x32xf32, #tpu.memory_space<vmem>>, vector<1x8x32xf32>,
    %94 = arith.index_cast %7 : i32 to index
    %c0_47 = arith.constant 0 : index
    %c0_48 = arith.constant 0 : index
    %95 = vector.load %arg5[%94, %c0_47, %c0_48] : memref<8x8x32xf32, #tpu.memory_space<vmem>>, vector<1x8x32xf32>
    %96 = vector.shape_cast %95 : vector<1x8x32xf32> to vector<8x32xf32>
    %97 = vector.shape_cast %85 : vector<8x32xf32> to vector<1x8x32xf32>
    tpu.vector_store %arg5[%94, %c0_47, %c0_48], %97 {strides = array<i32>} : memref<8x8x32xf32, #tpu.memory_space<vmem>>, vector<1x8x32xf32>,
    %c1_i32 = arith.constant 1 : i32
    %c7_i32_49 = arith.constant 7 : i32
    %98 = arith.subi %c7_i32_49, %c1_i32 : i32
    %99 = arith.index_cast %c1_i32 : i32 to index
    %c0_50 = arith.constant 0 : index
    %c0_51 = arith.constant 0 : index
    %100 = vector.load %arg1[%99, %c0_50, %c0_51] : memref<8x8x128xbf16, #tpu.memory_space<vmem>>, vector<1x8x128xbf16>
    %101 = vector.shape_cast %100 : vector<1x8x128xbf16> to vector<8x128xbf16>
    %102 = arith.extf %101 : vector<8x128xbf16> to vector<8x128xf32>
    %c0_52 = arith.constant 0 : index
    %c0_53 = arith.constant 0 : index
    %103 = vector.load %arg6[%c0_52, %c0_53] : memref<8x32xf32, #tpu.memory_space<vmem>>, vector<8x32xf32>
    %cst_54 = arith.constant dense<0.000000e+00> : vector<8x128xf32>
    %104 = tpu.matmul %103, %4, %cst_54 {dimension_numbers = #tpu.dot_dimension_numbers<[1], [0], [0], [1], [0, 0, 1, 1], [], []>} : vector<8x32xf32>, vector<32x128xf32>, vector<8x128xf32> -> vector<8x128xf32>
    %105 = arith.addf %102, %104 : vector<8x128xf32>
    %106 = arith.index_cast %98 : i32 to index
    %c0_55 = arith.constant 0 : index
    %c0_56 = arith.constant 0 : index
    %107 = vector.load %arg2[%106, %c0_55, %c0_56] : memref<8x8x128xbf16, #tpu.memory_space<vmem>>, vector<1x8x128xbf16>
    %108 = vector.shape_cast %107 : vector<1x8x128xbf16> to vector<8x128xbf16>
    %109 = arith.extf %108 : vector<8x128xbf16> to vector<8x128xf32>
    %c0_57 = arith.constant 0 : index
    %c0_58 = arith.constant 0 : index
    %110 = vector.load %arg8[%c0_57, %c0_58] : memref<8x32xf32, #tpu.memory_space<vmem>>, vector<8x32xf32>
    %cst_59 = arith.constant dense<0.000000e+00> : vector<8x128xf32>
    %111 = tpu.matmul %110, %6, %cst_59 {dimension_numbers = #tpu.dot_dimension_numbers<[1], [0], [0], [1], [0, 0, 1, 1], [], []>} : vector<8x32xf32>, vector<32x128xf32>, vector<8x128xf32> -> vector<8x128xf32>
    %112 = arith.addf %109, %111 : vector<8x128xf32>
    %c0_60 = arith.constant 0 : index
    %c0_61 = arith.constant 0 : index
    %113 = vector.load %arg7[%c0_60, %c0_61] : memref<8x32xf32, #tpu.memory_space<vmem>>, vector<8x32xf32>
    %114 = vector.extract_strided_slice %105 {offsets = [0, 0], sizes = [8, 32], strides = [1, 1]} : vector<8x128xf32> to vector<8x32xf32>
    %cst_62 = arith.constant 5.000000e-01 : f32
    %115 = vector.broadcast %cst_62 : f32 to vector<8x32xf32>
    %116 = arith.mulf %115, %114 : vector<8x32xf32>
    %117 = math.tanh %116 : vector<8x32xf32>
    %cst_63 = arith.constant 5.000000e-01 : f32
    %118 = vector.broadcast %cst_63 : f32 to vector<8x32xf32>
    %119 = arith.mulf %118, %117 : vector<8x32xf32>
    %cst_64 = arith.constant 5.000000e-01 : f32
    %120 = vector.broadcast %cst_64 : f32 to vector<8x32xf32>
    %121 = arith.addf %119, %120 : vector<8x32xf32>
    %122 = vector.extract_strided_slice %105 {offsets = [0, 32], sizes = [8, 32], strides = [1, 1]} : vector<8x128xf32> to vector<8x32xf32>
    %cst_65 = arith.constant 5.000000e-01 : f32
    %123 = vector.broadcast %cst_65 : f32 to vector<8x32xf32>
    %124 = arith.mulf %123, %122 : vector<8x32xf32>
    %125 = math.tanh %124 : vector<8x32xf32>
    %cst_66 = arith.constant 5.000000e-01 : f32
    %126 = vector.broadcast %cst_66 : f32 to vector<8x32xf32>
    %127 = arith.mulf %126, %125 : vector<8x32xf32>
    %cst_67 = arith.constant 5.000000e-01 : f32
    %128 = vector.broadcast %cst_67 : f32 to vector<8x32xf32>
    %129 = arith.addf %127, %128 : vector<8x32xf32>
    %130 = vector.extract_strided_slice %105 {offsets = [0, 64], sizes = [8, 32], strides = [1, 1]} : vector<8x128xf32> to vector<8x32xf32>
    %131 = math.tanh %130 : vector<8x32xf32>
    %132 = vector.extract_strided_slice %105 {offsets = [0, 96], sizes = [8, 32], strides = [1, 1]} : vector<8x128xf32> to vector<8x32xf32>
    %cst_68 = arith.constant 5.000000e-01 : f32
    %133 = vector.broadcast %cst_68 : f32 to vector<8x32xf32>
    %134 = arith.mulf %133, %132 : vector<8x32xf32>
    %135 = math.tanh %134 : vector<8x32xf32>
    %cst_69 = arith.constant 5.000000e-01 : f32
    %136 = vector.broadcast %cst_69 : f32 to vector<8x32xf32>
    %137 = arith.mulf %136, %135 : vector<8x32xf32>
    %cst_70 = arith.constant 5.000000e-01 : f32
    %138 = vector.broadcast %cst_70 : f32 to vector<8x32xf32>
    %139 = arith.addf %137, %138 : vector<8x32xf32>
    %140 = arith.mulf %129, %113 : vector<8x32xf32>
    %141 = arith.mulf %121, %131 : vector<8x32xf32>
    %142 = arith.addf %140, %141 : vector<8x32xf32>
    %143 = math.tanh %142 : vector<8x32xf32>
    %144 = arith.mulf %139, %143 : vector<8x32xf32>
    %c0_71 = arith.constant 0 : index
    %c0_72 = arith.constant 0 : index
    %145 = vector.load %arg9[%c0_71, %c0_72] : memref<8x32xf32, #tpu.memory_space<vmem>>, vector<8x32xf32>
    %146 = vector.extract_strided_slice %112 {offsets = [0, 0], sizes = [8, 32], strides = [1, 1]} : vector<8x128xf32> to vector<8x32xf32>
    %cst_73 = arith.constant 5.000000e-01 : f32
    %147 = vector.broadcast %cst_73 : f32 to vector<8x32xf32>
    %148 = arith.mulf %147, %146 : vector<8x32xf32>
    %149 = math.tanh %148 : vector<8x32xf32>
    %cst_74 = arith.constant 5.000000e-01 : f32
    %150 = vector.broadcast %cst_74 : f32 to vector<8x32xf32>
    %151 = arith.mulf %150, %149 : vector<8x32xf32>
    %cst_75 = arith.constant 5.000000e-01 : f32
    %152 = vector.broadcast %cst_75 : f32 to vector<8x32xf32>
    %153 = arith.addf %151, %152 : vector<8x32xf32>
    %154 = vector.extract_strided_slice %112 {offsets = [0, 32], sizes = [8, 32], strides = [1, 1]} : vector<8x128xf32> to vector<8x32xf32>
    %cst_76 = arith.constant 5.000000e-01 : f32
    %155 = vector.broadcast %cst_76 : f32 to vector<8x32xf32>
    %156 = arith.mulf %155, %154 : vector<8x32xf32>
    %157 = math.tanh %156 : vector<8x32xf32>
    %cst_77 = arith.constant 5.000000e-01 : f32
    %158 = vector.broadcast %cst_77 : f32 to vector<8x32xf32>
    %159 = arith.mulf %158, %157 : vector<8x32xf32>
    %cst_78 = arith.constant 5.000000e-01 : f32
    %160 = vector.broadcast %cst_78 : f32 to vector<8x32xf32>
    %161 = arith.addf %159, %160 : vector<8x32xf32>
    %162 = vector.extract_strided_slice %112 {offsets = [0, 64], sizes = [8, 32], strides = [1, 1]} : vector<8x128xf32> to vector<8x32xf32>
    %163 = math.tanh %162 : vector<8x32xf32>
    %164 = vector.extract_strided_slice %112 {offsets = [0, 96], sizes = [8, 32], strides = [1, 1]} : vector<8x128xf32> to vector<8x32xf32>
    %cst_79 = arith.constant 5.000000e-01 : f32
    %165 = vector.broadcast %cst_79 : f32 to vector<8x32xf32>
    %166 = arith.mulf %165, %164 : vector<8x32xf32>
    %167 = math.tanh %166 : vector<8x32xf32>
    %cst_80 = arith.constant 5.000000e-01 : f32
    %168 = vector.broadcast %cst_80 : f32 to vector<8x32xf32>
    %169 = arith.mulf %168, %167 : vector<8x32xf32>
    %cst_81 = arith.constant 5.000000e-01 : f32
    %170 = vector.broadcast %cst_81 : f32 to vector<8x32xf32>
    %171 = arith.addf %169, %170 : vector<8x32xf32>
    %172 = arith.mulf %161, %145 : vector<8x32xf32>
    %173 = arith.mulf %153, %163 : vector<8x32xf32>
    %174 = arith.addf %172, %173 : vector<8x32xf32>
    %175 = math.tanh %174 : vector<8x32xf32>
    %176 = arith.mulf %171, %175 : vector<8x32xf32>
    %c0_82 = arith.constant 0 : index
    %c0_83 = arith.constant 0 : index
    %177 = vector.load %arg6[%c0_82, %c0_83] : memref<8x32xf32, #tpu.memory_space<vmem>>, vector<8x32xf32>
    tpu.vector_store %arg6[%c0_82, %c0_83], %144 {strides = array<i32>} : memref<8x32xf32, #tpu.memory_space<vmem>>, vector<8x32xf32>,
    %c0_84 = arith.constant 0 : index
    %c0_85 = arith.constant 0 : index
    %178 = vector.load %arg7[%c0_84, %c0_85] : memref<8x32xf32, #tpu.memory_space<vmem>>, vector<8x32xf32>
    tpu.vector_store %arg7[%c0_84, %c0_85], %142 {strides = array<i32>} : memref<8x32xf32, #tpu.memory_space<vmem>>, vector<8x32xf32>,
    %c0_86 = arith.constant 0 : index
    %c0_87 = arith.constant 0 : index
    %179 = vector.load %arg8[%c0_86, %c0_87] : memref<8x32xf32, #tpu.memory_space<vmem>>, vector<8x32xf32>
    tpu.vector_store %arg8[%c0_86, %c0_87], %176 {strides = array<i32>} : memref<8x32xf32, #tpu.memory_space<vmem>>, vector<8x32xf32>,
    %c0_88 = arith.constant 0 : index
    %c0_89 = arith.constant 0 : index
    %180 = vector.load %arg9[%c0_88, %c0_89] : memref<8x32xf32, #tpu.memory_space<vmem>>, vector<8x32xf32>
    tpu.vector_store %arg9[%c0_88, %c0_89], %174 {strides = array<i32>} : memref<8x32xf32, #tpu.memory_space<vmem>>, vector<8x32xf32>,
    %181 = arith.index_cast %c1_i32 : i32 to index
    %c0_90 = arith.constant 0 : index
    %c0_91 = arith.constant 0 : index
    %182 = vector.load %arg4[%181, %c0_90, %c0_91] : memref<8x8x32xf32, #tpu.memory_space<vmem>>, vector<1x8x32xf32>
    %183 = vector.shape_cast %182 : vector<1x8x32xf32> to vector<8x32xf32>
    %184 = vector.shape_cast %144 : vector<8x32xf32> to vector<1x8x32xf32>
    tpu.vector_store %arg4[%181, %c0_90, %c0_91], %184 {strides = array<i32>} : memref<8x8x32xf32, #tpu.memory_space<vmem>>, vector<1x8x32xf32>,
    %185 = arith.index_cast %98 : i32 to index
    %c0_92 = arith.constant 0 : index
    %c0_93 = arith.constant 0 : index
    %186 = vector.load %arg5[%185, %c0_92, %c0_93] : memref<8x8x32xf32, #tpu.memory_space<vmem>>, vector<1x8x32xf32>
    %187 = vector.shape_cast %186 : vector<1x8x32xf32> to vector<8x32xf32>
    %188 = vector.shape_cast %176 : vector<8x32xf32> to vector<1x8x32xf32>
    tpu.vector_store %arg5[%185, %c0_92, %c0_93], %188 {strides = array<i32>} : memref<8x8x32xf32, #tpu.memory_space<vmem>>, vector<1x8x32xf32>,
    %c2_i32 = arith.constant 2 : i32
    %c7_i32_94 = arith.constant 7 : i32
    %189 = arith.subi %c7_i32_94, %c2_i32 : i32
    %190 = arith.index_cast %c2_i32 : i32 to index
    %c0_95 = arith.constant 0 : index
    %c0_96 = arith.constant 0 : index
    %191 = vector.load %arg1[%190, %c0_95, %c0_96] : memref<8x8x128xbf16, #tpu.memory_space<vmem>>, vector<1x8x128xbf16>
    %192 = vector.shape_cast %191 : vector<1x8x128xbf16> to vector<8x128xbf16>
    %193 = arith.extf %192 : vector<8x128xbf16> to vector<8x128xf32>
    %c0_97 = arith.constant 0 : index
    %c0_98 = arith.constant 0 : index
    %194 = vector.load %arg6[%c0_97, %c0_98] : memref<8x32xf32, #tpu.memory_space<vmem>>, vector<8x32xf32>
    %cst_99 = arith.constant dense<0.000000e+00> : vector<8x128xf32>
    %195 = tpu.matmul %194, %4, %cst_99 {dimension_numbers = #tpu.dot_dimension_numbers<[1], [0], [0], [1], [0, 0, 1, 1], [], []>} : vector<8x32xf32>, vector<32x128xf32>, vector<8x128xf32> -> vector<8x128xf32>
    %196 = arith.addf %193, %195 : vector<8x128xf32>
    %197 = arith.index_cast %189 : i32 to index
    %c0_100 = arith.constant 0 : index
    %c0_101 = arith.constant 0 : index
    %198 = vector.load %arg2[%197, %c0_100, %c0_101] : memref<8x8x128xbf16, #tpu.memory_space<vmem>>, vector<1x8x128xbf16>
    %199 = vector.shape_cast %198 : vector<1x8x128xbf16> to vector<8x128xbf16>
    %200 = arith.extf %199 : vector<8x128xbf16> to vector<8x128xf32>
    %c0_102 = arith.constant 0 : index
    %c0_103 = arith.constant 0 : index
    %201 = vector.load %arg8[%c0_102, %c0_103] : memref<8x32xf32, #tpu.memory_space<vmem>>, vector<8x32xf32>
    %cst_104 = arith.constant dense<0.000000e+00> : vector<8x128xf32>
    %202 = tpu.matmul %201, %6, %cst_104 {dimension_numbers = #tpu.dot_dimension_numbers<[1], [0], [0], [1], [0, 0, 1, 1], [], []>} : vector<8x32xf32>, vector<32x128xf32>, vector<8x128xf32> -> vector<8x128xf32>
    %203 = arith.addf %200, %202 : vector<8x128xf32>
    %c0_105 = arith.constant 0 : index
    %c0_106 = arith.constant 0 : index
    %204 = vector.load %arg7[%c0_105, %c0_106] : memref<8x32xf32, #tpu.memory_space<vmem>>, vector<8x32xf32>
    %205 = vector.extract_strided_slice %196 {offsets = [0, 0], sizes = [8, 32], strides = [1, 1]} : vector<8x128xf32> to vector<8x32xf32>
    %cst_107 = arith.constant 5.000000e-01 : f32
    %206 = vector.broadcast %cst_107 : f32 to vector<8x32xf32>
    %207 = arith.mulf %206, %205 : vector<8x32xf32>
    %208 = math.tanh %207 : vector<8x32xf32>
    %cst_108 = arith.constant 5.000000e-01 : f32
    %209 = vector.broadcast %cst_108 : f32 to vector<8x32xf32>
    %210 = arith.mulf %209, %208 : vector<8x32xf32>
    %cst_109 = arith.constant 5.000000e-01 : f32
    %211 = vector.broadcast %cst_109 : f32 to vector<8x32xf32>
    %212 = arith.addf %210, %211 : vector<8x32xf32>
    %213 = vector.extract_strided_slice %196 {offsets = [0, 32], sizes = [8, 32], strides = [1, 1]} : vector<8x128xf32> to vector<8x32xf32>
    %cst_110 = arith.constant 5.000000e-01 : f32
    %214 = vector.broadcast %cst_110 : f32 to vector<8x32xf32>
    %215 = arith.mulf %214, %213 : vector<8x32xf32>
    %216 = math.tanh %215 : vector<8x32xf32>
    %cst_111 = arith.constant 5.000000e-01 : f32
    %217 = vector.broadcast %cst_111 : f32 to vector<8x32xf32>
    %218 = arith.mulf %217, %216 : vector<8x32xf32>
    %cst_112 = arith.constant 5.000000e-01 : f32
    %219 = vector.broadcast %cst_112 : f32 to vector<8x32xf32>
    %220 = arith.addf %218, %219 : vector<8x32xf32>
    %221 = vector.extract_strided_slice %196 {offsets = [0, 64], sizes = [8, 32], strides = [1, 1]} : vector<8x128xf32> to vector<8x32xf32>
    %222 = math.tanh %221 : vector<8x32xf32>
    %223 = vector.extract_strided_slice %196 {offsets = [0, 96], sizes = [8, 32], strides = [1, 1]} : vector<8x128xf32> to vector<8x32xf32>
    %cst_113 = arith.constant 5.000000e-01 : f32
    %224 = vector.broadcast %cst_113 : f32 to vector<8x32xf32>
    %225 = arith.mulf %224, %223 : vector<8x32xf32>
    %226 = math.tanh %225 : vector<8x32xf32>
    %cst_114 = arith.constant 5.000000e-01 : f32
    %227 = vector.broadcast %cst_114 : f32 to vector<8x32xf32>
    %228 = arith.mulf %227, %226 : vector<8x32xf32>
    %cst_115 = arith.constant 5.000000e-01 : f32
    %229 = vector.broadcast %cst_115 : f32 to vector<8x32xf32>
    %230 = arith.addf %228, %229 : vector<8x32xf32>
    %231 = arith.mulf %220, %204 : vector<8x32xf32>
    %232 = arith.mulf %212, %222 : vector<8x32xf32>
    %233 = arith.addf %231, %232 : vector<8x32xf32>
    %234 = math.tanh %233 : vector<8x32xf32>
    %235 = arith.mulf %230, %234 : vector<8x32xf32>
    %c0_116 = arith.constant 0 : index
    %c0_117 = arith.constant 0 : index
    %236 = vector.load %arg9[%c0_116, %c0_117] : memref<8x32xf32, #tpu.memory_space<vmem>>, vector<8x32xf32>
    %237 = vector.extract_strided_slice %203 {offsets = [0, 0], sizes = [8, 32], strides = [1, 1]} : vector<8x128xf32> to vector<8x32xf32>
    %cst_118 = arith.constant 5.000000e-01 : f32
    %238 = vector.broadcast %cst_118 : f32 to vector<8x32xf32>
    %239 = arith.mulf %238, %237 : vector<8x32xf32>
    %240 = math.tanh %239 : vector<8x32xf32>
    %cst_119 = arith.constant 5.000000e-01 : f32
    %241 = vector.broadcast %cst_119 : f32 to vector<8x32xf32>
    %242 = arith.mulf %241, %240 : vector<8x32xf32>
    %cst_120 = arith.constant 5.000000e-01 : f32
    %243 = vector.broadcast %cst_120 : f32 to vector<8x32xf32>
    %244 = arith.addf %242, %243 : vector<8x32xf32>
    %245 = vector.extract_strided_slice %203 {offsets = [0, 32], sizes = [8, 32], strides = [1, 1]} : vector<8x128xf32> to vector<8x32xf32>
    %cst_121 = arith.constant 5.000000e-01 : f32
    %246 = vector.broadcast %cst_121 : f32 to vector<8x32xf32>
    %247 = arith.mulf %246, %245 : vector<8x32xf32>
    %248 = math.tanh %247 : vector<8x32xf32>
    %cst_122 = arith.constant 5.000000e-01 : f32
    %249 = vector.broadcast %cst_122 : f32 to vector<8x32xf32>
    %250 = arith.mulf %249, %248 : vector<8x32xf32>
    %cst_123 = arith.constant 5.000000e-01 : f32
    %251 = vector.broadcast %cst_123 : f32 to vector<8x32xf32>
    %252 = arith.addf %250, %251 : vector<8x32xf32>
    %253 = vector.extract_strided_slice %203 {offsets = [0, 64], sizes = [8, 32], strides = [1, 1]} : vector<8x128xf32> to vector<8x32xf32>
    %254 = math.tanh %253 : vector<8x32xf32>
    %255 = vector.extract_strided_slice %203 {offsets = [0, 96], sizes = [8, 32], strides = [1, 1]} : vector<8x128xf32> to vector<8x32xf32>
    %cst_124 = arith.constant 5.000000e-01 : f32
    %256 = vector.broadcast %cst_124 : f32 to vector<8x32xf32>
    %257 = arith.mulf %256, %255 : vector<8x32xf32>
    %258 = math.tanh %257 : vector<8x32xf32>
    %cst_125 = arith.constant 5.000000e-01 : f32
    %259 = vector.broadcast %cst_125 : f32 to vector<8x32xf32>
    %260 = arith.mulf %259, %258 : vector<8x32xf32>
    %cst_126 = arith.constant 5.000000e-01 : f32
    %261 = vector.broadcast %cst_126 : f32 to vector<8x32xf32>
    %262 = arith.addf %260, %261 : vector<8x32xf32>
    %263 = arith.mulf %252, %236 : vector<8x32xf32>
    %264 = arith.mulf %244, %254 : vector<8x32xf32>
    %265 = arith.addf %263, %264 : vector<8x32xf32>
    %266 = math.tanh %265 : vector<8x32xf32>
    %267 = arith.mulf %262, %266 : vector<8x32xf32>
    %c0_127 = arith.constant 0 : index
    %c0_128 = arith.constant 0 : index
    %268 = vector.load %arg6[%c0_127, %c0_128] : memref<8x32xf32, #tpu.memory_space<vmem>>, vector<8x32xf32>
    tpu.vector_store %arg6[%c0_127, %c0_128], %235 {strides = array<i32>} : memref<8x32xf32, #tpu.memory_space<vmem>>, vector<8x32xf32>,
    %c0_129 = arith.constant 0 : index
    %c0_130 = arith.constant 0 : index
    %269 = vector.load %arg7[%c0_129, %c0_130] : memref<8x32xf32, #tpu.memory_space<vmem>>, vector<8x32xf32>
    tpu.vector_store %arg7[%c0_129, %c0_130], %233 {strides = array<i32>} : memref<8x32xf32, #tpu.memory_space<vmem>>, vector<8x32xf32>,
    %c0_131 = arith.constant 0 : index
    %c0_132 = arith.constant 0 : index
    %270 = vector.load %arg8[%c0_131, %c0_132] : memref<8x32xf32, #tpu.memory_space<vmem>>, vector<8x32xf32>
    tpu.vector_store %arg8[%c0_131, %c0_132], %267 {strides = array<i32>} : memref<8x32xf32, #tpu.memory_space<vmem>>, vector<8x32xf32>,
    %c0_133 = arith.constant 0 : index
    %c0_134 = arith.constant 0 : index
    %271 = vector.load %arg9[%c0_133, %c0_134] : memref<8x32xf32, #tpu.memory_space<vmem>>, vector<8x32xf32>
    tpu.vector_store %arg9[%c0_133, %c0_134], %265 {strides = array<i32>} : memref<8x32xf32, #tpu.memory_space<vmem>>, vector<8x32xf32>,
    %272 = arith.index_cast %c2_i32 : i32 to index
    %c0_135 = arith.constant 0 : index
    %c0_136 = arith.constant 0 : index
    %273 = vector.load %arg4[%272, %c0_135, %c0_136] : memref<8x8x32xf32, #tpu.memory_space<vmem>>, vector<1x8x32xf32>
    %274 = vector.shape_cast %273 : vector<1x8x32xf32> to vector<8x32xf32>
    %275 = vector.shape_cast %235 : vector<8x32xf32> to vector<1x8x32xf32>
    tpu.vector_store %arg4[%272, %c0_135, %c0_136], %275 {strides = array<i32>} : memref<8x8x32xf32, #tpu.memory_space<vmem>>, vector<1x8x32xf32>,
    %276 = arith.index_cast %189 : i32 to index
    %c0_137 = arith.constant 0 : index
    %c0_138 = arith.constant 0 : index
    %277 = vector.load %arg5[%276, %c0_137, %c0_138] : memref<8x8x32xf32, #tpu.memory_space<vmem>>, vector<1x8x32xf32>
    %278 = vector.shape_cast %277 : vector<1x8x32xf32> to vector<8x32xf32>
    %279 = vector.shape_cast %267 : vector<8x32xf32> to vector<1x8x32xf32>
    tpu.vector_store %arg5[%276, %c0_137, %c0_138], %279 {strides = array<i32>} : memref<8x8x32xf32, #tpu.memory_space<vmem>>, vector<1x8x32xf32>,
    %c3_i32 = arith.constant 3 : i32
    %c7_i32_139 = arith.constant 7 : i32
    %280 = arith.subi %c7_i32_139, %c3_i32 : i32
    %281 = arith.index_cast %c3_i32 : i32 to index
    %c0_140 = arith.constant 0 : index
    %c0_141 = arith.constant 0 : index
    %282 = vector.load %arg1[%281, %c0_140, %c0_141] : memref<8x8x128xbf16, #tpu.memory_space<vmem>>, vector<1x8x128xbf16>
    %283 = vector.shape_cast %282 : vector<1x8x128xbf16> to vector<8x128xbf16>
    %284 = arith.extf %283 : vector<8x128xbf16> to vector<8x128xf32>
    %c0_142 = arith.constant 0 : index
    %c0_143 = arith.constant 0 : index
    %285 = vector.load %arg6[%c0_142, %c0_143] : memref<8x32xf32, #tpu.memory_space<vmem>>, vector<8x32xf32>
    %cst_144 = arith.constant dense<0.000000e+00> : vector<8x128xf32>
    %286 = tpu.matmul %285, %4, %cst_144 {dimension_numbers = #tpu.dot_dimension_numbers<[1], [0], [0], [1], [0, 0, 1, 1], [], []>} : vector<8x32xf32>, vector<32x128xf32>, vector<8x128xf32> -> vector<8x128xf32>
    %287 = arith.addf %284, %286 : vector<8x128xf32>
    %288 = arith.index_cast %280 : i32 to index
    %c0_145 = arith.constant 0 : index
    %c0_146 = arith.constant 0 : index
    %289 = vector.load %arg2[%288, %c0_145, %c0_146] : memref<8x8x128xbf16, #tpu.memory_space<vmem>>, vector<1x8x128xbf16>
    %290 = vector.shape_cast %289 : vector<1x8x128xbf16> to vector<8x128xbf16>
    %291 = arith.extf %290 : vector<8x128xbf16> to vector<8x128xf32>
    %c0_147 = arith.constant 0 : index
    %c0_148 = arith.constant 0 : index
    %292 = vector.load %arg8[%c0_147, %c0_148] : memref<8x32xf32, #tpu.memory_space<vmem>>, vector<8x32xf32>
    %cst_149 = arith.constant dense<0.000000e+00> : vector<8x128xf32>
    %293 = tpu.matmul %292, %6, %cst_149 {dimension_numbers = #tpu.dot_dimension_numbers<[1], [0], [0], [1], [0, 0, 1, 1], [], []>} : vector<8x32xf32>, vector<32x128xf32>, vector<8x128xf32> -> vector<8x128xf32>
    %294 = arith.addf %291, %293 : vector<8x128xf32>
    %c0_150 = arith.constant 0 : index
    %c0_151 = arith.constant 0 : index
    %295 = vector.load %arg7[%c0_150, %c0_151] : memref<8x32xf32, #tpu.memory_space<vmem>>, vector<8x32xf32>
    %296 = vector.extract_strided_slice %287 {offsets = [0, 0], sizes = [8, 32], strides = [1, 1]} : vector<8x128xf32> to vector<8x32xf32>
    %cst_152 = arith.constant 5.000000e-01 : f32
    %297 = vector.broadcast %cst_152 : f32 to vector<8x32xf32>
    %298 = arith.mulf %297, %296 : vector<8x32xf32>
    %299 = math.tanh %298 : vector<8x32xf32>
    %cst_153 = arith.constant 5.000000e-01 : f32
    %300 = vector.broadcast %cst_153 : f32 to vector<8x32xf32>
    %301 = arith.mulf %300, %299 : vector<8x32xf32>
    %cst_154 = arith.constant 5.000000e-01 : f32
    %302 = vector.broadcast %cst_154 : f32 to vector<8x32xf32>
    %303 = arith.addf %301, %302 : vector<8x32xf32>
    %304 = vector.extract_strided_slice %287 {offsets = [0, 32], sizes = [8, 32], strides = [1, 1]} : vector<8x128xf32> to vector<8x32xf32>
    %cst_155 = arith.constant 5.000000e-01 : f32
    %305 = vector.broadcast %cst_155 : f32 to vector<8x32xf32>
    %306 = arith.mulf %305, %304 : vector<8x32xf32>
    %307 = math.tanh %306 : vector<8x32xf32>
    %cst_156 = arith.constant 5.000000e-01 : f32
    %308 = vector.broadcast %cst_156 : f32 to vector<8x32xf32>
    %309 = arith.mulf %308, %307 : vector<8x32xf32>
    %cst_157 = arith.constant 5.000000e-01 : f32
    %310 = vector.broadcast %cst_157 : f32 to vector<8x32xf32>
    %311 = arith.addf %309, %310 : vector<8x32xf32>
    %312 = vector.extract_strided_slice %287 {offsets = [0, 64], sizes = [8, 32], strides = [1, 1]} : vector<8x128xf32> to vector<8x32xf32>
    %313 = math.tanh %312 : vector<8x32xf32>
    %314 = vector.extract_strided_slice %287 {offsets = [0, 96], sizes = [8, 32], strides = [1, 1]} : vector<8x128xf32> to vector<8x32xf32>
    %cst_158 = arith.constant 5.000000e-01 : f32
    %315 = vector.broadcast %cst_158 : f32 to vector<8x32xf32>
    %316 = arith.mulf %315, %314 : vector<8x32xf32>
    %317 = math.tanh %316 : vector<8x32xf32>
    %cst_159 = arith.constant 5.000000e-01 : f32
    %318 = vector.broadcast %cst_159 : f32 to vector<8x32xf32>
    %319 = arith.mulf %318, %317 : vector<8x32xf32>
    %cst_160 = arith.constant 5.000000e-01 : f32
    %320 = vector.broadcast %cst_160 : f32 to vector<8x32xf32>
    %321 = arith.addf %319, %320 : vector<8x32xf32>
    %322 = arith.mulf %311, %295 : vector<8x32xf32>
    %323 = arith.mulf %303, %313 : vector<8x32xf32>
    %324 = arith.addf %322, %323 : vector<8x32xf32>
    %325 = math.tanh %324 : vector<8x32xf32>
    %326 = arith.mulf %321, %325 : vector<8x32xf32>
    %c0_161 = arith.constant 0 : index
    %c0_162 = arith.constant 0 : index
    %327 = vector.load %arg9[%c0_161, %c0_162] : memref<8x32xf32, #tpu.memory_space<vmem>>, vector<8x32xf32>
    %328 = vector.extract_strided_slice %294 {offsets = [0, 0], sizes = [8, 32], strides = [1, 1]} : vector<8x128xf32> to vector<8x32xf32>
    %cst_163 = arith.constant 5.000000e-01 : f32
    %329 = vector.broadcast %cst_163 : f32 to vector<8x32xf32>
    %330 = arith.mulf %329, %328 : vector<8x32xf32>
    %331 = math.tanh %330 : vector<8x32xf32>
    %cst_164 = arith.constant 5.000000e-01 : f32
    %332 = vector.broadcast %cst_164 : f32 to vector<8x32xf32>
    %333 = arith.mulf %332, %331 : vector<8x32xf32>
    %cst_165 = arith.constant 5.000000e-01 : f32
    %334 = vector.broadcast %cst_165 : f32 to vector<8x32xf32>
    %335 = arith.addf %333, %334 : vector<8x32xf32>
    %336 = vector.extract_strided_slice %294 {offsets = [0, 32], sizes = [8, 32], strides = [1, 1]} : vector<8x128xf32> to vector<8x32xf32>
    %cst_166 = arith.constant 5.000000e-01 : f32
    %337 = vector.broadcast %cst_166 : f32 to vector<8x32xf32>
    %338 = arith.mulf %337, %336 : vector<8x32xf32>
    %339 = math.tanh %338 : vector<8x32xf32>
    %cst_167 = arith.constant 5.000000e-01 : f32
    %340 = vector.broadcast %cst_167 : f32 to vector<8x32xf32>
    %341 = arith.mulf %340, %339 : vector<8x32xf32>
    %cst_168 = arith.constant 5.000000e-01 : f32
    %342 = vector.broadcast %cst_168 : f32 to vector<8x32xf32>
    %343 = arith.addf %341, %342 : vector<8x32xf32>
    %344 = vector.extract_strided_slice %294 {offsets = [0, 64], sizes = [8, 32], strides = [1, 1]} : vector<8x128xf32> to vector<8x32xf32>
    %345 = math.tanh %344 : vector<8x32xf32>
    %346 = vector.extract_strided_slice %294 {offsets = [0, 96], sizes = [8, 32], strides = [1, 1]} : vector<8x128xf32> to vector<8x32xf32>
    %cst_169 = arith.constant 5.000000e-01 : f32
    %347 = vector.broadcast %cst_169 : f32 to vector<8x32xf32>
    %348 = arith.mulf %347, %346 : vector<8x32xf32>
    %349 = math.tanh %348 : vector<8x32xf32>
    %cst_170 = arith.constant 5.000000e-01 : f32
    %350 = vector.broadcast %cst_170 : f32 to vector<8x32xf32>
    %351 = arith.mulf %350, %349 : vector<8x32xf32>
    %cst_171 = arith.constant 5.000000e-01 : f32
    %352 = vector.broadcast %cst_171 : f32 to vector<8x32xf32>
    %353 = arith.addf %351, %352 : vector<8x32xf32>
    %354 = arith.mulf %343, %327 : vector<8x32xf32>
    %355 = arith.mulf %335, %345 : vector<8x32xf32>
    %356 = arith.addf %354, %355 : vector<8x32xf32>
    %357 = math.tanh %356 : vector<8x32xf32>
    %358 = arith.mulf %353, %357 : vector<8x32xf32>
    %c0_172 = arith.constant 0 : index
    %c0_173 = arith.constant 0 : index
    %359 = vector.load %arg6[%c0_172, %c0_173] : memref<8x32xf32, #tpu.memory_space<vmem>>, vector<8x32xf32>
    tpu.vector_store %arg6[%c0_172, %c0_173], %326 {strides = array<i32>} : memref<8x32xf32, #tpu.memory_space<vmem>>, vector<8x32xf32>,
    %c0_174 = arith.constant 0 : index
    %c0_175 = arith.constant 0 : index
    %360 = vector.load %arg7[%c0_174, %c0_175] : memref<8x32xf32, #tpu.memory_space<vmem>>, vector<8x32xf32>
    tpu.vector_store %arg7[%c0_174, %c0_175], %324 {strides = array<i32>} : memref<8x32xf32, #tpu.memory_space<vmem>>, vector<8x32xf32>,
    %c0_176 = arith.constant 0 : index
    %c0_177 = arith.constant 0 : index
    %361 = vector.load %arg8[%c0_176, %c0_177] : memref<8x32xf32, #tpu.memory_space<vmem>>, vector<8x32xf32>
    tpu.vector_store %arg8[%c0_176, %c0_177], %358 {strides = array<i32>} : memref<8x32xf32, #tpu.memory_space<vmem>>, vector<8x32xf32>,
    %c0_178 = arith.constant 0 : index
    %c0_179 = arith.constant 0 : index
    %362 = vector.load %arg9[%c0_178, %c0_179] : memref<8x32xf32, #tpu.memory_space<vmem>>, vector<8x32xf32>
    tpu.vector_store %arg9[%c0_178, %c0_179], %356 {strides = array<i32>} : memref<8x32xf32, #tpu.memory_space<vmem>>, vector<8x32xf32>,
    %363 = arith.index_cast %c3_i32 : i32 to index
    %c0_180 = arith.constant 0 : index
    %c0_181 = arith.constant 0 : index
    %364 = vector.load %arg4[%363, %c0_180, %c0_181] : memref<8x8x32xf32, #tpu.memory_space<vmem>>, vector<1x8x32xf32>
    %365 = vector.shape_cast %364 : vector<1x8x32xf32> to vector<8x32xf32>
    %366 = vector.shape_cast %326 : vector<8x32xf32> to vector<1x8x32xf32>
    tpu.vector_store %arg4[%363, %c0_180, %c0_181], %366 {strides = array<i32>} : memref<8x8x32xf32, #tpu.memory_space<vmem>>, vector<1x8x32xf32>,
    %367 = arith.index_cast %280 : i32 to index
    %c0_182 = arith.constant 0 : index
    %c0_183 = arith.constant 0 : index
    %368 = vector.load %arg5[%367, %c0_182, %c0_183] : memref<8x8x32xf32, #tpu.memory_space<vmem>>, vector<1x8x32xf32>
    %369 = vector.shape_cast %368 : vector<1x8x32xf32> to vector<8x32xf32>
    %370 = vector.shape_cast %358 : vector<8x32xf32> to vector<1x8x32xf32>
    tpu.vector_store %arg5[%367, %c0_182, %c0_183], %370 {strides = array<i32>} : memref<8x8x32xf32, #tpu.memory_space<vmem>>, vector<1x8x32xf32>,
    %c4_i32 = arith.constant 4 : i32
    %c7_i32_184 = arith.constant 7 : i32
    %371 = arith.subi %c7_i32_184, %c4_i32 : i32
    %372 = arith.index_cast %c4_i32 : i32 to index
    %c0_185 = arith.constant 0 : index
    %c0_186 = arith.constant 0 : index
    %373 = vector.load %arg1[%372, %c0_185, %c0_186] : memref<8x8x128xbf16, #tpu.memory_space<vmem>>, vector<1x8x128xbf16>
    %374 = vector.shape_cast %373 : vector<1x8x128xbf16> to vector<8x128xbf16>
    %375 = arith.extf %374 : vector<8x128xbf16> to vector<8x128xf32>
    %c0_187 = arith.constant 0 : index
    %c0_188 = arith.constant 0 : index
    %376 = vector.load %arg6[%c0_187, %c0_188] : memref<8x32xf32, #tpu.memory_space<vmem>>, vector<8x32xf32>
    %cst_189 = arith.constant dense<0.000000e+00> : vector<8x128xf32>
    %377 = tpu.matmul %376, %4, %cst_189 {dimension_numbers = #tpu.dot_dimension_numbers<[1], [0], [0], [1], [0, 0, 1, 1], [], []>} : vector<8x32xf32>, vector<32x128xf32>, vector<8x128xf32> -> vector<8x128xf32>
    %378 = arith.addf %375, %377 : vector<8x128xf32>
    %379 = arith.index_cast %371 : i32 to index
    %c0_190 = arith.constant 0 : index
    %c0_191 = arith.constant 0 : index
    %380 = vector.load %arg2[%379, %c0_190, %c0_191] : memref<8x8x128xbf16, #tpu.memory_space<vmem>>, vector<1x8x128xbf16>
    %381 = vector.shape_cast %380 : vector<1x8x128xbf16> to vector<8x128xbf16>
    %382 = arith.extf %381 : vector<8x128xbf16> to vector<8x128xf32>
    %c0_192 = arith.constant 0 : index
    %c0_193 = arith.constant 0 : index
    %383 = vector.load %arg8[%c0_192, %c0_193] : memref<8x32xf32, #tpu.memory_space<vmem>>, vector<8x32xf32>
    %cst_194 = arith.constant dense<0.000000e+00> : vector<8x128xf32>
    %384 = tpu.matmul %383, %6, %cst_194 {dimension_numbers = #tpu.dot_dimension_numbers<[1], [0], [0], [1], [0, 0, 1, 1], [], []>} : vector<8x32xf32>, vector<32x128xf32>, vector<8x128xf32> -> vector<8x128xf32>
    %385 = arith.addf %382, %384 : vector<8x128xf32>
    %c0_195 = arith.constant 0 : index
    %c0_196 = arith.constant 0 : index
    %386 = vector.load %arg7[%c0_195, %c0_196] : memref<8x32xf32, #tpu.memory_space<vmem>>, vector<8x32xf32>
    %387 = vector.extract_strided_slice %378 {offsets = [0, 0], sizes = [8, 32], strides = [1, 1]} : vector<8x128xf32> to vector<8x32xf32>
    %cst_197 = arith.constant 5.000000e-01 : f32
    %388 = vector.broadcast %cst_197 : f32 to vector<8x32xf32>
    %389 = arith.mulf %388, %387 : vector<8x32xf32>
    %390 = math.tanh %389 : vector<8x32xf32>
    %cst_198 = arith.constant 5.000000e-01 : f32
    %391 = vector.broadcast %cst_198 : f32 to vector<8x32xf32>
    %392 = arith.mulf %391, %390 : vector<8x32xf32>
    %cst_199 = arith.constant 5.000000e-01 : f32
    %393 = vector.broadcast %cst_199 : f32 to vector<8x32xf32>
    %394 = arith.addf %392, %393 : vector<8x32xf32>
    %395 = vector.extract_strided_slice %378 {offsets = [0, 32], sizes = [8, 32], strides = [1, 1]} : vector<8x128xf32> to vector<8x32xf32>
    %cst_200 = arith.constant 5.000000e-01 : f32
    %396 = vector.broadcast %cst_200 : f32 to vector<8x32xf32>
    %397 = arith.mulf %396, %395 : vector<8x32xf32>
    %398 = math.tanh %397 : vector<8x32xf32>
    %cst_201 = arith.constant 5.000000e-01 : f32
    %399 = vector.broadcast %cst_201 : f32 to vector<8x32xf32>
    %400 = arith.mulf %399, %398 : vector<8x32xf32>
    %cst_202 = arith.constant 5.000000e-01 : f32
    %401 = vector.broadcast %cst_202 : f32 to vector<8x32xf32>
    %402 = arith.addf %400, %401 : vector<8x32xf32>
    %403 = vector.extract_strided_slice %378 {offsets = [0, 64], sizes = [8, 32], strides = [1, 1]} : vector<8x128xf32> to vector<8x32xf32>
    %404 = math.tanh %403 : vector<8x32xf32>
    %405 = vector.extract_strided_slice %378 {offsets = [0, 96], sizes = [8, 32], strides = [1, 1]} : vector<8x128xf32> to vector<8x32xf32>
    %cst_203 = arith.constant 5.000000e-01 : f32
    %406 = vector.broadcast %cst_203 : f32 to vector<8x32xf32>
    %407 = arith.mulf %406, %405 : vector<8x32xf32>
    %408 = math.tanh %407 : vector<8x32xf32>
    %cst_204 = arith.constant 5.000000e-01 : f32
    %409 = vector.broadcast %cst_204 : f32 to vector<8x32xf32>
    %410 = arith.mulf %409, %408 : vector<8x32xf32>
    %cst_205 = arith.constant 5.000000e-01 : f32
    %411 = vector.broadcast %cst_205 : f32 to vector<8x32xf32>
    %412 = arith.addf %410, %411 : vector<8x32xf32>
    %413 = arith.mulf %402, %386 : vector<8x32xf32>
    %414 = arith.mulf %394, %404 : vector<8x32xf32>
    %415 = arith.addf %413, %414 : vector<8x32xf32>
    %416 = math.tanh %415 : vector<8x32xf32>
    %417 = arith.mulf %412, %416 : vector<8x32xf32>
    %c0_206 = arith.constant 0 : index
    %c0_207 = arith.constant 0 : index
    %418 = vector.load %arg9[%c0_206, %c0_207] : memref<8x32xf32, #tpu.memory_space<vmem>>, vector<8x32xf32>
    %419 = vector.extract_strided_slice %385 {offsets = [0, 0], sizes = [8, 32], strides = [1, 1]} : vector<8x128xf32> to vector<8x32xf32>
    %cst_208 = arith.constant 5.000000e-01 : f32
    %420 = vector.broadcast %cst_208 : f32 to vector<8x32xf32>
    %421 = arith.mulf %420, %419 : vector<8x32xf32>
    %422 = math.tanh %421 : vector<8x32xf32>
    %cst_209 = arith.constant 5.000000e-01 : f32
    %423 = vector.broadcast %cst_209 : f32 to vector<8x32xf32>
    %424 = arith.mulf %423, %422 : vector<8x32xf32>
    %cst_210 = arith.constant 5.000000e-01 : f32
    %425 = vector.broadcast %cst_210 : f32 to vector<8x32xf32>
    %426 = arith.addf %424, %425 : vector<8x32xf32>
    %427 = vector.extract_strided_slice %385 {offsets = [0, 32], sizes = [8, 32], strides = [1, 1]} : vector<8x128xf32> to vector<8x32xf32>
    %cst_211 = arith.constant 5.000000e-01 : f32
    %428 = vector.broadcast %cst_211 : f32 to vector<8x32xf32>
    %429 = arith.mulf %428, %427 : vector<8x32xf32>
    %430 = math.tanh %429 : vector<8x32xf32>
    %cst_212 = arith.constant 5.000000e-01 : f32
    %431 = vector.broadcast %cst_212 : f32 to vector<8x32xf32>
    %432 = arith.mulf %431, %430 : vector<8x32xf32>
    %cst_213 = arith.constant 5.000000e-01 : f32
    %433 = vector.broadcast %cst_213 : f32 to vector<8x32xf32>
    %434 = arith.addf %432, %433 : vector<8x32xf32>
    %435 = vector.extract_strided_slice %385 {offsets = [0, 64], sizes = [8, 32], strides = [1, 1]} : vector<8x128xf32> to vector<8x32xf32>
    %436 = math.tanh %435 : vector<8x32xf32>
    %437 = vector.extract_strided_slice %385 {offsets = [0, 96], sizes = [8, 32], strides = [1, 1]} : vector<8x128xf32> to vector<8x32xf32>
    %cst_214 = arith.constant 5.000000e-01 : f32
    %438 = vector.broadcast %cst_214 : f32 to vector<8x32xf32>
    %439 = arith.mulf %438, %437 : vector<8x32xf32>
    %440 = math.tanh %439 : vector<8x32xf32>
    %cst_215 = arith.constant 5.000000e-01 : f32
    %441 = vector.broadcast %cst_215 : f32 to vector<8x32xf32>
    %442 = arith.mulf %441, %440 : vector<8x32xf32>
    %cst_216 = arith.constant 5.000000e-01 : f32
    %443 = vector.broadcast %cst_216 : f32 to vector<8x32xf32>
    %444 = arith.addf %442, %443 : vector<8x32xf32>
    %445 = arith.mulf %434, %418 : vector<8x32xf32>
    %446 = arith.mulf %426, %436 : vector<8x32xf32>
    %447 = arith.addf %445, %446 : vector<8x32xf32>
    %448 = math.tanh %447 : vector<8x32xf32>
    %449 = arith.mulf %444, %448 : vector<8x32xf32>
    %c0_217 = arith.constant 0 : index
    %c0_218 = arith.constant 0 : index
    %450 = vector.load %arg6[%c0_217, %c0_218] : memref<8x32xf32, #tpu.memory_space<vmem>>, vector<8x32xf32>
    tpu.vector_store %arg6[%c0_217, %c0_218], %417 {strides = array<i32>} : memref<8x32xf32, #tpu.memory_space<vmem>>, vector<8x32xf32>,
    %c0_219 = arith.constant 0 : index
    %c0_220 = arith.constant 0 : index
    %451 = vector.load %arg7[%c0_219, %c0_220] : memref<8x32xf32, #tpu.memory_space<vmem>>, vector<8x32xf32>
    tpu.vector_store %arg7[%c0_219, %c0_220], %415 {strides = array<i32>} : memref<8x32xf32, #tpu.memory_space<vmem>>, vector<8x32xf32>,
    %c0_221 = arith.constant 0 : index
    %c0_222 = arith.constant 0 : index
    %452 = vector.load %arg8[%c0_221, %c0_222] : memref<8x32xf32, #tpu.memory_space<vmem>>, vector<8x32xf32>
    tpu.vector_store %arg8[%c0_221, %c0_222], %449 {strides = array<i32>} : memref<8x32xf32, #tpu.memory_space<vmem>>, vector<8x32xf32>,
    %c0_223 = arith.constant 0 : index
    %c0_224 = arith.constant 0 : index
    %453 = vector.load %arg9[%c0_223, %c0_224] : memref<8x32xf32, #tpu.memory_space<vmem>>, vector<8x32xf32>
    tpu.vector_store %arg9[%c0_223, %c0_224], %447 {strides = array<i32>} : memref<8x32xf32, #tpu.memory_space<vmem>>, vector<8x32xf32>,
    %454 = arith.index_cast %c4_i32 : i32 to index
    %c0_225 = arith.constant 0 : index
    %c0_226 = arith.constant 0 : index
    %455 = vector.load %arg4[%454, %c0_225, %c0_226] : memref<8x8x32xf32, #tpu.memory_space<vmem>>, vector<1x8x32xf32>
    %456 = vector.shape_cast %455 : vector<1x8x32xf32> to vector<8x32xf32>
    %457 = vector.shape_cast %417 : vector<8x32xf32> to vector<1x8x32xf32>
    tpu.vector_store %arg4[%454, %c0_225, %c0_226], %457 {strides = array<i32>} : memref<8x8x32xf32, #tpu.memory_space<vmem>>, vector<1x8x32xf32>,
    %458 = arith.index_cast %371 : i32 to index
    %c0_227 = arith.constant 0 : index
    %c0_228 = arith.constant 0 : index
    %459 = vector.load %arg5[%458, %c0_227, %c0_228] : memref<8x8x32xf32, #tpu.memory_space<vmem>>, vector<1x8x32xf32>
    %460 = vector.shape_cast %459 : vector<1x8x32xf32> to vector<8x32xf32>
    %461 = vector.shape_cast %449 : vector<8x32xf32> to vector<1x8x32xf32>
    tpu.vector_store %arg5[%458, %c0_227, %c0_228], %461 {strides = array<i32>} : memref<8x8x32xf32, #tpu.memory_space<vmem>>, vector<1x8x32xf32>,
    %c5_i32 = arith.constant 5 : i32
    %c7_i32_229 = arith.constant 7 : i32
    %462 = arith.subi %c7_i32_229, %c5_i32 : i32
    %463 = arith.index_cast %c5_i32 : i32 to index
    %c0_230 = arith.constant 0 : index
    %c0_231 = arith.constant 0 : index
    %464 = vector.load %arg1[%463, %c0_230, %c0_231] : memref<8x8x128xbf16, #tpu.memory_space<vmem>>, vector<1x8x128xbf16>
    %465 = vector.shape_cast %464 : vector<1x8x128xbf16> to vector<8x128xbf16>
    %466 = arith.extf %465 : vector<8x128xbf16> to vector<8x128xf32>
    %c0_232 = arith.constant 0 : index
    %c0_233 = arith.constant 0 : index
    %467 = vector.load %arg6[%c0_232, %c0_233] : memref<8x32xf32, #tpu.memory_space<vmem>>, vector<8x32xf32>
    %cst_234 = arith.constant dense<0.000000e+00> : vector<8x128xf32>
    %468 = tpu.matmul %467, %4, %cst_234 {dimension_numbers = #tpu.dot_dimension_numbers<[1], [0], [0], [1], [0, 0, 1, 1], [], []>} : vector<8x32xf32>, vector<32x128xf32>, vector<8x128xf32> -> vector<8x128xf32>
    %469 = arith.addf %466, %468 : vector<8x128xf32>
    %470 = arith.index_cast %462 : i32 to index
    %c0_235 = arith.constant 0 : index
    %c0_236 = arith.constant 0 : index
    %471 = vector.load %arg2[%470, %c0_235, %c0_236] : memref<8x8x128xbf16, #tpu.memory_space<vmem>>, vector<1x8x128xbf16>
    %472 = vector.shape_cast %471 : vector<1x8x128xbf16> to vector<8x128xbf16>
    %473 = arith.extf %472 : vector<8x128xbf16> to vector<8x128xf32>
    %c0_237 = arith.constant 0 : index
    %c0_238 = arith.constant 0 : index
    %474 = vector.load %arg8[%c0_237, %c0_238] : memref<8x32xf32, #tpu.memory_space<vmem>>, vector<8x32xf32>
    %cst_239 = arith.constant dense<0.000000e+00> : vector<8x128xf32>
    %475 = tpu.matmul %474, %6, %cst_239 {dimension_numbers = #tpu.dot_dimension_numbers<[1], [0], [0], [1], [0, 0, 1, 1], [], []>} : vector<8x32xf32>, vector<32x128xf32>, vector<8x128xf32> -> vector<8x128xf32>
    %476 = arith.addf %473, %475 : vector<8x128xf32>
    %c0_240 = arith.constant 0 : index
    %c0_241 = arith.constant 0 : index
    %477 = vector.load %arg7[%c0_240, %c0_241] : memref<8x32xf32, #tpu.memory_space<vmem>>, vector<8x32xf32>
    %478 = vector.extract_strided_slice %469 {offsets = [0, 0], sizes = [8, 32], strides = [1, 1]} : vector<8x128xf32> to vector<8x32xf32>
    %cst_242 = arith.constant 5.000000e-01 : f32
    %479 = vector.broadcast %cst_242 : f32 to vector<8x32xf32>
    %480 = arith.mulf %479, %478 : vector<8x32xf32>
    %481 = math.tanh %480 : vector<8x32xf32>
    %cst_243 = arith.constant 5.000000e-01 : f32
    %482 = vector.broadcast %cst_243 : f32 to vector<8x32xf32>
    %483 = arith.mulf %482, %481 : vector<8x32xf32>
    %cst_244 = arith.constant 5.000000e-01 : f32
    %484 = vector.broadcast %cst_244 : f32 to vector<8x32xf32>
    %485 = arith.addf %483, %484 : vector<8x32xf32>
    %486 = vector.extract_strided_slice %469 {offsets = [0, 32], sizes = [8, 32], strides = [1, 1]} : vector<8x128xf32> to vector<8x32xf32>
    %cst_245 = arith.constant 5.000000e-01 : f32
    %487 = vector.broadcast %cst_245 : f32 to vector<8x32xf32>
    %488 = arith.mulf %487, %486 : vector<8x32xf32>
    %489 = math.tanh %488 : vector<8x32xf32>
    %cst_246 = arith.constant 5.000000e-01 : f32
    %490 = vector.broadcast %cst_246 : f32 to vector<8x32xf32>
    %491 = arith.mulf %490, %489 : vector<8x32xf32>
    %cst_247 = arith.constant 5.000000e-01 : f32
    %492 = vector.broadcast %cst_247 : f32 to vector<8x32xf32>
    %493 = arith.addf %491, %492 : vector<8x32xf32>
    %494 = vector.extract_strided_slice %469 {offsets = [0, 64], sizes = [8, 32], strides = [1, 1]} : vector<8x128xf32> to vector<8x32xf32>
    %495 = math.tanh %494 : vector<8x32xf32>
    %496 = vector.extract_strided_slice %469 {offsets = [0, 96], sizes = [8, 32], strides = [1, 1]} : vector<8x128xf32> to vector<8x32xf32>
    %cst_248 = arith.constant 5.000000e-01 : f32
    %497 = vector.broadcast %cst_248 : f32 to vector<8x32xf32>
    %498 = arith.mulf %497, %496 : vector<8x32xf32>
    %499 = math.tanh %498 : vector<8x32xf32>
    %cst_249 = arith.constant 5.000000e-01 : f32
    %500 = vector.broadcast %cst_249 : f32 to vector<8x32xf32>
    %501 = arith.mulf %500, %499 : vector<8x32xf32>
    %cst_250 = arith.constant 5.000000e-01 : f32
    %502 = vector.broadcast %cst_250 : f32 to vector<8x32xf32>
    %503 = arith.addf %501, %502 : vector<8x32xf32>
    %504 = arith.mulf %493, %477 : vector<8x32xf32>
    %505 = arith.mulf %485, %495 : vector<8x32xf32>
    %506 = arith.addf %504, %505 : vector<8x32xf32>
    %507 = math.tanh %506 : vector<8x32xf32>
    %508 = arith.mulf %503, %507 : vector<8x32xf32>
    %c0_251 = arith.constant 0 : index
    %c0_252 = arith.constant 0 : index
    %509 = vector.load %arg9[%c0_251, %c0_252] : memref<8x32xf32, #tpu.memory_space<vmem>>, vector<8x32xf32>
    %510 = vector.extract_strided_slice %476 {offsets = [0, 0], sizes = [8, 32], strides = [1, 1]} : vector<8x128xf32> to vector<8x32xf32>
    %cst_253 = arith.constant 5.000000e-01 : f32
    %511 = vector.broadcast %cst_253 : f32 to vector<8x32xf32>
    %512 = arith.mulf %511, %510 : vector<8x32xf32>
    %513 = math.tanh %512 : vector<8x32xf32>
    %cst_254 = arith.constant 5.000000e-01 : f32
    %514 = vector.broadcast %cst_254 : f32 to vector<8x32xf32>
    %515 = arith.mulf %514, %513 : vector<8x32xf32>
    %cst_255 = arith.constant 5.000000e-01 : f32
    %516 = vector.broadcast %cst_255 : f32 to vector<8x32xf32>
    %517 = arith.addf %515, %516 : vector<8x32xf32>
    %518 = vector.extract_strided_slice %476 {offsets = [0, 32], sizes = [8, 32], strides = [1, 1]} : vector<8x128xf32> to vector<8x32xf32>
    %cst_256 = arith.constant 5.000000e-01 : f32
    %519 = vector.broadcast %cst_256 : f32 to vector<8x32xf32>
    %520 = arith.mulf %519, %518 : vector<8x32xf32>
    %521 = math.tanh %520 : vector<8x32xf32>
    %cst_257 = arith.constant 5.000000e-01 : f32
    %522 = vector.broadcast %cst_257 : f32 to vector<8x32xf32>
    %523 = arith.mulf %522, %521 : vector<8x32xf32>
    %cst_258 = arith.constant 5.000000e-01 : f32
    %524 = vector.broadcast %cst_258 : f32 to vector<8x32xf32>
    %525 = arith.addf %523, %524 : vector<8x32xf32>
    %526 = vector.extract_strided_slice %476 {offsets = [0, 64], sizes = [8, 32], strides = [1, 1]} : vector<8x128xf32> to vector<8x32xf32>
    %527 = math.tanh %526 : vector<8x32xf32>
    %528 = vector.extract_strided_slice %476 {offsets = [0, 96], sizes = [8, 32], strides = [1, 1]} : vector<8x128xf32> to vector<8x32xf32>
    %cst_259 = arith.constant 5.000000e-01 : f32
    %529 = vector.broadcast %cst_259 : f32 to vector<8x32xf32>
    %530 = arith.mulf %529, %528 : vector<8x32xf32>
    %531 = math.tanh %530 : vector<8x32xf32>
    %cst_260 = arith.constant 5.000000e-01 : f32
    %532 = vector.broadcast %cst_260 : f32 to vector<8x32xf32>
    %533 = arith.mulf %532, %531 : vector<8x32xf32>
    %cst_261 = arith.constant 5.000000e-01 : f32
    %534 = vector.broadcast %cst_261 : f32 to vector<8x32xf32>
    %535 = arith.addf %533, %534 : vector<8x32xf32>
    %536 = arith.mulf %525, %509 : vector<8x32xf32>
    %537 = arith.mulf %517, %527 : vector<8x32xf32>
    %538 = arith.addf %536, %537 : vector<8x32xf32>
    %539 = math.tanh %538 : vector<8x32xf32>
    %540 = arith.mulf %535, %539 : vector<8x32xf32>
    %c0_262 = arith.constant 0 : index
    %c0_263 = arith.constant 0 : index
    %541 = vector.load %arg6[%c0_262, %c0_263] : memref<8x32xf32, #tpu.memory_space<vmem>>, vector<8x32xf32>
    tpu.vector_store %arg6[%c0_262, %c0_263], %508 {strides = array<i32>} : memref<8x32xf32, #tpu.memory_space<vmem>>, vector<8x32xf32>,
    %c0_264 = arith.constant 0 : index
    %c0_265 = arith.constant 0 : index
    %542 = vector.load %arg7[%c0_264, %c0_265] : memref<8x32xf32, #tpu.memory_space<vmem>>, vector<8x32xf32>
    tpu.vector_store %arg7[%c0_264, %c0_265], %506 {strides = array<i32>} : memref<8x32xf32, #tpu.memory_space<vmem>>, vector<8x32xf32>,
    %c0_266 = arith.constant 0 : index
    %c0_267 = arith.constant 0 : index
    %543 = vector.load %arg8[%c0_266, %c0_267] : memref<8x32xf32, #tpu.memory_space<vmem>>, vector<8x32xf32>
    tpu.vector_store %arg8[%c0_266, %c0_267], %540 {strides = array<i32>} : memref<8x32xf32, #tpu.memory_space<vmem>>, vector<8x32xf32>,
    %c0_268 = arith.constant 0 : index
    %c0_269 = arith.constant 0 : index
    %544 = vector.load %arg9[%c0_268, %c0_269] : memref<8x32xf32, #tpu.memory_space<vmem>>, vector<8x32xf32>
    tpu.vector_store %arg9[%c0_268, %c0_269], %538 {strides = array<i32>} : memref<8x32xf32, #tpu.memory_space<vmem>>, vector<8x32xf32>,
    %545 = arith.index_cast %c5_i32 : i32 to index
    %c0_270 = arith.constant 0 : index
    %c0_271 = arith.constant 0 : index
    %546 = vector.load %arg4[%545, %c0_270, %c0_271] : memref<8x8x32xf32, #tpu.memory_space<vmem>>, vector<1x8x32xf32>
    %547 = vector.shape_cast %546 : vector<1x8x32xf32> to vector<8x32xf32>
    %548 = vector.shape_cast %508 : vector<8x32xf32> to vector<1x8x32xf32>
    tpu.vector_store %arg4[%545, %c0_270, %c0_271], %548 {strides = array<i32>} : memref<8x8x32xf32, #tpu.memory_space<vmem>>, vector<1x8x32xf32>,
    %549 = arith.index_cast %462 : i32 to index
    %c0_272 = arith.constant 0 : index
    %c0_273 = arith.constant 0 : index
    %550 = vector.load %arg5[%549, %c0_272, %c0_273] : memref<8x8x32xf32, #tpu.memory_space<vmem>>, vector<1x8x32xf32>
    %551 = vector.shape_cast %550 : vector<1x8x32xf32> to vector<8x32xf32>
    %552 = vector.shape_cast %540 : vector<8x32xf32> to vector<1x8x32xf32>
    tpu.vector_store %arg5[%549, %c0_272, %c0_273], %552 {strides = array<i32>} : memref<8x8x32xf32, #tpu.memory_space<vmem>>, vector<1x8x32xf32>,
    %c6_i32 = arith.constant 6 : i32
    %c7_i32_274 = arith.constant 7 : i32
    %553 = arith.subi %c7_i32_274, %c6_i32 : i32
    %554 = arith.index_cast %c6_i32 : i32 to index
    %c0_275 = arith.constant 0 : index
    %c0_276 = arith.constant 0 : index
    %555 = vector.load %arg1[%554, %c0_275, %c0_276] : memref<8x8x128xbf16, #tpu.memory_space<vmem>>, vector<1x8x128xbf16>
    %556 = vector.shape_cast %555 : vector<1x8x128xbf16> to vector<8x128xbf16>
    %557 = arith.extf %556 : vector<8x128xbf16> to vector<8x128xf32>
    %c0_277 = arith.constant 0 : index
    %c0_278 = arith.constant 0 : index
    %558 = vector.load %arg6[%c0_277, %c0_278] : memref<8x32xf32, #tpu.memory_space<vmem>>, vector<8x32xf32>
    %cst_279 = arith.constant dense<0.000000e+00> : vector<8x128xf32>
    %559 = tpu.matmul %558, %4, %cst_279 {dimension_numbers = #tpu.dot_dimension_numbers<[1], [0], [0], [1], [0, 0, 1, 1], [], []>} : vector<8x32xf32>, vector<32x128xf32>, vector<8x128xf32> -> vector<8x128xf32>
    %560 = arith.addf %557, %559 : vector<8x128xf32>
    %561 = arith.index_cast %553 : i32 to index
    %c0_280 = arith.constant 0 : index
    %c0_281 = arith.constant 0 : index
    %562 = vector.load %arg2[%561, %c0_280, %c0_281] : memref<8x8x128xbf16, #tpu.memory_space<vmem>>, vector<1x8x128xbf16>
    %563 = vector.shape_cast %562 : vector<1x8x128xbf16> to vector<8x128xbf16>
    %564 = arith.extf %563 : vector<8x128xbf16> to vector<8x128xf32>
    %c0_282 = arith.constant 0 : index
    %c0_283 = arith.constant 0 : index
    %565 = vector.load %arg8[%c0_282, %c0_283] : memref<8x32xf32, #tpu.memory_space<vmem>>, vector<8x32xf32>
    %cst_284 = arith.constant dense<0.000000e+00> : vector<8x128xf32>
    %566 = tpu.matmul %565, %6, %cst_284 {dimension_numbers = #tpu.dot_dimension_numbers<[1], [0], [0], [1], [0, 0, 1, 1], [], []>} : vector<8x32xf32>, vector<32x128xf32>, vector<8x128xf32> -> vector<8x128xf32>
    %567 = arith.addf %564, %566 : vector<8x128xf32>
    %c0_285 = arith.constant 0 : index
    %c0_286 = arith.constant 0 : index
    %568 = vector.load %arg7[%c0_285, %c0_286] : memref<8x32xf32, #tpu.memory_space<vmem>>, vector<8x32xf32>
    %569 = vector.extract_strided_slice %560 {offsets = [0, 0], sizes = [8, 32], strides = [1, 1]} : vector<8x128xf32> to vector<8x32xf32>
    %cst_287 = arith.constant 5.000000e-01 : f32
    %570 = vector.broadcast %cst_287 : f32 to vector<8x32xf32>
    %571 = arith.mulf %570, %569 : vector<8x32xf32>
    %572 = math.tanh %571 : vector<8x32xf32>
    %cst_288 = arith.constant 5.000000e-01 : f32
    %573 = vector.broadcast %cst_288 : f32 to vector<8x32xf32>
    %574 = arith.mulf %573, %572 : vector<8x32xf32>
    %cst_289 = arith.constant 5.000000e-01 : f32
    %575 = vector.broadcast %cst_289 : f32 to vector<8x32xf32>
    %576 = arith.addf %574, %575 : vector<8x32xf32>
    %577 = vector.extract_strided_slice %560 {offsets = [0, 32], sizes = [8, 32], strides = [1, 1]} : vector<8x128xf32> to vector<8x32xf32>
    %cst_290 = arith.constant 5.000000e-01 : f32
    %578 = vector.broadcast %cst_290 : f32 to vector<8x32xf32>
    %579 = arith.mulf %578, %577 : vector<8x32xf32>
    %580 = math.tanh %579 : vector<8x32xf32>
    %cst_291 = arith.constant 5.000000e-01 : f32
    %581 = vector.broadcast %cst_291 : f32 to vector<8x32xf32>
    %582 = arith.mulf %581, %580 : vector<8x32xf32>
    %cst_292 = arith.constant 5.000000e-01 : f32
    %583 = vector.broadcast %cst_292 : f32 to vector<8x32xf32>
    %584 = arith.addf %582, %583 : vector<8x32xf32>
    %585 = vector.extract_strided_slice %560 {offsets = [0, 64], sizes = [8, 32], strides = [1, 1]} : vector<8x128xf32> to vector<8x32xf32>
    %586 = math.tanh %585 : vector<8x32xf32>
    %587 = vector.extract_strided_slice %560 {offsets = [0, 96], sizes = [8, 32], strides = [1, 1]} : vector<8x128xf32> to vector<8x32xf32>
    %cst_293 = arith.constant 5.000000e-01 : f32
    %588 = vector.broadcast %cst_293 : f32 to vector<8x32xf32>
    %589 = arith.mulf %588, %587 : vector<8x32xf32>
    %590 = math.tanh %589 : vector<8x32xf32>
    %cst_294 = arith.constant 5.000000e-01 : f32
    %591 = vector.broadcast %cst_294 : f32 to vector<8x32xf32>
    %592 = arith.mulf %591, %590 : vector<8x32xf32>
    %cst_295 = arith.constant 5.000000e-01 : f32
    %593 = vector.broadcast %cst_295 : f32 to vector<8x32xf32>
    %594 = arith.addf %592, %593 : vector<8x32xf32>
    %595 = arith.mulf %584, %568 : vector<8x32xf32>
    %596 = arith.mulf %576, %586 : vector<8x32xf32>
    %597 = arith.addf %595, %596 : vector<8x32xf32>
    %598 = math.tanh %597 : vector<8x32xf32>
    %599 = arith.mulf %594, %598 : vector<8x32xf32>
    %c0_296 = arith.constant 0 : index
    %c0_297 = arith.constant 0 : index
    %600 = vector.load %arg9[%c0_296, %c0_297] : memref<8x32xf32, #tpu.memory_space<vmem>>, vector<8x32xf32>
    %601 = vector.extract_strided_slice %567 {offsets = [0, 0], sizes = [8, 32], strides = [1, 1]} : vector<8x128xf32> to vector<8x32xf32>
    %cst_298 = arith.constant 5.000000e-01 : f32
    %602 = vector.broadcast %cst_298 : f32 to vector<8x32xf32>
    %603 = arith.mulf %602, %601 : vector<8x32xf32>
    %604 = math.tanh %603 : vector<8x32xf32>
    %cst_299 = arith.constant 5.000000e-01 : f32
    %605 = vector.broadcast %cst_299 : f32 to vector<8x32xf32>
    %606 = arith.mulf %605, %604 : vector<8x32xf32>
    %cst_300 = arith.constant 5.000000e-01 : f32
    %607 = vector.broadcast %cst_300 : f32 to vector<8x32xf32>
    %608 = arith.addf %606, %607 : vector<8x32xf32>
    %609 = vector.extract_strided_slice %567 {offsets = [0, 32], sizes = [8, 32], strides = [1, 1]} : vector<8x128xf32> to vector<8x32xf32>
    %cst_301 = arith.constant 5.000000e-01 : f32
    %610 = vector.broadcast %cst_301 : f32 to vector<8x32xf32>
    %611 = arith.mulf %610, %609 : vector<8x32xf32>
    %612 = math.tanh %611 : vector<8x32xf32>
    %cst_302 = arith.constant 5.000000e-01 : f32
    %613 = vector.broadcast %cst_302 : f32 to vector<8x32xf32>
    %614 = arith.mulf %613, %612 : vector<8x32xf32>
    %cst_303 = arith.constant 5.000000e-01 : f32
    %615 = vector.broadcast %cst_303 : f32 to vector<8x32xf32>
    %616 = arith.addf %614, %615 : vector<8x32xf32>
    %617 = vector.extract_strided_slice %567 {offsets = [0, 64], sizes = [8, 32], strides = [1, 1]} : vector<8x128xf32> to vector<8x32xf32>
    %618 = math.tanh %617 : vector<8x32xf32>
    %619 = vector.extract_strided_slice %567 {offsets = [0, 96], sizes = [8, 32], strides = [1, 1]} : vector<8x128xf32> to vector<8x32xf32>
    %cst_304 = arith.constant 5.000000e-01 : f32
    %620 = vector.broadcast %cst_304 : f32 to vector<8x32xf32>
    %621 = arith.mulf %620, %619 : vector<8x32xf32>
    %622 = math.tanh %621 : vector<8x32xf32>
    %cst_305 = arith.constant 5.000000e-01 : f32
    %623 = vector.broadcast %cst_305 : f32 to vector<8x32xf32>
    %624 = arith.mulf %623, %622 : vector<8x32xf32>
    %cst_306 = arith.constant 5.000000e-01 : f32
    %625 = vector.broadcast %cst_306 : f32 to vector<8x32xf32>
    %626 = arith.addf %624, %625 : vector<8x32xf32>
    %627 = arith.mulf %616, %600 : vector<8x32xf32>
    %628 = arith.mulf %608, %618 : vector<8x32xf32>
    %629 = arith.addf %627, %628 : vector<8x32xf32>
    %630 = math.tanh %629 : vector<8x32xf32>
    %631 = arith.mulf %626, %630 : vector<8x32xf32>
    %c0_307 = arith.constant 0 : index
    %c0_308 = arith.constant 0 : index
    %632 = vector.load %arg6[%c0_307, %c0_308] : memref<8x32xf32, #tpu.memory_space<vmem>>, vector<8x32xf32>
    tpu.vector_store %arg6[%c0_307, %c0_308], %599 {strides = array<i32>} : memref<8x32xf32, #tpu.memory_space<vmem>>, vector<8x32xf32>,
    %c0_309 = arith.constant 0 : index
    %c0_310 = arith.constant 0 : index
    %633 = vector.load %arg7[%c0_309, %c0_310] : memref<8x32xf32, #tpu.memory_space<vmem>>, vector<8x32xf32>
    tpu.vector_store %arg7[%c0_309, %c0_310], %597 {strides = array<i32>} : memref<8x32xf32, #tpu.memory_space<vmem>>, vector<8x32xf32>,
    %c0_311 = arith.constant 0 : index
    %c0_312 = arith.constant 0 : index
    %634 = vector.load %arg8[%c0_311, %c0_312] : memref<8x32xf32, #tpu.memory_space<vmem>>, vector<8x32xf32>
    tpu.vector_store %arg8[%c0_311, %c0_312], %631 {strides = array<i32>} : memref<8x32xf32, #tpu.memory_space<vmem>>, vector<8x32xf32>,
    %c0_313 = arith.constant 0 : index
    %c0_314 = arith.constant 0 : index
    %635 = vector.load %arg9[%c0_313, %c0_314] : memref<8x32xf32, #tpu.memory_space<vmem>>, vector<8x32xf32>
    tpu.vector_store %arg9[%c0_313, %c0_314], %629 {strides = array<i32>} : memref<8x32xf32, #tpu.memory_space<vmem>>, vector<8x32xf32>,
    %636 = arith.index_cast %c6_i32 : i32 to index
    %c0_315 = arith.constant 0 : index
    %c0_316 = arith.constant 0 : index
    %637 = vector.load %arg4[%636, %c0_315, %c0_316] : memref<8x8x32xf32, #tpu.memory_space<vmem>>, vector<1x8x32xf32>
    %638 = vector.shape_cast %637 : vector<1x8x32xf32> to vector<8x32xf32>
    %639 = vector.shape_cast %599 : vector<8x32xf32> to vector<1x8x32xf32>
    tpu.vector_store %arg4[%636, %c0_315, %c0_316], %639 {strides = array<i32>} : memref<8x8x32xf32, #tpu.memory_space<vmem>>, vector<1x8x32xf32>,
    %640 = arith.index_cast %553 : i32 to index
    %c0_317 = arith.constant 0 : index
    %c0_318 = arith.constant 0 : index
    %641 = vector.load %arg5[%640, %c0_317, %c0_318] : memref<8x8x32xf32, #tpu.memory_space<vmem>>, vector<1x8x32xf32>
    %642 = vector.shape_cast %641 : vector<1x8x32xf32> to vector<8x32xf32>
    %643 = vector.shape_cast %631 : vector<8x32xf32> to vector<1x8x32xf32>
    tpu.vector_store %arg5[%640, %c0_317, %c0_318], %643 {strides = array<i32>} : memref<8x8x32xf32, #tpu.memory_space<vmem>>, vector<1x8x32xf32>,
    %c7_i32_319 = arith.constant 7 : i32
    %c7_i32_320 = arith.constant 7 : i32
    %644 = arith.subi %c7_i32_320, %c7_i32_319 : i32
    %645 = arith.index_cast %c7_i32_319 : i32 to index
    %c0_321 = arith.constant 0 : index
    %c0_322 = arith.constant 0 : index
    %646 = vector.load %arg1[%645, %c0_321, %c0_322] : memref<8x8x128xbf16, #tpu.memory_space<vmem>>, vector<1x8x128xbf16>
    %647 = vector.shape_cast %646 : vector<1x8x128xbf16> to vector<8x128xbf16>
    %648 = arith.extf %647 : vector<8x128xbf16> to vector<8x128xf32>
    %c0_323 = arith.constant 0 : index
    %c0_324 = arith.constant 0 : index
    %649 = vector.load %arg6[%c0_323, %c0_324] : memref<8x32xf32, #tpu.memory_space<vmem>>, vector<8x32xf32>
    %cst_325 = arith.constant dense<0.000000e+00> : vector<8x128xf32>
    %650 = tpu.matmul %649, %4, %cst_325 {dimension_numbers = #tpu.dot_dimension_numbers<[1], [0], [0], [1], [0, 0, 1, 1], [], []>} : vector<8x32xf32>, vector<32x128xf32>, vector<8x128xf32> -> vector<8x128xf32>
    %651 = arith.addf %648, %650 : vector<8x128xf32>
    %652 = arith.index_cast %644 : i32 to index
    %c0_326 = arith.constant 0 : index
    %c0_327 = arith.constant 0 : index
    %653 = vector.load %arg2[%652, %c0_326, %c0_327] : memref<8x8x128xbf16, #tpu.memory_space<vmem>>, vector<1x8x128xbf16>
    %654 = vector.shape_cast %653 : vector<1x8x128xbf16> to vector<8x128xbf16>
    %655 = arith.extf %654 : vector<8x128xbf16> to vector<8x128xf32>
    %c0_328 = arith.constant 0 : index
    %c0_329 = arith.constant 0 : index
    %656 = vector.load %arg8[%c0_328, %c0_329] : memref<8x32xf32, #tpu.memory_space<vmem>>, vector<8x32xf32>
    %cst_330 = arith.constant dense<0.000000e+00> : vector<8x128xf32>
    %657 = tpu.matmul %656, %6, %cst_330 {dimension_numbers = #tpu.dot_dimension_numbers<[1], [0], [0], [1], [0, 0, 1, 1], [], []>} : vector<8x32xf32>, vector<32x128xf32>, vector<8x128xf32> -> vector<8x128xf32>
    %658 = arith.addf %655, %657 : vector<8x128xf32>
    %c0_331 = arith.constant 0 : index
    %c0_332 = arith.constant 0 : index
    %659 = vector.load %arg7[%c0_331, %c0_332] : memref<8x32xf32, #tpu.memory_space<vmem>>, vector<8x32xf32>
    %660 = vector.extract_strided_slice %651 {offsets = [0, 0], sizes = [8, 32], strides = [1, 1]} : vector<8x128xf32> to vector<8x32xf32>
    %cst_333 = arith.constant 5.000000e-01 : f32
    %661 = vector.broadcast %cst_333 : f32 to vector<8x32xf32>
    %662 = arith.mulf %661, %660 : vector<8x32xf32>
    %663 = math.tanh %662 : vector<8x32xf32>
    %cst_334 = arith.constant 5.000000e-01 : f32
    %664 = vector.broadcast %cst_334 : f32 to vector<8x32xf32>
    %665 = arith.mulf %664, %663 : vector<8x32xf32>
    %cst_335 = arith.constant 5.000000e-01 : f32
    %666 = vector.broadcast %cst_335 : f32 to vector<8x32xf32>
    %667 = arith.addf %665, %666 : vector<8x32xf32>
    %668 = vector.extract_strided_slice %651 {offsets = [0, 32], sizes = [8, 32], strides = [1, 1]} : vector<8x128xf32> to vector<8x32xf32>
    %cst_336 = arith.constant 5.000000e-01 : f32
    %669 = vector.broadcast %cst_336 : f32 to vector<8x32xf32>
    %670 = arith.mulf %669, %668 : vector<8x32xf32>
    %671 = math.tanh %670 : vector<8x32xf32>
    %cst_337 = arith.constant 5.000000e-01 : f32
    %672 = vector.broadcast %cst_337 : f32 to vector<8x32xf32>
    %673 = arith.mulf %672, %671 : vector<8x32xf32>
    %cst_338 = arith.constant 5.000000e-01 : f32
    %674 = vector.broadcast %cst_338 : f32 to vector<8x32xf32>
    %675 = arith.addf %673, %674 : vector<8x32xf32>
    %676 = vector.extract_strided_slice %651 {offsets = [0, 64], sizes = [8, 32], strides = [1, 1]} : vector<8x128xf32> to vector<8x32xf32>
    %677 = math.tanh %676 : vector<8x32xf32>
    %678 = vector.extract_strided_slice %651 {offsets = [0, 96], sizes = [8, 32], strides = [1, 1]} : vector<8x128xf32> to vector<8x32xf32>
    %cst_339 = arith.constant 5.000000e-01 : f32
    %679 = vector.broadcast %cst_339 : f32 to vector<8x32xf32>
    %680 = arith.mulf %679, %678 : vector<8x32xf32>
    %681 = math.tanh %680 : vector<8x32xf32>
    %cst_340 = arith.constant 5.000000e-01 : f32
    %682 = vector.broadcast %cst_340 : f32 to vector<8x32xf32>
    %683 = arith.mulf %682, %681 : vector<8x32xf32>
    %cst_341 = arith.constant 5.000000e-01 : f32
    %684 = vector.broadcast %cst_341 : f32 to vector<8x32xf32>
    %685 = arith.addf %683, %684 : vector<8x32xf32>
    %686 = arith.mulf %675, %659 : vector<8x32xf32>
    %687 = arith.mulf %667, %677 : vector<8x32xf32>
    %688 = arith.addf %686, %687 : vector<8x32xf32>
    %689 = math.tanh %688 : vector<8x32xf32>
    %690 = arith.mulf %685, %689 : vector<8x32xf32>
    %c0_342 = arith.constant 0 : index
    %c0_343 = arith.constant 0 : index
    %691 = vector.load %arg9[%c0_342, %c0_343] : memref<8x32xf32, #tpu.memory_space<vmem>>, vector<8x32xf32>
    %692 = vector.extract_strided_slice %658 {offsets = [0, 0], sizes = [8, 32], strides = [1, 1]} : vector<8x128xf32> to vector<8x32xf32>
    %cst_344 = arith.constant 5.000000e-01 : f32
    %693 = vector.broadcast %cst_344 : f32 to vector<8x32xf32>
    %694 = arith.mulf %693, %692 : vector<8x32xf32>
    %695 = math.tanh %694 : vector<8x32xf32>
    %cst_345 = arith.constant 5.000000e-01 : f32
    %696 = vector.broadcast %cst_345 : f32 to vector<8x32xf32>
    %697 = arith.mulf %696, %695 : vector<8x32xf32>
    %cst_346 = arith.constant 5.000000e-01 : f32
    %698 = vector.broadcast %cst_346 : f32 to vector<8x32xf32>
    %699 = arith.addf %697, %698 : vector<8x32xf32>
    %700 = vector.extract_strided_slice %658 {offsets = [0, 32], sizes = [8, 32], strides = [1, 1]} : vector<8x128xf32> to vector<8x32xf32>
    %cst_347 = arith.constant 5.000000e-01 : f32
    %701 = vector.broadcast %cst_347 : f32 to vector<8x32xf32>
    %702 = arith.mulf %701, %700 : vector<8x32xf32>
    %703 = math.tanh %702 : vector<8x32xf32>
    %cst_348 = arith.constant 5.000000e-01 : f32
    %704 = vector.broadcast %cst_348 : f32 to vector<8x32xf32>
    %705 = arith.mulf %704, %703 : vector<8x32xf32>
    %cst_349 = arith.constant 5.000000e-01 : f32
    %706 = vector.broadcast %cst_349 : f32 to vector<8x32xf32>
    %707 = arith.addf %705, %706 : vector<8x32xf32>
    %708 = vector.extract_strided_slice %658 {offsets = [0, 64], sizes = [8, 32], strides = [1, 1]} : vector<8x128xf32> to vector<8x32xf32>
    %709 = math.tanh %708 : vector<8x32xf32>
    %710 = vector.extract_strided_slice %658 {offsets = [0, 96], sizes = [8, 32], strides = [1, 1]} : vector<8x128xf32> to vector<8x32xf32>
    %cst_350 = arith.constant 5.000000e-01 : f32
    %711 = vector.broadcast %cst_350 : f32 to vector<8x32xf32>
    %712 = arith.mulf %711, %710 : vector<8x32xf32>
    %713 = math.tanh %712 : vector<8x32xf32>
    %cst_351 = arith.constant 5.000000e-01 : f32
    %714 = vector.broadcast %cst_351 : f32 to vector<8x32xf32>
    %715 = arith.mulf %714, %713 : vector<8x32xf32>
    %cst_352 = arith.constant 5.000000e-01 : f32
    %716 = vector.broadcast %cst_352 : f32 to vector<8x32xf32>
    %717 = arith.addf %715, %716 : vector<8x32xf32>
    %718 = arith.mulf %707, %691 : vector<8x32xf32>
    %719 = arith.mulf %699, %709 : vector<8x32xf32>
    %720 = arith.addf %718, %719 : vector<8x32xf32>
    %721 = math.tanh %720 : vector<8x32xf32>
    %722 = arith.mulf %717, %721 : vector<8x32xf32>
    %c0_353 = arith.constant 0 : index
    %c0_354 = arith.constant 0 : index
    %723 = vector.load %arg6[%c0_353, %c0_354] : memref<8x32xf32, #tpu.memory_space<vmem>>, vector<8x32xf32>
    tpu.vector_store %arg6[%c0_353, %c0_354], %690 {strides = array<i32>} : memref<8x32xf32, #tpu.memory_space<vmem>>, vector<8x32xf32>,
    %c0_355 = arith.constant 0 : index
    %c0_356 = arith.constant 0 : index
    %724 = vector.load %arg7[%c0_355, %c0_356] : memref<8x32xf32, #tpu.memory_space<vmem>>, vector<8x32xf32>
    tpu.vector_store %arg7[%c0_355, %c0_356], %688 {strides = array<i32>} : memref<8x32xf32, #tpu.memory_space<vmem>>, vector<8x32xf32>,
    %c0_357 = arith.constant 0 : index
    %c0_358 = arith.constant 0 : index
    %725 = vector.load %arg8[%c0_357, %c0_358] : memref<8x32xf32, #tpu.memory_space<vmem>>, vector<8x32xf32>
    tpu.vector_store %arg8[%c0_357, %c0_358], %722 {strides = array<i32>} : memref<8x32xf32, #tpu.memory_space<vmem>>, vector<8x32xf32>,
    %c0_359 = arith.constant 0 : index
    %c0_360 = arith.constant 0 : index
    %726 = vector.load %arg9[%c0_359, %c0_360] : memref<8x32xf32, #tpu.memory_space<vmem>>, vector<8x32xf32>
    tpu.vector_store %arg9[%c0_359, %c0_360], %720 {strides = array<i32>} : memref<8x32xf32, #tpu.memory_space<vmem>>, vector<8x32xf32>,
    %727 = arith.index_cast %c7_i32_319 : i32 to index
    %c0_361 = arith.constant 0 : index
    %c0_362 = arith.constant 0 : index
    %728 = vector.load %arg4[%727, %c0_361, %c0_362] : memref<8x8x32xf32, #tpu.memory_space<vmem>>, vector<1x8x32xf32>
    %729 = vector.shape_cast %728 : vector<1x8x32xf32> to vector<8x32xf32>
    %730 = vector.shape_cast %690 : vector<8x32xf32> to vector<1x8x32xf32>
    tpu.vector_store %arg4[%727, %c0_361, %c0_362], %730 {strides = array<i32>} : memref<8x8x32xf32, #tpu.memory_space<vmem>>, vector<1x8x32xf32>,
    %731 = arith.index_cast %644 : i32 to index
    %c0_363 = arith.constant 0 : index
    %c0_364 = arith.constant 0 : index
    %732 = vector.load %arg5[%731, %c0_363, %c0_364] : memref<8x8x32xf32, #tpu.memory_space<vmem>>, vector<1x8x32xf32>
    %733 = vector.shape_cast %732 : vector<1x8x32xf32> to vector<8x32xf32>
    %734 = vector.shape_cast %722 : vector<8x32xf32> to vector<1x8x32xf32>
    tpu.vector_store %arg5[%731, %c0_363, %c0_364], %734 {strides = array<i32>} : memref<8x8x32xf32, #tpu.memory_space<vmem>>, vector<1x8x32xf32>,
    %c8_i32 = arith.constant 8 : i32
    return
  }
  func.func @transform_0(%arg0: i32) -> (i32, i32, i32) {
    %c0_i32 = arith.constant 0 : i32
    %c0_i32_0 = arith.constant 0 : i32
    %c0_i32_1 = arith.constant 0 : i32
    return %arg0, %c0_i32, %c0_i32_0 : i32, i32, i32
  }
  func.func @transform_1(%arg0: i32) -> (i32, i32, i32) {
    %c0_i32 = arith.constant 0 : i32
    %0 = arith.subi %c0_i32, %arg0 : i32
    %c0_i32_0 = arith.constant 0 : i32
    %c0_i32_1 = arith.constant 0 : i32
    %c0_i32_2 = arith.constant 0 : i32
    return %0, %c0_i32_0, %c0_i32_1 : i32, i32, i32
  }
  func.func @transform_2(%arg0: i32) -> (i32, i32, i32) {
    %c0_i32 = arith.constant 0 : i32
    %c0_i32_0 = arith.constant 0 : i32
    %c0_i32_1 = arith.constant 0 : i32
    %c0_i32_2 = arith.constant 0 : i32
    return %c0_i32, %c0_i32_0, %c0_i32_1 : i32, i32, i32
  }
  func.func @transform_3(%arg0: i32) -> (i32, i32, i32) {
    %c0_i32 = arith.constant 0 : i32
    %c0_i32_0 = arith.constant 0 : i32
    %c0_i32_1 = arith.constant 0 : i32
    return %arg0, %c0_i32, %c0_i32_0 : i32, i32, i32
  }
  func.func @transform_4(%arg0: i32) -> (i32, i32, i32) {
    %c0_i32 = arith.constant 0 : i32
    %0 = arith.subi %c0_i32, %arg0 : i32
    %c0_i32_0 = arith.constant 0 : i32
    %c0_i32_1 = arith.constant 0 : i32
    %c0_i32_2 = arith.constant 0 : i32
    return %0, %c0_i32_0, %c0_i32_1 : i32, i32, i32
  }
}

</mosaic_0001>

<bundles_post_ra>
// kernel: tpu_custom_call.1
= control target key start
LH: loop header
LB: loop body
LE: loop exit
PB: predicated region body
PF: predicated region fallthrough
CT: control target
= control target key end

     0   :  { %10 = vsyncpa [#allocation7], 0  ;;  %s3015_s0 = inlined_call_operand.hbm [shape: bf16[8,8,128], index: 0, kind: input, shape index: {}]   ;;  %s3016_s1 = inlined_call_operand.hbm [shape: bf16[8,8,128], index: 1, kind: input, shape index: {}]   ;;  %s3017_s2 = inlined_call_operand.hbm [shape: f32[2,32,128], index: 2, kind: input, shape index: {}]   ;;  %s3018_s3 = inlined_call_operand.hbm [shape: f32[8,8,32], index: 3, kind: output, shape index: {0}]   ;;  %s3019_s4 = inlined_call_operand.hbm [shape: f32[8,8,32], index: 4, kind: output, shape index: {1}]  }
   0x1   :  { %11 = vsyncpa [#allocation10], 0 }
   0x2   :  { %12 = vsyncpa [#allocation8], 0 }
   0x3   :  { %13 = vsyncpa [#allocation14], 0  ;;  %s2592_s15 = smov [#allocation9]   ;;  %s2593_s17 = smov [#allocation6]  }
   0x4   :  { %s35_s16 = sshll.u32 %s2592_s15, 4  ;;  %s19_s18 = sshll.u32 %s2593_s17, 4  ;;  %s36_s16 = int_to_ptr.vmem [resolvable:$true] %s35_s16  ;;  %s2631_s18 = int_to_ptr.vmem [resolvable:$true] %s19_s18 }
   0x5   :  { %s2474_s21 = scalar_lea.hbm %s3016_s1, 512 }
   0x6   :  { %p2475_p0 = scmp.ne.s32.totalorder %s3016_s1, %s2474_s21  ;;  %p2478_p1 = scmp.lt.u32.totalorder %s2474_s21, %s3016_s1 }
   0x8   :  { %p2480_p2 = pnand %p2478_p1, %p2475_p0 }
   0xa   :  { %2483 = shalt.err (!%p2480_p2)
}
   0xb   :  { %s2484_s26 = scalar_lea.vmem %s36_s16, 512  ;;  %p2489_p4 = scmp.lt.s32.totalorder %s36_s16, %s36_s16 }
   0xc   :  { %p2485_p3 = scmp.ne.s32.totalorder %s36_s16, %s2484_s26  ;;  %p2490_p5 = scmp.lt.s32.totalorder %s2484_s26, %s2484_s26 }
   0xe   :  { %p2491_p6 = por %p2490_p5, %p2489_p4 }
  0x10   :  { %p2492_p7 = pnand %p2491_p6, %p2485_p3 }
  0x12   :  { %2495 = shalt.err (!%p2492_p7)
}
  0x13   :  { %s2594_s27 = smov 64   ;;  %s2595_s28 = smov 4  }
  0x14   :  { %41 = dma.hbm_to_vmem [thread:$0]  %s3016_s1, 512, %s36_s16, [#allocation10], %s2594_s27, %s2594_s27, %s2595_s28  }
  0x15   :  { %s2496_s7 = scalar_lea.hbm %s3015_s0, 512 }
  0x16   :  { %p2497_p8 = scmp.ne.s32.totalorder %s3015_s0, %s2496_s7  ;;  %p2500_p9 = scmp.lt.u32.totalorder %s2496_s7, %s3015_s0 }
  0x18   :  { %p2502_p10 = pnand %p2500_p9, %p2497_p8 }
  0x1a   :  { %2505 = shalt.err (!%p2502_p10)
}
  0x1b   :  { %s2506_s12 = scalar_lea.vmem %s2631_s18, 512  ;;  %p2511_p12 = scmp.lt.s32.totalorder %s2631_s18, %s2631_s18 }
  0x1c   :  { %p2507_p11 = scmp.ne.s32.totalorder %s2631_s18, %s2506_s12  ;;  %p2512_p13 = scmp.lt.s32.totalorder %s2506_s12, %s2506_s12 }
  0x1e   :  { %p2513_p0 = por %p2512_p13, %p2511_p12 }
  0x20   :  { %p2514_p1 = pnand %p2513_p0, %p2507_p11 }
  0x22   :  { %2517 = shalt.err (!%p2514_p1)
}
  0x23   :  { %25 = dma.hbm_to_vmem [thread:$0]  %s3015_s0, 512, %s2631_s18, [#allocation7], %s2594_s27, %s2594_s27, %s2595_s28  }
  0x24   :  { %s2596_s14 = smov [#allocation11]   ;;  %s2518_s19 = scalar_lea.hbm %s3017_s2, 1024 }
  0x25   :  { %s47_s15 = sshll.u32 %s2596_s14, 4  ;;  %p2519_p2 = scmp.ne.s32.totalorder %s3017_s2, %s2518_s19  ;;  %s48_s15 = int_to_ptr.vmem [resolvable:$true] %s47_s15 }
  0x26   :  { %p2522_p3 = scmp.lt.u32.totalorder %s2518_s19, %s3017_s2 }
  0x28   :  { %p2524_p4 = pnand %p2522_p3, %p2519_p2 }
  0x2a   :  { %2527 = shalt.err (!%p2524_p4)
}
  0x2b   :  { %s2528_s24 = scalar_lea.vmem %s48_s15, 1024  ;;  %p2533_p6 = scmp.lt.s32.totalorder %s48_s15, %s48_s15 }
  0x2c   :  { %p2529_p5 = scmp.ne.s32.totalorder %s48_s15, %s2528_s24  ;;  %p2534_p7 = scmp.lt.s32.totalorder %s2528_s24, %s2528_s24 }
  0x2e   :  { %p2535_p8 = por %p2534_p7, %p2533_p6 }
  0x30   :  { %p2536_p9 = pnand %p2535_p8, %p2529_p5 }
  0x32   :  { %2539 = shalt.err (!%p2536_p9)
}
  0x33   :  { %s2597_s0 = smov 128   ;;  %s2598_s18 = smov 8  }
  0x34   :  { %53 = dma.hbm_to_vmem [thread:$0]  %s3017_s2, 1024, %s48_s15, [#allocation10], %s2597_s0, %s2597_s0, %s2598_s18  }
  0x35   :  { %2584 = dma.done.wait [#allocation7], 512  }
  0x36   :  { %2585 = vsyncadd [#allocation7], 4294966784 }
  0x37   :  { %2586 = dma.done.wait [#allocation10], 1536  }
  0x38   :  { %2587 = vsyncadd [#allocation10], 4294965760  ;;  %vm71_vm0 = vcmask 261120   ;;  %v2599_v0 = vmov 0.0|0.0   ;;  %v2600_v1 = vmov 0.0   ;;  %vm2601_vm1 = vmmov 0  }
  0x39   :  { %2268 = vmatprep.subr.bf16.mxu0 %v2599_v0  ;;  %2274 = vmatprep.subr.bf16.mxu1 %v2599_v0  ;;  %72 = vst.msk [vmem:[#allocation2] sm:$0xff] %vm71_vm0, %v2600_v1  ;;  %73 = vst.msk [vmem:[#allocation3] sm:$0xff] %vm71_vm0, %v2600_v1  ;;  %v76_v2 = vld [vmem:[#allocation11] sm:$0xff]  ;;  %v77_v3 = vld [vmem:[#allocation11 + $0x8] sm:$0xff]  ;;  %s2602_s2 = smov 32   ;;  %s2603_s28 = smov 96  }
  0x3a   :  { %74 = vst.msk [vmem:[#allocation4] sm:$0xff] %vm71_vm0, %v2600_v1  ;;  %75 = vst.msk [vmem:[#allocation5] sm:$0xff] %vm71_vm0, %v2600_v1  ;;  %2100 = vmatprep.mubr.msk.f32.mxu0 %vm2601_vm1, %v2600_v1  ;;  %2111 = vmatprep.mubr.msk.f32.mxu1 %vm2601_vm1, %v2600_v1  ;;  %v81_v4 = vld [vmem:[#allocation11 + $0x20] sm:$0xff]  ;;  %v2695_v5 = vpack.c.bf16 %v77_v3, %v76_v2  ;;  %v82_v6 = vld [vmem:[#allocation11 + $0x28] sm:$0xff]  ;;  %s2604_s29 = smov [#allocation12]   ;;  %s2605_s5 = smov [#allocation13]  }
  0x3b   :  { %v78_v7 = vld [vmem:[#allocation11 + $0x10] sm:$0xff]  ;;  %v79_v8 = vld [vmem:[#allocation11 + $0x18] sm:$0xff]  ;;  %v2697_v9 = vpack.c.bf16 %v82_v6, %v81_v4  ;;  %v2727_v18 = vld [vmem:[#allocation6] sm:$0xff]   ;;  %s1959_s30 = sshll.u32 %s2604_s29, 4  ;;  %s1975_s6 = sshll.u32 %s2605_s5, 4  ;;  %s1960_s30 = int_to_ptr.vmem [resolvable:$true] %s1959_s30  ;;  %s1976_s6 = int_to_ptr.vmem [resolvable:$true] %s1975_s6 }
  0x3c   :  { %v83_v10 = vld [vmem:[#allocation11 + $0x30] sm:$0xff]  ;;  %v84_v11 = vld [vmem:[#allocation11 + $0x38] sm:$0xff]  ;;  %2270 = vmatpush3.bf16.msra.mxu0 %v2695_v5  ;;  %v2700_v12 = vpack.c.bf16 %v79_v8, %v78_v7  ;;  %v86_v20 = vunpack.c.l.bf16 %v2727_v18  ;;  %v320_v62 = vunpack.c.h.bf16 %v2727_v18  ;;  %p2545_p11 = scmp.lt.s32.totalorder %s1960_s30, %s1960_s30 }
  0x3d   :  { %2271 = vmatprep.subr.bf16.mxu0 %v2599_v0  ;;  %2276 = vmatpush3.bf16.msra.mxu1 %v2697_v9  ;;  %v2704_v14 = vpack.c.bf16 %v84_v11, %v83_v10  ;;  %v2729_v19 = vld [vmem:[#allocation9 + $0x18] sm:$0xff]  }
  0x3e   :  { %2277 = vmatprep.subr.bf16.mxu1 %v2599_v0  ;;  %v165_v21 = vunpack.c.h.bf16 %v2729_v19  ;;  %v398_v4 = vunpack.c.l.bf16 %v2729_v19 }
  0x40   :  { %v241_v13 = vld [vmem:[#allocation3] sm:$0xff]  ;;  %2273 = vmatpush3.bf16.msra.mxu0 %v2700_v12  ;;  %v87_v16 = vld [vmem:[#allocation2] sm:$0xff] }
  0x41   :  { %248 = vrot.lane.b32.xlu1 %v241_v13, %s2602_s2  ;;  %v268_v15 = vld [vmem:[#allocation5] sm:$0xff]  ;;  %2279 = vmatpush3.bf16.msra.mxu1 %v2704_v14  ;;  %v166_v17 = vld [vmem:[#allocation4] sm:$0xff] }
  0x42   :  { %2280 = vmatprep.subr.bf16.mxu0 %v2599_v0  ;;  %2286 = vmatprep.subr.bf16.mxu1 %v2599_v0 }
  0x43   :  { %2101 = vmatmul.mubr.msk.f32.vlgmr.msra.gmra.mrb[0].mxu0 %vm71_vm0, %v87_v16 }
  0x44   :  { %2112 = vmatmul.mubr.msk.f32.vlgmr.msra.gmra.mrb[0].mxu1 %vm71_vm0, %v166_v17  ;;  %2282 = vmatpush3.bf16.msra.mxu0 %v2695_v5 }
  0x45   :  { %275 = vrot.lane.b32.xlu1 %v268_v15, %s2602_s2  ;;  %2283 = vmatprep.subr.bf16.mxu0 %v2599_v0 }
  0x46   :  { %2288 = vmatpush3.bf16.msra.mxu1 %v2697_v9  ;;  %2122 = vmatprep.mubr.msk.f32.mxu0 %vm2601_vm1, %v2600_v1 }
  0x47   :  { %2289 = vmatprep.subr.bf16.mxu1 %v2599_v0  ;;  %2133 = vmatprep.mubr.msk.f32.mxu1 %vm2601_vm1, %v2600_v1 }
  0x48   :  { %2285 = vmatpush3.bf16.msra.mxu0 %v2700_v12 }
  0x49   :  { %2292 = vmatprep.subr.bf16.mxu0 %v2599_v0 }
  0x4a   :  { %2291 = vmatpush3.bf16.msra.mxu1 %v2704_v14 }
  0x4b   :  { %2298 = vmatprep.subr.bf16.mxu1 %v2599_v0 }
  0xb3   :  { %v249_v42 = vpop.permute.xlu1 %248 }
  0xb7   :  { %v276_v44 = vpop.permute.xlu1 %275 }
 0x116   :  { %v158_v22 = vpop.f32.mrb[0].mxu0 }
 0x117   :  { %v162_v23 = vadd.f32 %v158_v22, %v86_v20  ;;  %v2102_v24 = vpop.f32.mrb[1].mxu0  ;;  %v236_v25 = vpop.f32.mrb[0].mxu1 }
 0x118   :  { %v240_v26 = vadd.f32 %v236_v25, %v165_v21  ;;  %v2113_v27 = vpop.f32.mrb[1].mxu1 }
 0x119   :  { %2378 = vtanh.f32 %v162_v23  ;;  %v242_v30 = vmul.f32 0.5, %v162_v23 }
 0x11a   :  { %2380 = vtanh.f32 %v240_v26  ;;  %v269_v31 = vmul.f32 0.5, %v240_v26 }
 0x11b   :  { %2382 = vtanh.f32 %v242_v30 }
 0x11c   :  { %2384 = vtanh.f32 %v269_v31 }
 0x123   :  { %v2379_v28 = vpop.eup %2378 }
 0x124   :  { %253 = vrot.lane.b32.xlu0 %v2379_v28, %s2594_s27  ;;  %v2381_v29 = vpop.eup %2380 }
 0x125   :  { %v2383_v32 = vpop.eup %2382 }
 0x126   :  { %v244_v33 = vmul.f32 0.5, %v2383_v32  ;;  %v2385_v34 = vpop.eup %2384 }
 0x127   :  { %v271_v36 = vmul.f32 0.5, %v2385_v34 }
 0x128   :  { %280 = vrot.lane.b32.xlu0 %v2381_v29, %s2594_s27  ;;  %v245_v35 = vadd.f32 0.5, %v244_v33 }
 0x129   :  { %v272_v39 = vadd.f32 0.5, %v271_v36 }
 0x12a   :  { %v251_v43 = vmul.f32 %v249_v42, %v245_v35 }
 0x12b   :  { %v278_v47 = vmul.f32 %v276_v44, %v272_v39 }
 0x196   :  { %v254_v37 = vpop.permute.xlu0 %253 }
 0x197   :  { %v256_v38 = vmul.f32 %v254_v37, %v245_v35 }
 0x199   :  { %258 = vrot.lane.b32.xlu0 %v256_v38, %s2602_s2 }
 0x19a   :  { %v281_v40 = vpop.permute.xlu0 %280 }
 0x19b   :  { %v283_v41 = vmul.f32 %v281_v40, %v272_v39 }
 0x19d   :  { %285 = vrot.lane.b32.xlu1 %v283_v41, %s2602_s2 }
 0x20b   :  { %v259_v45 = vpop.permute.xlu0 %258 }
 0x20c   :  { %v261_v46 = vadd.f32 %v259_v45, %v251_v43 }
 0x20e   :  { %2386 = vtanh.f32 %v261_v46 }
 0x20f   :  { %v286_v48 = vpop.permute.xlu1 %285 }
 0x210   :  { %v288_v49 = vadd.f32 %v286_v48, %v278_v47  ;;  %v2797_v48 = vld [vmem:[#allocation6 + $0x8] sm:$0xff]  }
 0x212   :  { %2388 = vtanh.f32 %v288_v49 }
 0x218   :  { %v2387_v50 = vpop.eup %2386 }
 0x219   :  { %264 = vrot.lane.b32.xlu0 %v2387_v50, %s2594_s27  ;;  %v2800_v50 = vld [vmem:[#allocation9 + $0x10] sm:$0xff]  }
 0x21c   :  { %v2389_v51 = vpop.eup %2388 }
 0x21d   :  { %291 = vrot.lane.b32.xlu1 %v2389_v51, %s2594_s27 }
 0x28b   :  { %v265_v52 = vpop.permute.xlu0 %264 }
 0x28c   :  { %v267_v53 = vmul.f32 %v265_v52, %v245_v35 }
 0x28e   :  { %296 = vrot.lane.b32.xlu0 %v267_v53, %s2602_s2 }
 0x28f   :  { %v292_v54 = vpop.permute.xlu1 %291 }
 0x290   :  { %v294_v55 = vmul.f32 %v292_v54, %v272_v39  ;;  %v632_v54 = vunpack.c.h.bf16 %v2800_v50 }
 0x292   :  { %306 = vrot.lane.b32.xlu1 %v294_v55, %s2602_s2  ;;  %301 = vrot.lane.b32.xlu0 %v261_v46, %s2603_s28 }
 0x296   :  { %311 = vrot.lane.b32.xlu1 %v288_v49, %s2603_s28  ;;  %v554_v49 = vunpack.c.l.bf16 %v2797_v48 }
 0x300   :  { %v297_v56 = vpop.permute.xlu0 %296 }
 0x301   :  { %299 = vst.msk [vmem:[#allocation2] sm:$0xff] %vm71_vm0, %v297_v56  ;;  %315 = vst.msk [vmem:[#allocation12] sm:$0xff] %vm71_vm0, %v297_v56 }
 0x304   :  { %v307_v57 = vpop.permute.xlu1 %306  ;;  %v302_v58 = vpop.permute.xlu0 %301 }
 0x305   :  { %309 = vst.msk [vmem:[#allocation4] sm:$0xff] %vm71_vm0, %v307_v57  ;;  %317 = vst.msk [vmem:[#allocation13 + $0x38] sm:$0xff] %vm71_vm0, %v307_v57 }
 0x306   :  { %304 = vst.msk [vmem:[#allocation3] sm:$0xff] %vm71_vm0, %v302_v58 }
 0x308   :  { %v312_v59 = vpop.permute.xlu1 %311  ;;  %v321_v60 = vld [vmem:[#allocation2] sm:$0xff] }
 0x309   :  { %314 = vst.msk [vmem:[#allocation5] sm:$0xff] %vm71_vm0, %v312_v59  ;;  %2123 = vmatmul.mubr.msk.f32.vlgmr.msra.gmra.mrb[2].mxu0 %vm71_vm0, %v321_v60 }
 0x30a   :  { %2294 = vmatpush3.bf16.msra.mxu0 %v2695_v5  ;;  %2144 = vmatprep.mubr.msk.f32.mxu0 %vm2601_vm1, %v2600_v1 }
 0x30b   :  { %2295 = vmatprep.subr.bf16.mxu0 %v2599_v0 }
 0x30c   :  { %v399_v61 = vld [vmem:[#allocation4] sm:$0xff] }
 0x30d   :  { %2134 = vmatmul.mubr.msk.f32.vlgmr.msra.gmra.mrb[2].mxu1 %vm71_vm0, %v399_v61  ;;  %v474_v13 = vld [vmem:[#allocation3] sm:$0xff] }
 0x30e   :  { %2297 = vmatpush3.bf16.msra.mxu0 %v2700_v12  ;;  %2300 = vmatpush3.bf16.msra.mxu1 %v2697_v9 }
 0x30f   :  { %2301 = vmatprep.subr.bf16.mxu1 %v2599_v0  ;;  %2155 = vmatprep.mubr.msk.f32.mxu1 %vm2601_vm1, %v2600_v1 }
 0x310   :  { %2304 = vmatprep.subr.bf16.mxu0 %v2599_v0  ;;  %v501_v15 = vld [vmem:[#allocation5] sm:$0xff] }
 0x312   :  { %2303 = vmatpush3.bf16.msra.mxu1 %v2704_v14 }
 0x313   :  { %2310 = vmatprep.subr.bf16.mxu1 %v2599_v0 }
 0x3dc   :  { %v391_v63 = vpop.f32.mrb[2].mxu0 }
 0x3dd   :  { %v395_v2 = vadd.f32 %v391_v63, %v320_v62  ;;  %v2124_v3 = vpop.f32.mrb[3].mxu0 }
 0x3df   :  { %2390 = vtanh.f32 %v395_v2  ;;  %v475_v16 = vmul.f32 0.5, %v395_v2 }
 0x3e0   :  { %v469_v6 = vpop.f32.mrb[2].mxu1 }
 0x3e1   :  { %v473_v7 = vadd.f32 %v469_v6, %v398_v4  ;;  %v2135_v8 = vpop.f32.mrb[3].mxu1 }
 0x3e3   :  { %2392 = vtanh.f32 %v473_v7  ;;  %v502_v17 = vmul.f32 0.5, %v473_v7 }
 0x3e4   :  { %2394 = vtanh.f32 %v475_v16 }
 0x3e5   :  { %2396 = vtanh.f32 %v502_v17 }
 0x3e9   :  { %v2391_v10 = vpop.eup %2390 }
 0x3ea   :  { %486 = vrot.lane.b32.xlu0 %v2391_v10, %s2594_s27 }
 0x3ed   :  { %v2393_v11 = vpop.eup %2392 }
 0x3ee   :  { %513 = vrot.lane.b32.xlu1 %v2393_v11, %s2594_s27  ;;  %481 = vrot.lane.b32.xlu0 %v474_v13, %s2602_s2  ;;  %v2395_v18 = vpop.eup %2394 }
 0x3ef   :  { %v477_v19 = vmul.f32 0.5, %v2395_v18  ;;  %v2397_v20 = vpop.eup %2396 }
 0x3f0   :  { %v504_v22 = vmul.f32 0.5, %v2397_v20 }
 0x3f1   :  { %v478_v21 = vadd.f32 0.5, %v477_v19 }
 0x3f2   :  { %508 = vrot.lane.b32.xlu1 %v501_v15, %s2602_s2  ;;  %v505_v25 = vadd.f32 0.5, %v504_v22 }
 0x45c   :  { %v487_v23 = vpop.permute.xlu0 %486 }
 0x45d   :  { %v489_v24 = vmul.f32 %v487_v23, %v478_v21 }
 0x45f   :  { %491 = vrot.lane.b32.xlu0 %v489_v24, %s2602_s2 }
 0x460   :  { %v514_v26 = vpop.permute.xlu1 %513  ;;  %v482_v28 = vpop.permute.xlu0 %481 }
 0x461   :  { %v516_v27 = vmul.f32 %v514_v26, %v505_v25  ;;  %v484_v29 = vmul.f32 %v482_v28, %v478_v21 }
 0x463   :  { %518 = vrot.lane.b32.xlu1 %v516_v27, %s2602_s2 }
 0x464   :  { %v509_v30 = vpop.permute.xlu1 %508 }
 0x465   :  { %v511_v33 = vmul.f32 %v509_v30, %v505_v25 }
 0x4d1   :  { %v492_v31 = vpop.permute.xlu0 %491 }
 0x4d2   :  { %v494_v32 = vadd.f32 %v492_v31, %v484_v29 }
 0x4d4   :  { %2398 = vtanh.f32 %v494_v32 }
 0x4d5   :  { %v519_v34 = vpop.permute.xlu1 %518 }
 0x4d6   :  { %v521_v35 = vadd.f32 %v519_v34, %v511_v33 }
 0x4d8   :  { %2400 = vtanh.f32 %v521_v35 }
 0x4de   :  { %v2399_v36 = vpop.eup %2398 }
 0x4df   :  { %497 = vrot.lane.b32.xlu0 %v2399_v36, %s2594_s27  ;;  %v788_v36 = vunpack.c.h.bf16 %v2797_v48 }
 0x4e2   :  { %v2401_v37 = vpop.eup %2400 }
 0x4e3   :  { %524 = vrot.lane.b32.xlu1 %v2401_v37, %s2594_s27 }
 0x551   :  { %v498_v38 = vpop.permute.xlu0 %497 }
 0x552   :  { %v500_v39 = vmul.f32 %v498_v38, %v478_v21 }
 0x554   :  { %529 = vrot.lane.b32.xlu0 %v500_v39, %s2602_s2 }
 0x555   :  { %v525_v40 = vpop.permute.xlu1 %524 }
 0x556   :  { %v527_v41 = vmul.f32 %v525_v40, %v505_v25  ;;  %v866_v40 = vunpack.c.l.bf16 %v2800_v50 }
 0x558   :  { %539 = vrot.lane.b32.xlu1 %v527_v41, %s2602_s2  ;;  %534 = vrot.lane.b32.xlu0 %v494_v32, %s2603_s28 }
 0x55c   :  { %544 = vrot.lane.b32.xlu1 %v521_v35, %s2603_s28 }
 0x5c6   :  { %v530_v42 = vpop.permute.xlu0 %529 }
 0x5c7   :  { %532 = vst.msk [vmem:[#allocation2] sm:$0xff] %vm71_vm0, %v530_v42  ;;  %549 = vst.msk [vmem:[#allocation12 + $0x8] sm:$0xff] %vm71_vm0, %v530_v42 }
 0x5ca   :  { %v540_v43 = vpop.permute.xlu1 %539  ;;  %v535_v44 = vpop.permute.xlu0 %534 }
 0x5cb   :  { %542 = vst.msk [vmem:[#allocation4] sm:$0xff] %vm71_vm0, %v540_v43  ;;  %551 = vst.msk [vmem:[#allocation13 + $0x30] sm:$0xff] %vm71_vm0, %v540_v43 }
 0x5cc   :  { %537 = vst.msk [vmem:[#allocation3] sm:$0xff] %vm71_vm0, %v535_v44 }
 0x5ce   :  { %v545_v45 = vpop.permute.xlu1 %544  ;;  %v555_v46 = vld [vmem:[#allocation2] sm:$0xff] }
 0x5cf   :  { %547 = vst.msk [vmem:[#allocation5] sm:$0xff] %vm71_vm0, %v545_v45  ;;  %2145 = vmatmul.mubr.msk.f32.vlgmr.msra.gmra.mrb[4].mxu0 %vm71_vm0, %v555_v46 }
 0x5d0   :  { %2306 = vmatpush3.bf16.msra.mxu0 %v2695_v5  ;;  %2166 = vmatprep.mubr.msk.f32.mxu0 %vm2601_vm1, %v2600_v1 }
 0x5d1   :  { %2307 = vmatprep.subr.bf16.mxu0 %v2599_v0 }
 0x5d2   :  { %v633_v47 = vld [vmem:[#allocation4] sm:$0xff] }
 0x5d3   :  { %2156 = vmatmul.mubr.msk.f32.vlgmr.msra.gmra.mrb[4].mxu1 %vm71_vm0, %v633_v47  ;;  %v708_v60 = vld [vmem:[#allocation3] sm:$0xff] }
 0x5d4   :  { %2309 = vmatpush3.bf16.msra.mxu0 %v2700_v12  ;;  %2312 = vmatpush3.bf16.msra.mxu1 %v2697_v9 }
 0x5d5   :  { %2313 = vmatprep.subr.bf16.mxu1 %v2599_v0  ;;  %2177 = vmatprep.mubr.msk.f32.mxu1 %vm2601_vm1, %v2600_v1 }
 0x5d6   :  { %2316 = vmatprep.subr.bf16.mxu0 %v2599_v0  ;;  %v735_v61 = vld [vmem:[#allocation5] sm:$0xff] }
 0x5d8   :  { %2315 = vmatpush3.bf16.msra.mxu1 %v2704_v14 }
 0x5d9   :  { %2322 = vmatprep.subr.bf16.mxu1 %v2599_v0 }
 0x6a2   :  { %v625_v51 = vpop.f32.mrb[4].mxu0 }
 0x6a3   :  { %v629_v52 = vadd.f32 %v625_v51, %v554_v49  ;;  %v2146_v53 = vpop.f32.mrb[5].mxu0 }
 0x6a5   :  { %2402 = vtanh.f32 %v629_v52  ;;  %v709_v62 = vmul.f32 0.5, %v629_v52 }
 0x6a6   :  { %v703_v55 = vpop.f32.mrb[4].mxu1 }
 0x6a7   :  { %v707_v56 = vadd.f32 %v703_v55, %v632_v54  ;;  %v2157_v57 = vpop.f32.mrb[5].mxu1 }
 0x6a9   :  { %2404 = vtanh.f32 %v707_v56  ;;  %v736_v63 = vmul.f32 0.5, %v707_v56 }
 0x6aa   :  { %2406 = vtanh.f32 %v709_v62 }
 0x6ab   :  { %2408 = vtanh.f32 %v736_v63 }
 0x6af   :  { %v2403_v58 = vpop.eup %2402 }
 0x6b0   :  { %720 = vrot.lane.b32.xlu0 %v2403_v58, %s2594_s27 }
 0x6b3   :  { %v2405_v59 = vpop.eup %2404 }
 0x6b4   :  { %747 = vrot.lane.b32.xlu1 %v2405_v59, %s2594_s27  ;;  %715 = vrot.lane.b32.xlu0 %v708_v60, %s2602_s2  ;;  %v2407_v2 = vpop.eup %2406 }
 0x6b5   :  { %v711_v3 = vmul.f32 0.5, %v2407_v2  ;;  %v2409_v4 = vpop.eup %2408 }
 0x6b6   :  { %v738_v7 = vmul.f32 0.5, %v2409_v4 }
 0x6b7   :  { %v712_v6 = vadd.f32 0.5, %v711_v3 }
 0x6b8   :  { %742 = vrot.lane.b32.xlu1 %v735_v61, %s2602_s2  ;;  %v739_v11 = vadd.f32 0.5, %v738_v7 }
 0x722   :  { %v721_v8 = vpop.permute.xlu0 %720 }
 0x723   :  { %v723_v10 = vmul.f32 %v721_v8, %v712_v6 }
 0x725   :  { %725 = vrot.lane.b32.xlu0 %v723_v10, %s2602_s2 }
 0x726   :  { %v748_v13 = vpop.permute.xlu1 %747  ;;  %v716_v16 = vpop.permute.xlu0 %715 }
 0x727   :  { %v750_v15 = vmul.f32 %v748_v13, %v739_v11  ;;  %v718_v17 = vmul.f32 %v716_v16, %v712_v6 }
 0x729   :  { %752 = vrot.lane.b32.xlu1 %v750_v15, %s2602_s2 }
 0x72a   :  { %v743_v18 = vpop.permute.xlu1 %742 }
 0x72b   :  { %v745_v21 = vmul.f32 %v743_v18, %v739_v11 }
 0x797   :  { %v726_v19 = vpop.permute.xlu0 %725 }
 0x798   :  { %v728_v20 = vadd.f32 %v726_v19, %v718_v17 }
 0x79a   :  { %2410 = vtanh.f32 %v728_v20 }
 0x79b   :  { %v753_v22 = vpop.permute.xlu1 %752 }
 0x79c   :  { %v755_v23 = vadd.f32 %v753_v22, %v745_v21  ;;  %v2869_v22 = vld [vmem:[#allocation6 + $0x10] sm:$0xff]  }
 0x79e   :  { %2412 = vtanh.f32 %v755_v23 }
 0x7a4   :  { %v2411_v24 = vpop.eup %2410 }
 0x7a5   :  { %731 = vrot.lane.b32.xlu0 %v2411_v24, %s2594_s27  ;;  %v2872_v24 = vld [vmem:[#allocation9 + $0x8] sm:$0xff]  }
 0x7a8   :  { %v2413_v25 = vpop.eup %2412 }
 0x7a9   :  { %758 = vrot.lane.b32.xlu1 %v2413_v25, %s2594_s27 }
 0x817   :  { %v732_v26 = vpop.permute.xlu0 %731 }
 0x818   :  { %v734_v27 = vmul.f32 %v732_v26, %v712_v6 }
 0x81a   :  { %763 = vrot.lane.b32.xlu0 %v734_v27, %s2602_s2 }
 0x81b   :  { %v759_v28 = vpop.permute.xlu1 %758 }
 0x81c   :  { %v761_v29 = vmul.f32 %v759_v28, %v739_v11  ;;  %v1100_v28 = vunpack.c.h.bf16 %v2872_v24 }
 0x81e   :  { %773 = vrot.lane.b32.xlu1 %v761_v29, %s2602_s2  ;;  %768 = vrot.lane.b32.xlu0 %v728_v20, %s2603_s28 }
 0x822   :  { %778 = vrot.lane.b32.xlu1 %v755_v23, %s2603_s28  ;;  %v1022_v23 = vunpack.c.l.bf16 %v2869_v22 }
 0x88c   :  { %v764_v30 = vpop.permute.xlu0 %763 }
 0x88d   :  { %766 = vst.msk [vmem:[#allocation2] sm:$0xff] %vm71_vm0, %v764_v30  ;;  %783 = vst.msk [vmem:[#allocation12 + $0x10] sm:$0xff] %vm71_vm0, %v764_v30 }
 0x890   :  { %v774_v31 = vpop.permute.xlu1 %773  ;;  %v769_v32 = vpop.permute.xlu0 %768 }
 0x891   :  { %776 = vst.msk [vmem:[#allocation4] sm:$0xff] %vm71_vm0, %v774_v31  ;;  %785 = vst.msk [vmem:[#allocation13 + $0x28] sm:$0xff] %vm71_vm0, %v774_v31 }
 0x892   :  { %771 = vst.msk [vmem:[#allocation3] sm:$0xff] %vm71_vm0, %v769_v32 }
 0x894   :  { %v779_v33 = vpop.permute.xlu1 %778  ;;  %v789_v34 = vld [vmem:[#allocation2] sm:$0xff] }
 0x895   :  { %781 = vst.msk [vmem:[#allocation5] sm:$0xff] %vm71_vm0, %v779_v33  ;;  %2167 = vmatmul.mubr.msk.f32.vlgmr.msra.gmra.mrb[6].mxu0 %vm71_vm0, %v789_v34 }
 0x896   :  { %2318 = vmatpush3.bf16.msra.mxu0 %v2695_v5  ;;  %2188 = vmatprep.mubr.msk.f32.mxu0 %vm2601_vm1, %v2600_v1 }
 0x897   :  { %2319 = vmatprep.subr.bf16.mxu0 %v2599_v0 }
 0x898   :  { %v867_v35 = vld [vmem:[#allocation4] sm:$0xff] }
 0x899   :  { %2178 = vmatmul.mubr.msk.f32.vlgmr.msra.gmra.mrb[6].mxu1 %vm71_vm0, %v867_v35  ;;  %v942_v46 = vld [vmem:[#allocation3] sm:$0xff] }
 0x89a   :  { %2321 = vmatpush3.bf16.msra.mxu0 %v2700_v12  ;;  %2324 = vmatpush3.bf16.msra.mxu1 %v2697_v9 }
 0x89b   :  { %2325 = vmatprep.subr.bf16.mxu1 %v2599_v0  ;;  %2199 = vmatprep.mubr.msk.f32.mxu1 %vm2601_vm1, %v2600_v1 }
 0x89c   :  { %2328 = vmatprep.subr.bf16.mxu0 %v2599_v0  ;;  %v969_v47 = vld [vmem:[#allocation5] sm:$0xff] }
 0x89e   :  { %2327 = vmatpush3.bf16.msra.mxu1 %v2704_v14 }
 0x89f   :  { %2334 = vmatprep.subr.bf16.mxu1 %v2599_v0 }
 0x968   :  { %v859_v37 = vpop.f32.mrb[6].mxu0 }
 0x969   :  { %v863_v38 = vadd.f32 %v859_v37, %v788_v36  ;;  %v2168_v39 = vpop.f32.mrb[7].mxu0 }
 0x96b   :  { %2414 = vtanh.f32 %v863_v38  ;;  %v943_v48 = vmul.f32 0.5, %v863_v38 }
 0x96c   :  { %v937_v41 = vpop.f32.mrb[6].mxu1 }
 0x96d   :  { %v941_v42 = vadd.f32 %v937_v41, %v866_v40  ;;  %v2179_v43 = vpop.f32.mrb[7].mxu1 }
 0x96f   :  { %2416 = vtanh.f32 %v941_v42  ;;  %v970_v49 = vmul.f32 0.5, %v941_v42 }
 0x970   :  { %2418 = vtanh.f32 %v943_v48 }
 0x971   :  { %2420 = vtanh.f32 %v970_v49 }
 0x975   :  { %v2415_v44 = vpop.eup %2414 }
 0x976   :  { %954 = vrot.lane.b32.xlu0 %v2415_v44, %s2594_s27 }
 0x979   :  { %v2417_v45 = vpop.eup %2416 }
 0x97a   :  { %981 = vrot.lane.b32.xlu1 %v2417_v45, %s2594_s27  ;;  %949 = vrot.lane.b32.xlu0 %v942_v46, %s2602_s2  ;;  %v2419_v50 = vpop.eup %2418 }
 0x97b   :  { %v945_v51 = vmul.f32 0.5, %v2419_v50  ;;  %v2421_v52 = vpop.eup %2420 }
 0x97c   :  { %v972_v54 = vmul.f32 0.5, %v2421_v52 }
 0x97d   :  { %v946_v53 = vadd.f32 0.5, %v945_v51 }
 0x97e   :  { %976 = vrot.lane.b32.xlu1 %v969_v47, %s2602_s2  ;;  %v973_v57 = vadd.f32 0.5, %v972_v54 }
 0x9e8   :  { %v955_v55 = vpop.permute.xlu0 %954 }
 0x9e9   :  { %v957_v56 = vmul.f32 %v955_v55, %v946_v53 }
 0x9eb   :  { %959 = vrot.lane.b32.xlu0 %v957_v56, %s2602_s2 }
 0x9ec   :  { %v982_v58 = vpop.permute.xlu1 %981  ;;  %v950_v60 = vpop.permute.xlu0 %949 }
 0x9ed   :  { %v984_v59 = vmul.f32 %v982_v58, %v973_v57  ;;  %v952_v61 = vmul.f32 %v950_v60, %v946_v53 }
 0x9ef   :  { %986 = vrot.lane.b32.xlu1 %v984_v59, %s2602_s2 }
 0x9f0   :  { %v977_v62 = vpop.permute.xlu1 %976 }
 0x9f1   :  { %v979_v3 = vmul.f32 %v977_v62, %v973_v57 }
 0xa5d   :  { %v960_v63 = vpop.permute.xlu0 %959 }
 0xa5e   :  { %v962_v2 = vadd.f32 %v960_v63, %v952_v61 }
 0xa60   :  { %2422 = vtanh.f32 %v962_v2 }
 0xa61   :  { %v987_v4 = vpop.permute.xlu1 %986 }
 0xa62   :  { %v989_v6 = vadd.f32 %v987_v4, %v979_v3 }
 0xa64   :  { %2424 = vtanh.f32 %v989_v6 }
 0xa6a   :  { %v2423_v7 = vpop.eup %2422 }
 0xa6b   :  { %965 = vrot.lane.b32.xlu0 %v2423_v7, %s2594_s27  ;;  %v1256_v7 = vunpack.c.h.bf16 %v2869_v22 }
 0xa6e   :  { %v2425_v8 = vpop.eup %2424 }
 0xa6f   :  { %992 = vrot.lane.b32.xlu1 %v2425_v8, %s2594_s27 }
 0xadd   :  { %v966_v10 = vpop.permute.xlu0 %965 }
 0xade   :  { %v968_v11 = vmul.f32 %v966_v10, %v946_v53 }
 0xae0   :  { %997 = vrot.lane.b32.xlu0 %v968_v11, %s2602_s2 }
 0xae1   :  { %v993_v13 = vpop.permute.xlu1 %992 }
 0xae2   :  { %v995_v15 = vmul.f32 %v993_v13, %v973_v57  ;;  %v1334_v13 = vunpack.c.l.bf16 %v2872_v24 }
 0xae4   :  { %1007 = vrot.lane.b32.xlu1 %v995_v15, %s2602_s2  ;;  %1002 = vrot.lane.b32.xlu0 %v962_v2, %s2603_s28 }
 0xae8   :  { %1012 = vrot.lane.b32.xlu1 %v989_v6, %s2603_s28 }
 0xb52   :  { %v998_v16 = vpop.permute.xlu0 %997 }
 0xb53   :  { %1000 = vst.msk [vmem:[#allocation2] sm:$0xff] %vm71_vm0, %v998_v16  ;;  %1017 = vst.msk [vmem:[#allocation12 + $0x18] sm:$0xff] %vm71_vm0, %v998_v16 }
 0xb56   :  { %v1008_v17 = vpop.permute.xlu1 %1007  ;;  %v1003_v18 = vpop.permute.xlu0 %1002 }
 0xb57   :  { %1010 = vst.msk [vmem:[#allocation4] sm:$0xff] %vm71_vm0, %v1008_v17  ;;  %1019 = vst.msk [vmem:[#allocation13 + $0x20] sm:$0xff] %vm71_vm0, %v1008_v17 }
 0xb58   :  { %1005 = vst.msk [vmem:[#allocation3] sm:$0xff] %vm71_vm0, %v1003_v18 }
 0xb5a   :  { %v1013_v19 = vpop.permute.xlu1 %1012  ;;  %v1023_v20 = vld [vmem:[#allocation2] sm:$0xff] }
 0xb5b   :  { %1015 = vst.msk [vmem:[#allocation5] sm:$0xff] %vm71_vm0, %v1013_v19  ;;  %2189 = vmatmul.mubr.msk.f32.vlgmr.msra.gmra.mrb[8].mxu0 %vm71_vm0, %v1023_v20 }
 0xb5c   :  { %2330 = vmatpush3.bf16.msra.mxu0 %v2695_v5  ;;  %2210 = vmatprep.mubr.msk.f32.mxu0 %vm2601_vm1, %v2600_v1 }
 0xb5d   :  { %2331 = vmatprep.subr.bf16.mxu0 %v2599_v0 }
 0xb5e   :  { %v1101_v21 = vld [vmem:[#allocation4] sm:$0xff] }
 0xb5f   :  { %2200 = vmatmul.mubr.msk.f32.vlgmr.msra.gmra.mrb[8].mxu1 %vm71_vm0, %v1101_v21  ;;  %v1176_v34 = vld [vmem:[#allocation3] sm:$0xff] }
 0xb60   :  { %2333 = vmatpush3.bf16.msra.mxu0 %v2700_v12  ;;  %2336 = vmatpush3.bf16.msra.mxu1 %v2697_v9 }
 0xb61   :  { %2337 = vmatprep.subr.bf16.mxu1 %v2599_v0  ;;  %2221 = vmatprep.mubr.msk.f32.mxu1 %vm2601_vm1, %v2600_v1 }
 0xb62   :  { %2340 = vmatprep.subr.bf16.mxu0 %v2599_v0  ;;  %v1203_v35 = vld [vmem:[#allocation5] sm:$0xff] }
 0xb64   :  { %2339 = vmatpush3.bf16.msra.mxu1 %v2704_v14 }
 0xb65   :  { %2346 = vmatprep.subr.bf16.mxu1 %v2599_v0 }
 0xc2e   :  { %v1093_v25 = vpop.f32.mrb[8].mxu0 }
 0xc2f   :  { %v1097_v26 = vadd.f32 %v1093_v25, %v1022_v23  ;;  %v2190_v27 = vpop.f32.mrb[9].mxu0 }
 0xc31   :  { %2426 = vtanh.f32 %v1097_v26  ;;  %v1177_v36 = vmul.f32 0.5, %v1097_v26 }
 0xc32   :  { %v1171_v29 = vpop.f32.mrb[8].mxu1 }
 0xc33   :  { %v1175_v30 = vadd.f32 %v1171_v29, %v1100_v28  ;;  %v2201_v31 = vpop.f32.mrb[9].mxu1 }
 0xc35   :  { %2428 = vtanh.f32 %v1175_v30  ;;  %v1204_v37 = vmul.f32 0.5, %v1175_v30 }
 0xc36   :  { %2430 = vtanh.f32 %v1177_v36 }
 0xc37   :  { %2432 = vtanh.f32 %v1204_v37 }
 0xc3b   :  { %v2427_v32 = vpop.eup %2426 }
 0xc3c   :  { %1188 = vrot.lane.b32.xlu0 %v2427_v32, %s2594_s27 }
 0xc3f   :  { %v2429_v33 = vpop.eup %2428 }
 0xc40   :  { %1215 = vrot.lane.b32.xlu1 %v2429_v33, %s2594_s27  ;;  %1183 = vrot.lane.b32.xlu0 %v1176_v34, %s2602_s2  ;;  %v2431_v38 = vpop.eup %2430 }
 0xc41   :  { %v1179_v39 = vmul.f32 0.5, %v2431_v38  ;;  %v2433_v40 = vpop.eup %2432 }
 0xc42   :  { %v1206_v42 = vmul.f32 0.5, %v2433_v40 }
 0xc43   :  { %v1180_v41 = vadd.f32 0.5, %v1179_v39 }
 0xc44   :  { %1210 = vrot.lane.b32.xlu1 %v1203_v35, %s2602_s2  ;;  %v1207_v45 = vadd.f32 0.5, %v1206_v42 }
 0xcae   :  { %v1189_v43 = vpop.permute.xlu0 %1188 }
 0xcaf   :  { %v1191_v44 = vmul.f32 %v1189_v43, %v1180_v41 }
 0xcb1   :  { %1193 = vrot.lane.b32.xlu0 %v1191_v44, %s2602_s2 }
 0xcb2   :  { %v1216_v46 = vpop.permute.xlu1 %1215  ;;  %v1184_v48 = vpop.permute.xlu0 %1183 }
 0xcb3   :  { %v1218_v47 = vmul.f32 %v1216_v46, %v1207_v45  ;;  %v1186_v49 = vmul.f32 %v1184_v48, %v1180_v41 }
 0xcb5   :  { %1220 = vrot.lane.b32.xlu1 %v1218_v47, %s2602_s2 }
 0xcb6   :  { %v1211_v50 = vpop.permute.xlu1 %1210 }
 0xcb7   :  { %v1213_v53 = vmul.f32 %v1211_v50, %v1207_v45 }
 0xd23   :  { %v1194_v51 = vpop.permute.xlu0 %1193 }
 0xd24   :  { %v1196_v52 = vadd.f32 %v1194_v51, %v1186_v49 }
 0xd26   :  { %2434 = vtanh.f32 %v1196_v52 }
 0xd27   :  { %v1221_v54 = vpop.permute.xlu1 %1220 }
 0xd28   :  { %v1223_v55 = vadd.f32 %v1221_v54, %v1213_v53 }
 0xd2a   :  { %2436 = vtanh.f32 %v1223_v55 }
 0xd30   :  { %v2435_v56 = vpop.eup %2434 }
 0xd31   :  { %1199 = vrot.lane.b32.xlu0 %v2435_v56, %s2594_s27 }
 0xd34   :  { %v2437_v57 = vpop.eup %2436 }
 0xd35   :  { %1226 = vrot.lane.b32.xlu1 %v2437_v57, %s2594_s27 }
 0xda3   :  { %v1200_v58 = vpop.permute.xlu0 %1199 }
 0xda4   :  { %v1202_v59 = vmul.f32 %v1200_v58, %v1180_v41 }
 0xda6   :  { %1231 = vrot.lane.b32.xlu0 %v1202_v59, %s2602_s2 }
 0xda7   :  { %v1227_v60 = vpop.permute.xlu1 %1226 }
 0xda8   :  { %v1229_v61 = vmul.f32 %v1227_v60, %v1207_v45 }
 0xdaa   :  { %1241 = vrot.lane.b32.xlu1 %v1229_v61, %s2602_s2  ;;  %1236 = vrot.lane.b32.xlu0 %v1196_v52, %s2603_s28 }
 0xdae   :  { %1246 = vrot.lane.b32.xlu1 %v1223_v55, %s2603_s28  ;;  %v2942_v55 = vld [vmem:[#allocation9] sm:$0xff]  }
 0xe18   :  { %v1232_v62 = vpop.permute.xlu0 %1231 }
 0xe19   :  { %1234 = vst.msk [vmem:[#allocation2] sm:$0xff] %vm71_vm0, %v1232_v62  ;;  %1251 = vst.msk [vmem:[#allocation12 + $0x20] sm:$0xff] %vm71_vm0, %v1232_v62 }
 0xe1c   :  { %v1242_v63 = vpop.permute.xlu1 %1241  ;;  %v1237_v2 = vpop.permute.xlu0 %1236 }
 0xe1d   :  { %1244 = vst.msk [vmem:[#allocation4] sm:$0xff] %vm71_vm0, %v1242_v63  ;;  %1253 = vst.msk [vmem:[#allocation13 + $0x18] sm:$0xff] %vm71_vm0, %v1242_v63 }
 0xe1e   :  { %1239 = vst.msk [vmem:[#allocation3] sm:$0xff] %vm71_vm0, %v1237_v2 }
 0xe20   :  { %v1247_v3 = vpop.permute.xlu1 %1246  ;;  %v1257_v4 = vld [vmem:[#allocation2] sm:$0xff] }
 0xe21   :  { %1249 = vst.msk [vmem:[#allocation5] sm:$0xff] %vm71_vm0, %v1247_v3  ;;  %2211 = vmatmul.mubr.msk.f32.vlgmr.msra.gmra.mrb[10].mxu0 %vm71_vm0, %v1257_v4 }
 0xe22   :  { %2342 = vmatpush3.bf16.msra.mxu0 %v2695_v5  ;;  %2232 = vmatprep.mubr.msk.f32.mxu0 %vm2601_vm1, %v2600_v1 }
 0xe23   :  { %2343 = vmatprep.subr.bf16.mxu0 %v2599_v0 }
 0xe24   :  { %v1335_v6 = vld [vmem:[#allocation4] sm:$0xff] }
 0xe25   :  { %2222 = vmatmul.mubr.msk.f32.vlgmr.msra.gmra.mrb[10].mxu1 %vm71_vm0, %v1335_v6  ;;  %v1410_v20 = vld [vmem:[#allocation3] sm:$0xff] }
 0xe26   :  { %2345 = vmatpush3.bf16.msra.mxu0 %v2700_v12  ;;  %2348 = vmatpush3.bf16.msra.mxu1 %v2697_v9 }
 0xe27   :  { %2349 = vmatprep.subr.bf16.mxu1 %v2599_v0  ;;  %2243 = vmatprep.mubr.msk.f32.mxu1 %vm2601_vm1, %v2600_v1 }
 0xe28   :  { %2352 = vmatprep.subr.bf16.mxu0 %v2599_v0  ;;  %v1437_v21 = vld [vmem:[#allocation5] sm:$0xff] }
 0xe2a   :  { %2351 = vmatpush3.bf16.msra.mxu1 %v2704_v14 }
 0xe2b   :  { %2358 = vmatprep.subr.bf16.mxu1 %v2599_v0 }
 0xef4   :  { %v1327_v8 = vpop.f32.mrb[10].mxu0 }
 0xef5   :  { %v1331_v10 = vadd.f32 %v1327_v8, %v1256_v7  ;;  %v2212_v11 = vpop.f32.mrb[11].mxu0 }
 0xef7   :  { %2438 = vtanh.f32 %v1331_v10  ;;  %v1411_v22 = vmul.f32 0.5, %v1331_v10 }
 0xef8   :  { %v1405_v15 = vpop.f32.mrb[10].mxu1 }
 0xef9   :  { %v1409_v16 = vadd.f32 %v1405_v15, %v1334_v13  ;;  %v2223_v17 = vpop.f32.mrb[11].mxu1 }
 0xefb   :  { %2440 = vtanh.f32 %v1409_v16  ;;  %v1438_v23 = vmul.f32 0.5, %v1409_v16 }
 0xefc   :  { %2442 = vtanh.f32 %v1411_v22 }
 0xefd   :  { %2444 = vtanh.f32 %v1438_v23 }
 0xf01   :  { %v2439_v18 = vpop.eup %2438 }
 0xf02   :  { %1422 = vrot.lane.b32.xlu0 %v2439_v18, %s2594_s27 }
 0xf05   :  { %v2441_v19 = vpop.eup %2440 }
 0xf06   :  { %1449 = vrot.lane.b32.xlu1 %v2441_v19, %s2594_s27  ;;  %1417 = vrot.lane.b32.xlu0 %v1410_v20, %s2602_s2  ;;  %v2443_v24 = vpop.eup %2442 }
 0xf07   :  { %v1413_v25 = vmul.f32 0.5, %v2443_v24  ;;  %v2445_v26 = vpop.eup %2444 }
 0xf08   :  { %v1440_v28 = vmul.f32 0.5, %v2445_v26 }
 0xf09   :  { %v1414_v27 = vadd.f32 0.5, %v1413_v25 }
 0xf0a   :  { %1444 = vrot.lane.b32.xlu1 %v1437_v21, %s2602_s2  ;;  %v1441_v31 = vadd.f32 0.5, %v1440_v28 }
 0xf74   :  { %v1423_v29 = vpop.permute.xlu0 %1422 }
 0xf75   :  { %v1425_v30 = vmul.f32 %v1423_v29, %v1414_v27 }
 0xf77   :  { %1427 = vrot.lane.b32.xlu0 %v1425_v30, %s2602_s2 }
 0xf78   :  { %v1450_v32 = vpop.permute.xlu1 %1449  ;;  %v1418_v34 = vpop.permute.xlu0 %1417 }
 0xf79   :  { %v1452_v33 = vmul.f32 %v1450_v32, %v1441_v31  ;;  %v1420_v35 = vmul.f32 %v1418_v34, %v1414_v27 }
 0xf7b   :  { %1454 = vrot.lane.b32.xlu1 %v1452_v33, %s2602_s2 }
 0xf7c   :  { %v1445_v36 = vpop.permute.xlu1 %1444 }
 0xf7d   :  { %v1447_v39 = vmul.f32 %v1445_v36, %v1441_v31 }
 0xfe9   :  { %v1428_v37 = vpop.permute.xlu0 %1427 }
 0xfea   :  { %v1430_v38 = vadd.f32 %v1428_v37, %v1420_v35 }
 0xfec   :  { %2446 = vtanh.f32 %v1430_v38 }
 0xfed   :  { %v1455_v40 = vpop.permute.xlu1 %1454 }
 0xfee   :  { %v1457_v41 = vadd.f32 %v1455_v40, %v1447_v39  ;;  %v1801_v40 = vunpack.c.l.bf16 %v2942_v55 }
 0xff0   :  { %2448 = vtanh.f32 %v1457_v41 }
 0xff6   :  { %v2447_v42 = vpop.eup %2446 }
 0xff7   :  { %1433 = vrot.lane.b32.xlu0 %v2447_v42, %s2594_s27 }
 0xffa   :  { %v2449_v43 = vpop.eup %2448 }
 0xffb   :  { %1460 = vrot.lane.b32.xlu1 %v2449_v43, %s2594_s27 }
0x1069   :  { %v1434_v44 = vpop.permute.xlu0 %1433 }
0x106a   :  { %v1436_v45 = vmul.f32 %v1434_v44, %v1414_v27 }
0x106c   :  { %1465 = vrot.lane.b32.xlu0 %v1436_v45, %s2602_s2 }
0x106d   :  { %v1461_v46 = vpop.permute.xlu1 %1460 }
0x106e   :  { %v1463_v47 = vmul.f32 %v1461_v46, %v1441_v31 }
0x1070   :  { %1475 = vrot.lane.b32.xlu1 %v1463_v47, %s2602_s2  ;;  %1470 = vrot.lane.b32.xlu0 %v1430_v38, %s2603_s28 }
0x1074   :  { %1480 = vrot.lane.b32.xlu1 %v1457_v41, %s2603_s28 }
0x10de   :  { %v1466_v48 = vpop.permute.xlu0 %1465 }
0x10df   :  { %1468 = vst.msk [vmem:[#allocation2] sm:$0xff] %vm71_vm0, %v1466_v48  ;;  %1485 = vst.msk [vmem:[#allocation12 + $0x28] sm:$0xff] %vm71_vm0, %v1466_v48 }
0x10e2   :  { %v1476_v49 = vpop.permute.xlu1 %1475  ;;  %v1471_v50 = vpop.permute.xlu0 %1470 }
0x10e3   :  { %1478 = vst.msk [vmem:[#allocation4] sm:$0xff] %vm71_vm0, %v1476_v49  ;;  %1487 = vst.msk [vmem:[#allocation13 + $0x10] sm:$0xff] %vm71_vm0, %v1476_v49 }
0x10e4   :  { %1473 = vst.msk [vmem:[#allocation3] sm:$0xff] %vm71_vm0, %v1471_v50 }
0x10e6   :  { %v1481_v51 = vpop.permute.xlu1 %1480  ;;  %v1491_v52 = vld [vmem:[#allocation2] sm:$0xff] }
0x10e7   :  { %1483 = vst.msk [vmem:[#allocation5] sm:$0xff] %vm71_vm0, %v1481_v51  ;;  %2233 = vmatmul.mubr.msk.f32.vlgmr.msra.gmra.mrb[12].mxu0 %vm71_vm0, %v1491_v52 }
0x10e8   :  { %2354 = vmatpush3.bf16.msra.mxu0 %v2695_v5  ;;  %2254 = vmatprep.mubr.msk.f32.mxu0 %vm2601_vm1, %v2600_v1  ;;  %v2939_v5 = vld [vmem:[#allocation6 + $0x18] sm:$0xff]  }
0x10e9   :  { %2355 = vmatprep.subr.bf16.mxu0 %v2599_v0  ;;  %v1490_v54 = vunpack.c.l.bf16 %v2939_v5  ;;  %v1724_v36 = vunpack.c.h.bf16 %v2939_v5 }
0x10ea   :  { %v1569_v53 = vld [vmem:[#allocation4] sm:$0xff] }
0x10eb   :  { %2244 = vmatmul.mubr.msk.f32.vlgmr.msra.gmra.mrb[12].mxu1 %vm71_vm0, %v1569_v53 }
0x10ec   :  { %2357 = vmatpush3.bf16.msra.mxu0 %v2700_v12  ;;  %2360 = vmatpush3.bf16.msra.mxu1 %v2697_v9  ;;  %v1568_v12 = vunpack.c.h.bf16 %v2942_v55 }
0x10ed   :  { %2361 = vmatprep.subr.bf16.mxu1 %v2599_v0  ;;  %2265 = vmatprep.mubr.msk.f32.mxu1 %vm2601_vm1, %v2600_v1 }
0x10ee   :  { %v1671_v61 = vld [vmem:[#allocation5] sm:$0xff] }
0x10f0   :  { %2363 = vmatpush3.bf16.msra.mxu1 %v2704_v14  ;;  %v1644_v14 = vld [vmem:[#allocation3] sm:$0xff] }
0x11ba   :  { %v1561_v56 = vpop.f32.mrb[12].mxu0 }
0x11bb   :  { %v1565_v57 = vadd.f32 %v1561_v56, %v1490_v54  ;;  %v2234_v58 = vpop.f32.mrb[13].mxu0 }
0x11bd   :  { %2450 = vtanh.f32 %v1565_v57  ;;  %v1645_v62 = vmul.f32 0.5, %v1565_v57 }
0x11be   :  { %v1639_v9 = vpop.f32.mrb[12].mxu1 }
0x11bf   :  { %v1643_v59 = vadd.f32 %v1639_v9, %v1568_v12  ;;  %v2245_v0 = vpop.f32.mrb[13].mxu1 }
0x11c1   :  { %2452 = vtanh.f32 %v1643_v59  ;;  %v1672_v63 = vmul.f32 0.5, %v1643_v59 }
0x11c2   :  { %2454 = vtanh.f32 %v1645_v62 }
0x11c3   :  { %2456 = vtanh.f32 %v1672_v63 }
0x11c7   :  { %v2451_v60 = vpop.eup %2450 }
0x11c8   :  { %1656 = vrot.lane.b32.xlu0 %v2451_v60, %s2594_s27 }
0x11cb   :  { %v2453_v1 = vpop.eup %2452 }
0x11cc   :  { %1683 = vrot.lane.b32.xlu1 %v2453_v1, %s2594_s27  ;;  %1651 = vrot.lane.b32.xlu0 %v1644_v14, %s2602_s2  ;;  %v2455_v2 = vpop.eup %2454 }
0x11cd   :  { %v1647_v3 = vmul.f32 0.5, %v2455_v2  ;;  %v2457_v4 = vpop.eup %2456 }
0x11ce   :  { %v1674_v7 = vmul.f32 0.5, %v2457_v4 }
0x11cf   :  { %v1648_v6 = vadd.f32 0.5, %v1647_v3 }
0x11d0   :  { %1678 = vrot.lane.b32.xlu1 %v1671_v61, %s2602_s2  ;;  %v1675_v11 = vadd.f32 0.5, %v1674_v7 }
0x123a   :  { %v1657_v8 = vpop.permute.xlu0 %1656 }
0x123b   :  { %v1659_v10 = vmul.f32 %v1657_v8, %v1648_v6 }
0x123d   :  { %1661 = vrot.lane.b32.xlu0 %v1659_v10, %s2602_s2 }
0x123e   :  { %v1684_v13 = vpop.permute.xlu1 %1683  ;;  %v1652_v16 = vpop.permute.xlu0 %1651 }
0x123f   :  { %v1686_v15 = vmul.f32 %v1684_v13, %v1675_v11  ;;  %v1654_v17 = vmul.f32 %v1652_v16, %v1648_v6 }
0x1241   :  { %1688 = vrot.lane.b32.xlu1 %v1686_v15, %s2602_s2 }
0x1242   :  { %v1679_v18 = vpop.permute.xlu1 %1678 }
0x1243   :  { %v1681_v21 = vmul.f32 %v1679_v18, %v1675_v11 }
0x12af   :  { %v1662_v19 = vpop.permute.xlu0 %1661 }
0x12b0   :  { %v1664_v20 = vadd.f32 %v1662_v19, %v1654_v17 }
0x12b2   :  { %2458 = vtanh.f32 %v1664_v20 }
0x12b3   :  { %v1689_v22 = vpop.permute.xlu1 %1688 }
0x12b4   :  { %v1691_v23 = vadd.f32 %v1689_v22, %v1681_v21 }
0x12b6   :  { %2460 = vtanh.f32 %v1691_v23 }
0x12bc   :  { %v2459_v24 = vpop.eup %2458 }
0x12bd   :  { %1667 = vrot.lane.b32.xlu0 %v2459_v24, %s2594_s27 }
0x12c0   :  { %v2461_v25 = vpop.eup %2460 }
0x12c1   :  { %1694 = vrot.lane.b32.xlu1 %v2461_v25, %s2594_s27 }
0x132f   :  { %v1668_v26 = vpop.permute.xlu0 %1667 }
0x1330   :  { %v1670_v27 = vmul.f32 %v1668_v26, %v1648_v6 }
0x1332   :  { %1699 = vrot.lane.b32.xlu0 %v1670_v27, %s2602_s2 }
0x1333   :  { %v1695_v28 = vpop.permute.xlu1 %1694 }
0x1334   :  { %v1697_v29 = vmul.f32 %v1695_v28, %v1675_v11 }
0x1336   :  { %1709 = vrot.lane.b32.xlu1 %v1697_v29, %s2602_s2  ;;  %1704 = vrot.lane.b32.xlu0 %v1664_v20, %s2603_s28 }
0x133a   :  { %1714 = vrot.lane.b32.xlu1 %v1691_v23, %s2603_s28 }
0x13a4   :  { %v1700_v30 = vpop.permute.xlu0 %1699 }
0x13a5   :  { %1702 = vst.msk [vmem:[#allocation2] sm:$0xff] %vm71_vm0, %v1700_v30  ;;  %1719 = vst.msk [vmem:[#allocation12 + $0x30] sm:$0xff] %vm71_vm0, %v1700_v30 }
0x13a8   :  { %v1710_v31 = vpop.permute.xlu1 %1709  ;;  %v1705_v32 = vpop.permute.xlu0 %1704 }
0x13a9   :  { %1712 = vst.msk [vmem:[#allocation4] sm:$0xff] %vm71_vm0, %v1710_v31  ;;  %1721 = vst.msk [vmem:[#allocation13 + $0x8] sm:$0xff] %vm71_vm0, %v1710_v31 }
0x13aa   :  { %1707 = vst.msk [vmem:[#allocation3] sm:$0xff] %vm71_vm0, %v1705_v32 }
0x13ac   :  { %v1715_v33 = vpop.permute.xlu1 %1714  ;;  %v1725_v34 = vld [vmem:[#allocation2] sm:$0xff] }
0x13ad   :  { %1717 = vst.msk [vmem:[#allocation5] sm:$0xff] %vm71_vm0, %v1715_v33  ;;  %2255 = vmatmul.mubr.msk.f32.vlgmr.msra.gmra.mrb[14].mxu0 %vm71_vm0, %v1725_v34 }
0x13b0   :  { %v1802_v35 = vld [vmem:[#allocation4] sm:$0xff] }
0x13b1   :  { %2266 = vmatmul.mubr.msk.f32.vlgmr.msra.gmra.mrb[14].mxu1 %vm71_vm0, %v1802_v35  ;;  %v1877_v46 = vld [vmem:[#allocation3] sm:$0xff] }
0x13b4   :  { %v1904_v47 = vld [vmem:[#allocation5] sm:$0xff] }
0x1480   :  { %v1795_v37 = vpop.f32.mrb[14].mxu0 }
0x1481   :  { %v1799_v38 = vadd.f32 %v1795_v37, %v1724_v36  ;;  %v2256_v39 = vpop.f32.mrb[15].mxu0 }
0x1483   :  { %2462 = vtanh.f32 %v1799_v38  ;;  %v1878_v48 = vmul.f32 0.5, %v1799_v38 }
0x1484   :  { %v1872_v41 = vpop.f32.mrb[14].mxu1 }
0x1485   :  { %v1876_v42 = vadd.f32 %v1872_v41, %v1801_v40  ;;  %v2267_v43 = vpop.f32.mrb[15].mxu1 }
0x1487   :  { %2464 = vtanh.f32 %v1876_v42  ;;  %v1905_v49 = vmul.f32 0.5, %v1876_v42 }
0x1488   :  { %2466 = vtanh.f32 %v1878_v48 }
0x1489   :  { %2468 = vtanh.f32 %v1905_v49 }
0x148d   :  { %v2463_v44 = vpop.eup %2462 }
0x148e   :  { %1889 = vrot.lane.b32.xlu0 %v2463_v44, %s2594_s27 }
0x1491   :  { %v2465_v45 = vpop.eup %2464 }
0x1492   :  { %1916 = vrot.lane.b32.xlu1 %v2465_v45, %s2594_s27  ;;  %1884 = vrot.lane.b32.xlu0 %v1877_v46, %s2602_s2  ;;  %v2467_v50 = vpop.eup %2466 }
0x1493   :  { %v1880_v51 = vmul.f32 0.5, %v2467_v50  ;;  %v2469_v52 = vpop.eup %2468 }
0x1494   :  { %v1907_v5 = vmul.f32 0.5, %v2469_v52 }
0x1495   :  { %v1881_v53 = vadd.f32 0.5, %v1880_v51 }
0x1496   :  { %1911 = vrot.lane.b32.xlu1 %v1904_v47, %s2602_s2  ;;  %v1908_v56 = vadd.f32 0.5, %v1907_v5 }
0x1500   :  { %v1890_v54 = vpop.permute.xlu0 %1889 }
0x1501   :  { %v1892_v55 = vmul.f32 %v1890_v54, %v1881_v53 }
0x1503   :  { %1894 = vrot.lane.b32.xlu0 %v1892_v55, %s2602_s2 }
0x1504   :  { %v1917_v57 = vpop.permute.xlu1 %1916  ;;  %v1885_v12 = vpop.permute.xlu0 %1884 }
0x1505   :  { %v1919_v58 = vmul.f32 %v1917_v57, %v1908_v56  ;;  %v1887_v9 = vmul.f32 %v1885_v12, %v1881_v53 }
0x1507   :  { %1921 = vrot.lane.b32.xlu1 %v1919_v58, %s2602_s2 }
0x1508   :  { %v1912_v59 = vpop.permute.xlu1 %1911 }
0x1509   :  { %v1914_v1 = vmul.f32 %v1912_v59, %v1908_v56 }
0x1575   :  { %v1895_v0 = vpop.permute.xlu0 %1894 }
0x1576   :  { %v1897_v60 = vadd.f32 %v1895_v0, %v1887_v9 }
0x1578   :  { %2470 = vtanh.f32 %v1897_v60 }
0x1579   :  { %v1922_v14 = vpop.permute.xlu1 %1921 }
0x157a   :  { %v1924_v61 = vadd.f32 %v1922_v14, %v1914_v1 }
0x157c   :  { %2472 = vtanh.f32 %v1924_v61 }
0x1582   :  { %v2471_v62 = vpop.eup %2470 }
0x1583   :  { %1900 = vrot.lane.b32.xlu0 %v2471_v62, %s2594_s27 }
0x1586   :  { %v2473_v63 = vpop.eup %2472 }
0x1587   :  { %1927 = vrot.lane.b32.xlu1 %v2473_v63, %s2594_s27  ;;  %s2540_s27 = scalar_lea.vmem %s1960_s30, 1024 }
0x1588   :  { %p2541_p10 = scmp.ne.s32.totalorder %s1960_s30, %s2540_s27  ;;  %p2546_p12 = scmp.lt.s32.totalorder %s2540_s27, %s2540_s27 }
0x158a   :  { %p2547_p13 = por %p2546_p12, %p2545_p11 }
0x158c   :  { %p2548_p0 = pnand %p2547_p13, %p2541_p10 }
0x15f5   :  { %v1901_v2 = vpop.permute.xlu0 %1900 }
0x15f6   :  { %v1903_v3 = vmul.f32 %v1901_v2, %v1881_v53 }
0x15f8   :  { %1932 = vrot.lane.b32.xlu0 %v1903_v3, %s2602_s2 }
0x15f9   :  { %v1928_v4 = vpop.permute.xlu1 %1927 }
0x15fa   :  { %v1930_v6 = vmul.f32 %v1928_v4, %v1908_v56 }
0x15fc   :  { %1942 = vrot.lane.b32.xlu1 %v1930_v6, %s2602_s2  ;;  %1937 = vrot.lane.b32.xlu0 %v1897_v60, %s2603_s28 }
0x1600   :  { %1947 = vrot.lane.b32.xlu1 %v1924_v61, %s2603_s28 }
0x166a   :  { %v1933_v7 = vpop.permute.xlu0 %1932 }
0x166b   :  { %1935 = vst.msk [vmem:[#allocation2] sm:$0xff] %vm71_vm0, %v1933_v7  ;;  %1952 = vst.msk [vmem:[#allocation12 + $0x38] sm:$0xff] %vm71_vm0, %v1933_v7 }
0x166c   :  { %2551 = shalt.err (!%p2548_p0)
}
0x166d   :  { %s2552_s9 = scalar_lea.hbm %s3018_s3, 1024 }
0x166e   :  { %p2553_p1 = scmp.ne.s32.totalorder %s3018_s3, %s2552_s9  ;;  %p2556_p2 = scmp.lt.u32.totalorder %s2552_s9, %s3018_s3 }
0x1670   :  { %p2558_p3 = pnand %p2556_p2, %p2553_p1 }
0x1672   :  { %2561 = shalt.err (!%p2558_p3)
}
0x1673   :  { %1965 = dma.vmem_to_hbm [thread:$0]  %s1960_s30, 1024, %s3018_s3, [#allocation8], %s2597_s0, %s2597_s0, %s2598_s18   ;;  %v1943_v8 = vpop.permute.xlu1 %1942  ;;  %v1938_v10 = vpop.permute.xlu0 %1937 }
0x1674   :  { %1945 = vst.msk [vmem:[#allocation4] sm:$0xff] %vm71_vm0, %v1943_v8  ;;  %1953 = vst.msk [vmem:[#allocation13] sm:$0xff] %vm71_vm0, %v1943_v8  ;;  %s2562_s15 = scalar_lea.vmem %s1976_s6, 1024  ;;  %p2567_p5 = scmp.lt.s32.totalorder %s1976_s6, %s1976_s6 }
0x1675   :  { %1940 = vst.msk [vmem:[#allocation3] sm:$0xff] %vm71_vm0, %v1938_v10  ;;  %p2563_p4 = scmp.ne.s32.totalorder %s1976_s6, %s2562_s15  ;;  %p2568_p6 = scmp.lt.s32.totalorder %s2562_s15, %s2562_s15 }
0x1677   :  { %p2569_p7 = por %p2568_p6, %p2567_p5 }
0x1679   :  { %p2570_p8 = pnand %p2569_p7, %p2563_p4 }
0x167b   :  { %2573 = shalt.err (!%p2570_p8)
}
0x167c   :  { %s2574_s3 = scalar_lea.hbm %s3019_s4, 1024 }
0x167d   :  { %p2575_p9 = scmp.ne.s32.totalorder %s3019_s4, %s2574_s3  ;;  %p2578_p10 = scmp.lt.u32.totalorder %s2574_s3, %s3019_s4 }
0x167f   :  { %p2580_p11 = pnand %p2578_p10, %p2575_p9 }
0x1681   :  { %2583 = shalt.err (!%p2580_p11)
}
0x1682   :  { %1981 = dma.vmem_to_hbm [thread:$0]  %s1976_s6, 1024, %s3019_s4, [#allocation14], %s2597_s0, %s2597_s0, %s2598_s18   ;;  %v1948_v11 = vpop.permute.xlu1 %1947 }
0x1683   :  { %1950 = vst.msk [vmem:[#allocation5] sm:$0xff] %vm71_vm0, %v1948_v11 }
0x1684   :  { %2588 = dma.done.wait [#allocation8], 1024  }
0x1685   :  { %2589 = vsyncadd [#allocation8], 4294966272 }
0x1686   :  { %2590 = dma.done.wait [#allocation14], 1024  }
0x1687   :  { %2591 = vsyncadd [#allocation14], 4294966272 }
0x1688   :  { %1988 = vsyncpa [#allocation7], 1 }
0x1689   :  { %1989 = vsyncpa [#allocation10], 1 }
0x168a   :  { %1990 = vsyncpa [#allocation8], 1 }
0x168b   :  { %1991 = vsyncpa [#allocation14], 1 }

</bundles_post_ra>
